<compile_context>
chip_gen: v6e
topology: v6e:2x2x1
jax: 0.10.0
libtpu: 0.0.40
codegen_flags: <defaults>
</compile_context>

<pallas_src>
import jax
import jax.numpy as jnp
from jax.experimental import pallas as pl
from jax.experimental.pallas import tpu as pltpu

IN_FEATURES = 2048
HIDDEN = 1024
CLASSES = 50
CLASSES_PAD = 128          # lane-dense output width (multiple of 128)
MAX_TILE_N = 256           # batch tile (256-aligned edges feed v6e/v7x MXUs)


def _round_up(x, m):
    return (x + m - 1) // m * m


def _mlp_kernel(x_ref, w1_ref, b1_ref, w2_ref, b2_ref, o_ref):
    # fc1: (T, 2048)bf16 @ (2048, 1024)bf16 -> f32 accumulation on the MXU
    h = jnp.dot(x_ref[...], w1_ref[...], preferred_element_type=jnp.float32)
    h = h + b1_ref[...]
    # dropout(p=0.25, training=False) -> identity ; relu
    h = jnp.maximum(h, 0.0)
    # fc2 on the native bf16 MXU path, f32 accumulation, lane-dense 128 cols.
    h = h.astype(jnp.bfloat16)
    out = jnp.dot(h, w2_ref[...], preferred_element_type=jnp.float32)
    out = out + b2_ref[...]
    o_ref[...] = out.astype(o_ref.dtype)


def recoverable_cnn_forward(x, w1_t, b1, w2_t, b2):
    """mode='f' forward: x is any tensor flattening to (-1, 2048)."""
    feature = x.reshape(-1, IN_FEATURES).astype(jnp.bfloat16)
    n = feature.shape[0]
    classes = w2_t.shape[1]

    # Batch tiling: a single small tile for tiny n, 256-row tiles otherwise.
    tile_n = min(MAX_TILE_N, _round_up(n, 16))
    n_pad = _round_up(n, tile_n)
    if n_pad != n:
        feature = jnp.pad(feature, ((0, n_pad - n), (0, 0)))

    # bf16 weights; fc2 weight/bias zero-padded to 128 output lanes.
    w1_b = w1_t.astype(jnp.bfloat16)
    w2_b = jnp.zeros((HIDDEN, CLASSES_PAD), jnp.bfloat16)
    w2_b = w2_b.at[:, :classes].set(w2_t.astype(jnp.bfloat16))
    b1_2d = b1.reshape(1, HIDDEN).astype(jnp.float32)
    b2_2d = jnp.zeros((1, CLASSES_PAD), jnp.float32)
    b2_2d = b2_2d.at[:, :classes].set(b2.astype(jnp.float32))

    out_pad = pl.pallas_call(
        _mlp_kernel,
        out_shape=jax.ShapeDtypeStruct((n_pad, CLASSES_PAD), jnp.float32),
        grid=(n_pad // tile_n,),
        in_specs=[
            pl.BlockSpec((tile_n, IN_FEATURES), lambda i: (i, 0)),
            pl.BlockSpec((IN_FEATURES, HIDDEN), lambda i: (0, 0)),
            pl.BlockSpec((1, HIDDEN), lambda i: (0, 0)),
            pl.BlockSpec((HIDDEN, CLASSES_PAD), lambda i: (0, 0)),
            pl.BlockSpec((1, CLASSES_PAD), lambda i: (0, 0)),
        ],
        out_specs=pl.BlockSpec((tile_n, CLASSES_PAD), lambda i: (i, 0)),
        compiler_params=pltpu.CompilerParams(
            dimension_semantics=("parallel",),      # shards over v7x's 2 TCs
            vmem_limit_bytes=48 * 1024 * 1024,      # fits v7x 64 MiB VMEM
        ),
    )(feature, w1_b, b1_2d, w2_b, b2_2d)

    return out_pad[:n, :classes]


def init_params(key, classes=CLASSES):
    """Deterministic init mirroring nn.Linear's U(-1/sqrt(fan_in), 1/sqrt(fan_in))."""
    k1, k2, k3, k4 = jax.random.split(key, 4)
    bound1 = 1.0 / jnp.sqrt(float(IN_FEATURES))
    bound2 = 1.0 / jnp.sqrt(float(HIDDEN))
    # stored transposed: (in, out)
    w1_t = jax.random.uniform(k1, (IN_FEATURES, HIDDEN), jnp.float32,
                              minval=-bound1, maxval=bound1)
    b1 = jax.random.uniform(k2, (HIDDEN,), jnp.float32,
                            minval=-bound1, maxval=bound1)
    w2_t = jax.random.uniform(k3, (HIDDEN, classes), jnp.float32,
                              minval=-bound2, maxval=bound2)
    b2 = jax.random.uniform(k4, (classes,), jnp.float32,
                            minval=-bound2, maxval=bound2)
    return w1_t, b1, w2_t, b2


def reference_forward(x, w1_t, b1, w2_t, b2):
    """Pure-JAX reference with the same bf16 storage / f32 accumulation."""
    f = x.reshape(-1, IN_FEATURES).astype(jnp.bfloat16)
    h = jnp.dot(f, w1_t.astype(jnp.bfloat16),
                preferred_element_type=jnp.float32) + b1[None, :]
    h = jnp.maximum(h, 0.0).astype(jnp.bfloat16)
    return jnp.dot(h, w2_t.astype(jnp.bfloat16),
                   preferred_element_type=jnp.float32) + b2[None, :]


if __name__ == "__main__":
    key = jax.random.PRNGKey(0)
    kx, kp = jax.random.split(key)

    # mode='f': input is a pre-extracted feature tensor flattening to (-1, 2048)
    batch = 4
    x = jax.random.normal(kx, (batch, IN_FEATURES), jnp.float32)

    w1_t, b1, w2_t, b2 = init_params(kp, CLASSES)

    out = recoverable_cnn_forward(x, w1_t, b1, w2_t, b2)
    out = jax.block_until_ready(out)

    ref = reference_forward(x, w1_t, b1, w2_t, b2)
    assert out.shape == (batch, CLASSES), out.shape
    assert jnp.allclose(out, ref, atol=2e-2, rtol=2e-2), "mismatch vs reference"

    print("KERNEL_OK")
</pallas_src>

<mosaic_0001>
module attributes {stable_mosaic.version = 11 : i64} {
  func.func @_mlp_kernel(%arg0: i32, %arg1: memref<16x2048xbf16, #tpu.memory_space<vmem>>, %arg2: memref<2048x1024xbf16, #tpu.memory_space<vmem>>, %arg3: memref<1x1024xf32, #tpu.memory_space<vmem>>, %arg4: memref<1024x128xbf16, #tpu.memory_space<vmem>>, %arg5: memref<1x128xf32, #tpu.memory_space<vmem>>, %arg6: memref<16x128xf32, #tpu.memory_space<vmem>>) attributes {dimension_semantics = [#tpu.dimension_semantics<parallel>], iteration_bounds = array<i64: 1>, scalar_prefetch = 0 : i64, scratch_operands = 0 : i64, tpu.core_type = #tpu.core_type<tc>, window_params = [{transform_indices = @transform_0, window_bounds = array<i64: 16, 2048>}, {pipeline_mode = #tpu.pipeline_mode<synchronous>, transform_indices = @transform_1, window_bounds = array<i64: 2048, 1024>}, {pipeline_mode = #tpu.pipeline_mode<synchronous>, transform_indices = @transform_2, window_bounds = array<i64: 1, 1024>}, {pipeline_mode = #tpu.pipeline_mode<synchronous>, transform_indices = @transform_3, window_bounds = array<i64: 1024, 128>}, {pipeline_mode = #tpu.pipeline_mode<synchronous>, transform_indices = @transform_4, window_bounds = array<i64: 1, 128>}, {transform_indices = @transform_5, window_bounds = array<i64: 16, 128>}]} {
    %c0 = arith.constant 0 : index
    %c0_0 = arith.constant 0 : index
    %0 = vector.load %arg1[%c0, %c0_0] : memref<16x2048xbf16, #tpu.memory_space<vmem>>, vector<16x2048xbf16>
    %c0_1 = arith.constant 0 : index
    %c0_2 = arith.constant 0 : index
    %1 = vector.load %arg2[%c0_1, %c0_2] : memref<2048x1024xbf16, #tpu.memory_space<vmem>>, vector<2048x1024xbf16>
    %cst = arith.constant dense<0.000000e+00> : vector<16x1024xf32>
    %2 = tpu.matmul %0, %1, %cst {dimension_numbers = #tpu.dot_dimension_numbers<[1], [0], [0], [1], [0, 0, 1, 1], [], []>} : vector<16x2048xbf16>, vector<2048x1024xbf16>, vector<16x1024xf32> -> vector<16x1024xf32>
    %c0_3 = arith.constant 0 : index
    %c0_4 = arith.constant 0 : index
    %3 = vector.load %arg3[%c0_3, %c0_4] : memref<1x1024xf32, #tpu.memory_space<vmem>>, vector<1x1024xf32>
    %4 = vector.broadcast %3 : vector<1x1024xf32> to vector<16x1024xf32>
    %5 = arith.addf %2, %4 : vector<16x1024xf32>
    %cst_5 = arith.constant 0.000000e+00 : f32
    %6 = vector.broadcast %cst_5 : f32 to vector<16x1024xf32>
    %7 = arith.maximumf %5, %6 : vector<16x1024xf32>
    %8 = arith.truncf %7 : vector<16x1024xf32> to vector<16x1024xbf16>
    %c0_6 = arith.constant 0 : index
    %c0_7 = arith.constant 0 : index
    %9 = vector.load %arg4[%c0_6, %c0_7] : memref<1024x128xbf16, #tpu.memory_space<vmem>>, vector<1024x128xbf16>
    %cst_8 = arith.constant dense<0.000000e+00> : vector<16x128xf32>
    %10 = tpu.matmul %8, %9, %cst_8 {dimension_numbers = #tpu.dot_dimension_numbers<[1], [0], [0], [1], [0, 0, 1, 1], [], []>} : vector<16x1024xbf16>, vector<1024x128xbf16>, vector<16x128xf32> -> vector<16x128xf32>
    %c0_9 = arith.constant 0 : index
    %c0_10 = arith.constant 0 : index
    %11 = vector.load %arg5[%c0_9, %c0_10] : memref<1x128xf32, #tpu.memory_space<vmem>>, vector<1x128xf32>
    %12 = vector.broadcast %11 : vector<1x128xf32> to vector<16x128xf32>
    %13 = arith.addf %10, %12 : vector<16x128xf32>
    %c0_11 = arith.constant 0 : index
    %c0_12 = arith.constant 0 : index
    %14 = vector.load %arg6[%c0_11, %c0_12] : memref<16x128xf32, #tpu.memory_space<vmem>>, vector<16x128xf32>
    tpu.vector_store %arg6[%c0_11, %c0_12], %13 {strides = array<i32>} : memref<16x128xf32, #tpu.memory_space<vmem>>, vector<16x128xf32>,
    return
  }
  func.func @transform_0(%arg0: i32) -> (i32, i32) {
    %c0_i32 = arith.constant 0 : i32
    %c0_i32_0 = arith.constant 0 : i32
    return %arg0, %c0_i32 : i32, i32
  }
  func.func @transform_1(%arg0: i32) -> (i32, i32) {
    %c0_i32 = arith.constant 0 : i32
    %c0_i32_0 = arith.constant 0 : i32
    %c0_i32_1 = arith.constant 0 : i32
    return %c0_i32, %c0_i32_0 : i32, i32
  }
  func.func @transform_2(%arg0: i32) -> (i32, i32) {
    %c0_i32 = arith.constant 0 : i32
    %c0_i32_0 = arith.constant 0 : i32
    %c0_i32_1 = arith.constant 0 : i32
    return %c0_i32, %c0_i32_0 : i32, i32
  }
  func.func @transform_3(%arg0: i32) -> (i32, i32) {
    %c0_i32 = arith.constant 0 : i32
    %c0_i32_0 = arith.constant 0 : i32
    %c0_i32_1 = arith.constant 0 : i32
    return %c0_i32, %c0_i32_0 : i32, i32
  }
  func.func @transform_4(%arg0: i32) -> (i32, i32) {
    %c0_i32 = arith.constant 0 : i32
    %c0_i32_0 = arith.constant 0 : i32
    %c0_i32_1 = arith.constant 0 : i32
    return %c0_i32, %c0_i32_0 : i32, i32
  }
  func.func @transform_5(%arg0: i32) -> (i32, i32) {
    %c0_i32 = arith.constant 0 : i32
    %c0_i32_0 = arith.constant 0 : i32
    return %arg0, %c0_i32 : i32, i32
  }
}

</mosaic_0001>

<bundles_post_ra>
// kernel: tpu_custom_call.1
= control target key start
LH: loop header
LB: loop body
LE: loop exit
PB: predicated region body
PF: predicated region fallthrough
CT: control target
= control target key end

     0   :  { %10 = vsyncpa [#allocation3], 0  ;;  %s10354_s0 = inlined_call_operand.hbm [shape: bf16[16,2048], index: 0, kind: input, shape index: {}]   ;;  %s10355_s1 = inlined_call_operand.hbm [shape: bf16[2048,1024], index: 1, kind: input, shape index: {}]   ;;  %s10356_s2 = inlined_call_operand.hbm [shape: f32[1,1024], index: 2, kind: input, shape index: {}]   ;;  %s10357_s3 = inlined_call_operand.hbm [shape: bf16[1024,128], index: 3, kind: input, shape index: {}]   ;;  %s10358_s4 = inlined_call_operand.hbm [shape: f32[1,128], index: 4, kind: input, shape index: {}]   ;;  %s10359_s5 = inlined_call_operand.hbm [shape: f32[16,128], index: 5, kind: output, shape index: {}]  }
   0x1   :  { %11 = vsyncpa [#allocation6], 0 }
   0x2   :  { %12 = vsyncpa [#allocation9], 0 }
   0x3   :  { %13 = vsyncpa [#allocation4], 0  ;;  %s9871_s18 = smov [#allocation5]  }
   0x4   :  { %s31_s19 = sshll.u32 %s9871_s18, 4  ;;  %s32_s19 = int_to_ptr.vmem [resolvable:$true] %s31_s19 }
   0x5   :  { %s9751_s20 = scalar_lea.vmem %s32_s19, 131072  ;;  %p9756_p1 = scmp.lt.s32.totalorder %s32_s19, %s32_s19 }
   0x6   :  { %p9752_p0 = scmp.ne.s32.totalorder %s32_s19, %s9751_s20  ;;  %p9757_p2 = scmp.lt.s32.totalorder %s9751_s20, %s9751_s20 }
   0x8   :  { %p9758_p3 = por %p9757_p2, %p9756_p1 }
   0xa   :  { %p9759_p4 = pnand %p9758_p3, %p9752_p0 }
   0xc   :  { %9762 = shalt.err (!%p9759_p4)
}
   0xd   :  { %s9872_s21 = smov 512   ;;  %s9873_s22 = smov 32  }
   0xe   :  { %37 = dma.hbm_to_vmem [thread:$0]  %s10355_s1, 131072, %s32_s19, [#allocation6], %s9872_s21, %s9872_s21, %s9873_s22  }
   0xf   :  { %s9874_s25 = smov [#allocation8]   ;;  %s9875_s27 = smov [#allocation2]  }
  0x10   :  { %s53_s26 = sshll.u32 %s9874_s25, 4  ;;  %s19_s28 = sshll.u32 %s9875_s27, 4  ;;  %s54_s26 = int_to_ptr.vmem [resolvable:$true] %s53_s26  ;;  %s20_s28 = int_to_ptr.vmem [resolvable:$true] %s19_s28 }
  0x11   :  { %s9771_s29 = scalar_lea.vmem %s54_s26, 8192  ;;  %p9776_p6 = scmp.lt.s32.totalorder %s54_s26, %s54_s26 }
  0x12   :  { %p9772_p5 = scmp.ne.s32.totalorder %s54_s26, %s9771_s29  ;;  %p9777_p7 = scmp.lt.s32.totalorder %s9771_s29, %s9771_s29 }
  0x14   :  { %p9778_p8 = por %p9777_p7, %p9776_p6 }
  0x16   :  { %p9779_p9 = pnand %p9778_p8, %p9772_p5 }
  0x18   :  { %9782 = shalt.err (!%p9779_p9)
}
  0x19   :  { %s9876_s30 = smov 64   ;;  %s9877_s6 = smov 4  }
  0x1a   :  { %59 = dma.hbm_to_vmem [thread:$0]  %s10357_s3, 8192, %s54_s26, [#allocation9], %s9876_s30, %s9876_s30, %s9877_s6  }
  0x1b   :  { %s9791_s1 = scalar_lea.vmem %s20_s28, 2048  ;;  %p9796_p11 = scmp.lt.s32.totalorder %s20_s28, %s20_s28 }
  0x1c   :  { %p9792_p10 = scmp.ne.s32.totalorder %s20_s28, %s9791_s1  ;;  %p9797_p12 = scmp.lt.s32.totalorder %s9791_s1, %s9791_s1 }
  0x1e   :  { %p9798_p13 = por %p9797_p12, %p9796_p11 }
  0x20   :  { %p9799_p0 = pnand %p9798_p13, %p9792_p10 }
  0x22   :  { %9802 = shalt.err (!%p9799_p0)
}
  0x23   :  { %s9878_s9 = smov 1024   ;;  %s9879_s12 = smov [#allocation7]  }
  0x24   :  { %25 = dma.hbm_to_vmem [thread:$0]  %s10354_s0, 2048, %s20_s28, [#allocation3], %s9878_s9, %s9878_s9, %s9876_s30  }
  0x25   :  { %s44_s13 = sshll.u32 %s9879_s12, 4  ;;  %s9880_s14 = smov [#allocation10]   ;;  %s45_s13 = int_to_ptr.vmem [resolvable:$true] %s44_s13 }
  0x26   :  { %s66_s15 = sshll.u32 %s9880_s14, 4  ;;  %s9811_s3 = scalar_lea.vmem %s45_s13, 128  ;;  %s67_s15 = int_to_ptr.vmem [resolvable:$true] %s66_s15 }
  0x27   :  { %p9812_p1 = scmp.ne.s32.totalorder %s45_s13, %s9811_s3  ;;  %p9816_p2 = scmp.lt.s32.totalorder %s45_s13, %s45_s13 }
  0x28   :  { %p9817_p3 = scmp.lt.s32.totalorder %s9811_s3, %s9811_s3 }
  0x2a   :  { %p9818_p4 = por %p9817_p3, %p9816_p2 }
  0x2c   :  { %p9819_p5 = pnand %p9818_p4, %p9812_p1 }
  0x2e   :  { %9822 = shalt.err (!%p9819_p5)
}
  0x2f   :  { %47 = dma.hbm_to_vmem [thread:$0]  %s10356_s2, 128, %s45_s13, [#allocation6]  }
  0x30   :  { %s9831_s18 = scalar_lea.vmem %s67_s15, 16  ;;  %s9835_s0 = scalar_lea.vmem %s67_s15, 32 }
  0x31   :  { %p9832_p6 = scmp.ne.s32.totalorder %s67_s15, %s9831_s18  ;;  %p9836_p7 = scmp.lt.s32.totalorder %s67_s15, %s67_s15 }
  0x32   :  { %p9837_p8 = scmp.lt.s32.totalorder %s9835_s0, %s9831_s18 }
  0x34   :  { %p9838_p9 = por %p9837_p8, %p9836_p7 }
  0x36   :  { %p9839_p10 = pnand %p9838_p9, %p9832_p6 }
  0x38   :  { %9842 = shalt.err (!%p9839_p10)
}
  0x39   :  { %69 = dma.hbm_to_vmem [thread:$0]  %s10358_s4, 16, %s67_s15, [#allocation9]  }
  0x3a   :  { %9863 = dma.done.wait [#allocation3], 2048  }
  0x3b   :  { %9864 = vsyncadd [#allocation3], 4294965248 }
  0x3c   :  { %9865 = dma.done.wait [#allocation6], 131200  }
  0x3d   :  { %9866 = vsyncadd [#allocation6], 4294836096 }
  0x3e   :  { %9867 = dma.done.wait [#allocation9], 8208  }
  0x3f   :  { %9868 = vsyncadd [#allocation9], 4294959088  ;;  %v158_v0 = vld [vmem:[#allocation5 + $0x1c0] sm:$0xff]  ;;  %v9937_v59 = vld [vmem:[#allocation2 + $0x8] sm:$0xff]  ;;  %s9881_s2 = smov [#allocation11]  }
  0x40   :  { %v162_v1 = vld [vmem:[#allocation5 + $0x1e0] sm:$0xff]  ;;  %v9939_v60 = vld [vmem:[#allocation2 + $0x48] sm:$0xff]  ;;  %s8458_s4 = sshll.u32 %s9881_s2, 4  ;;  %s8459_s4 = int_to_ptr.vmem [resolvable:$true] %s8458_s4 }
  0x41   :  { %v286_v2 = vld [vmem:[#allocation5 + $0x5c0] sm:$0xff]  ;;  %v8545_v3 = vcombine.high %v158_v0, %v162_v1  ;;  %v8544_v5 = vcombine.low %v158_v0, %v162_v1  ;;  %v9943_v63 = vcombine.high %v9937_v59, %v9939_v60  ;;  %s9843_s21 = scalar_lea.vmem %s8459_s4, 256  ;;  %p9848_p12 = scmp.lt.s32.totalorder %s8459_s4, %s8459_s4 }
  0x42   :  { %v290_v4 = vld [vmem:[#allocation5 + $0x5e0] sm:$0xff]  ;;  %p9844_p11 = scmp.ne.s32.totalorder %s8459_s4, %s9843_s21  ;;  %p9849_p13 = scmp.lt.s32.totalorder %s9843_s21, %s9843_s21 }
  0x43   :  { %v150_v6 = vld [vmem:[#allocation5 + $0x180] sm:$0xff]  ;;  %v8673_v8 = vcombine.high %v286_v2, %v290_v4  ;;  %v8672_v9 = vcombine.low %v286_v2, %v290_v4  ;;  %6368 = vmatprep.subr.bf16.mxu0 %v8545_v3  ;;  %6443 = vmatprep.mubr.bf16.mxu1 %v9943_v63 }
  0x44   :  { %v154_v7 = vld [vmem:[#allocation5 + $0x1a0] sm:$0xff]  ;;  %6369 = vmatpush1.bf16.msra.mxu0 %v8544_v5  ;;  %p9850_p0 = por %p9849_p13, %p9848_p12 }
  0x45   :  { %v8537_v10 = vcombine.high %v150_v6, %v154_v7  ;;  %v278_v11 = vld [vmem:[#allocation5 + $0x580] sm:$0xff]  ;;  %6411 = vmatprep.subr.bf16.mxu1 %v8673_v8  ;;  %v8536_v18 = vcombine.low %v150_v6, %v154_v7 }
  0x46   :  { %v282_v12 = vld [vmem:[#allocation5 + $0x5a0] sm:$0xff]  ;;  %6412 = vmatpush1.bf16.msra.mxu1 %v8672_v9  ;;  %p9851_p1 = pnand %p9850_p0, %p9844_p11 }
  0x47   :  { %v142_v13 = vld [vmem:[#allocation5 + $0x140] sm:$0xff]  ;;  %v8665_v14 = vcombine.high %v278_v11, %v282_v12  ;;  %6370 = vmatprep.subr.bf16.mxu0 %v8537_v10  ;;  %v8664_v19 = vcombine.low %v278_v11, %v282_v12 }
  0x48   :  { %v146_v15 = vld [vmem:[#allocation5 + $0x160] sm:$0xff]  ;;  %6371 = vmatpush1.bf16.msra.mxu0 %v8536_v18 }
  0x49   :  { %v270_v16 = vld [vmem:[#allocation5 + $0x540] sm:$0xff]  ;;  %v8529_v20 = vcombine.high %v142_v13, %v146_v15  ;;  %6413 = vmatprep.subr.bf16.mxu1 %v8665_v14  ;;  %v8528_v26 = vcombine.low %v142_v13, %v146_v15 }
  0x4a   :  { %v274_v17 = vld [vmem:[#allocation5 + $0x560] sm:$0xff]  ;;  %6414 = vmatpush1.bf16.msra.mxu1 %v8664_v19 }
  0x4b   :  { %v8657_v21 = vcombine.high %v270_v16, %v274_v17  ;;  %v134_v22 = vld [vmem:[#allocation5 + $0x100] sm:$0xff]  ;;  %6372 = vmatprep.subr.bf16.mxu0 %v8529_v20  ;;  %v8656_v27 = vcombine.low %v270_v16, %v274_v17 }
  0x4c   :  { %v138_v23 = vld [vmem:[#allocation5 + $0x120] sm:$0xff]  ;;  %6373 = vmatpush1.bf16.msra.mxu0 %v8528_v26 }
  0x4d   :  { %v262_v24 = vld [vmem:[#allocation5 + $0x500] sm:$0xff]  ;;  %v8521_v28 = vcombine.high %v134_v22, %v138_v23  ;;  %6415 = vmatprep.subr.bf16.mxu1 %v8657_v21  ;;  %v8520_v34 = vcombine.low %v134_v22, %v138_v23 }
  0x4e   :  { %v266_v25 = vld [vmem:[#allocation5 + $0x520] sm:$0xff]  ;;  %6416 = vmatpush1.bf16.msra.mxu1 %v8656_v27 }
  0x4f   :  { %v8649_v29 = vcombine.high %v262_v24, %v266_v25  ;;  %v126_v30 = vld [vmem:[#allocation5 + $0xc0] sm:$0xff]  ;;  %6374 = vmatprep.subr.bf16.mxu0 %v8521_v28  ;;  %v8648_v35 = vcombine.low %v262_v24, %v266_v25 }
  0x50   :  { %v130_v31 = vld [vmem:[#allocation5 + $0xe0] sm:$0xff]  ;;  %6375 = vmatpush1.bf16.msra.mxu0 %v8520_v34 }
  0x51   :  { %v254_v32 = vld [vmem:[#allocation5 + $0x4c0] sm:$0xff]  ;;  %v8513_v36 = vcombine.high %v126_v30, %v130_v31  ;;  %6417 = vmatprep.subr.bf16.mxu1 %v8649_v29  ;;  %v8512_v42 = vcombine.low %v126_v30, %v130_v31 }
  0x52   :  { %v258_v33 = vld [vmem:[#allocation5 + $0x4e0] sm:$0xff]  ;;  %6418 = vmatpush1.bf16.msra.mxu1 %v8648_v35 }
  0x53   :  { %v8641_v37 = vcombine.high %v254_v32, %v258_v33  ;;  %v118_v38 = vld [vmem:[#allocation5 + $0x80] sm:$0xff]  ;;  %6376 = vmatprep.subr.bf16.mxu0 %v8513_v36  ;;  %v8640_v43 = vcombine.low %v254_v32, %v258_v33 }
  0x54   :  { %v122_v39 = vld [vmem:[#allocation5 + $0xa0] sm:$0xff]  ;;  %6377 = vmatpush1.bf16.msra.mxu0 %v8512_v42 }
  0x55   :  { %v246_v40 = vld [vmem:[#allocation5 + $0x480] sm:$0xff]  ;;  %v8505_v44 = vcombine.high %v118_v38, %v122_v39  ;;  %6419 = vmatprep.subr.bf16.mxu1 %v8641_v37  ;;  %v8504_v50 = vcombine.low %v118_v38, %v122_v39 }
  0x56   :  { %v250_v41 = vld [vmem:[#allocation5 + $0x4a0] sm:$0xff]  ;;  %6420 = vmatpush1.bf16.msra.mxu1 %v8640_v43 }
  0x57   :  { %v8633_v45 = vcombine.high %v246_v40, %v250_v41  ;;  %v110_v46 = vld [vmem:[#allocation5 + $0x40] sm:$0xff]  ;;  %6378 = vmatprep.subr.bf16.mxu0 %v8505_v44  ;;  %v8632_v51 = vcombine.low %v246_v40, %v250_v41 }
  0x58   :  { %v114_v47 = vld [vmem:[#allocation5 + $0x60] sm:$0xff]  ;;  %6379 = vmatpush1.bf16.msra.mxu0 %v8504_v50 }
  0x59   :  { %v238_v48 = vld [vmem:[#allocation5 + $0x440] sm:$0xff]  ;;  %v8497_v52 = vcombine.high %v110_v46, %v114_v47  ;;  %6421 = vmatprep.subr.bf16.mxu1 %v8633_v45  ;;  %v8496_v0 = vcombine.low %v110_v46, %v114_v47 }
  0x5a   :  { %v242_v49 = vld [vmem:[#allocation5 + $0x460] sm:$0xff]  ;;  %6422 = vmatpush1.bf16.msra.mxu1 %v8632_v51 }
  0x5b   :  { %v102_v53 = vld [vmem:[#allocation5] sm:$0xff]  ;;  %v8625_v56 = vcombine.high %v238_v48, %v242_v49  ;;  %6380 = vmatprep.subr.bf16.mxu0 %v8497_v52  ;;  %v8624_v1 = vcombine.low %v238_v48, %v242_v49 }
  0x5c   :  { %v9929_v54 = vld [vmem:[#allocation2] sm:$0xff]  ;;  %6381 = vmatpush1.bf16.msra.mxu0 %v8496_v0 }
  0x5d   :  { %v9931_v55 = vld [vmem:[#allocation2 + $0x40] sm:$0xff]  ;;  %6423 = vmatprep.subr.bf16.mxu1 %v8625_v56 }
  0x5e   :  { %v106_v57 = vld [vmem:[#allocation5 + $0x20] sm:$0xff]  ;;  %v9935_v58 = vcombine.high %v9929_v54, %v9931_v55  ;;  %6424 = vmatpush1.bf16.msra.mxu1 %v8624_v1 }
  0x5f   :  { %v230_v61 = vld [vmem:[#allocation5 + $0x400] sm:$0xff]  ;;  %v8489_v2 = vcombine.high %v102_v53, %v106_v57  ;;  %v8488_v8 = vcombine.low %v102_v53, %v106_v57 }
  0x60   :  { %v234_v62 = vld [vmem:[#allocation5 + $0x420] sm:$0xff]  ;;  %6400 = vmatprep.mubr.bf16.mxu0 %v9935_v58 }
  0x61   :  { %v8617_v3 = vcombine.high %v230_v61, %v234_v62  ;;  %v222_v4 = vld [vmem:[#allocation5 + $0x3c0] sm:$0xff]  ;;  %6382 = vmatprep.subr.bf16.mxu0 %v8489_v2  ;;  %v8616_v9 = vcombine.low %v230_v61, %v234_v62 }
  0x62   :  { %v226_v5 = vld [vmem:[#allocation5 + $0x3e0] sm:$0xff]  ;;  %6383 = vmatpush1.bf16.msra.mxu0 %v8488_v8 }
  0x63   :  { %v350_v6 = vld [vmem:[#allocation5 + $0x7c0] sm:$0xff]  ;;  %v8609_v10 = vcombine.high %v222_v4, %v226_v5  ;;  %6425 = vmatprep.subr.bf16.mxu1 %v8617_v3  ;;  %v8608_v16 = vcombine.low %v222_v4, %v226_v5 }
  0x64   :  { %v354_v7 = vld [vmem:[#allocation5 + $0x7e0] sm:$0xff]  ;;  %6426 = vmatpush1.bf16.msra.mxu1 %v8616_v9 }
  0x65   :  { %v8737_v11 = vcombine.high %v350_v6, %v354_v7  ;;  %v214_v12 = vld [vmem:[#allocation5 + $0x380] sm:$0xff]  ;;  %6384 = vmatprep.subr.bf16.mxu0 %v8609_v10  ;;  %v8736_v17 = vcombine.low %v350_v6, %v354_v7 }
  0x66   :  { %v218_v13 = vld [vmem:[#allocation5 + $0x3a0] sm:$0xff]  ;;  %6385 = vmatpush2.bf16.msra.mxu0 %v8608_v16 }
  0x67   :  { %v342_v14 = vld [vmem:[#allocation5 + $0x780] sm:$0xff]  ;;  %v8601_v18 = vcombine.high %v214_v12, %v218_v13  ;;  %6427 = vmatprep.subr.bf16.mxu1 %v8737_v11  ;;  %v8600_v24 = vcombine.low %v214_v12, %v218_v13 }
  0x68   :  { %v346_v15 = vld [vmem:[#allocation5 + $0x7a0] sm:$0xff]  ;;  %6428 = vmatpush2.bf16.msra.mxu1 %v8736_v17 }
  0x69   :  { %v8729_v19 = vcombine.high %v342_v14, %v346_v15  ;;  %v206_v20 = vld [vmem:[#allocation5 + $0x340] sm:$0xff]  ;;  %6386 = vmatprep.subr.bf16.mxu0 %v8601_v18  ;;  %v8728_v25 = vcombine.low %v342_v14, %v346_v15 }
  0x6a   :  { %v210_v21 = vld [vmem:[#allocation5 + $0x360] sm:$0xff]  ;;  %6387 = vmatpush2.bf16.msra.mxu0 %v8600_v24  ;;  %v9953_v24 = vld [vmem:[#allocation2 + $0x50] sm:$0xff] }
  0x6b   :  { %v334_v22 = vld [vmem:[#allocation5 + $0x740] sm:$0xff]  ;;  %v8593_v26 = vcombine.high %v206_v20, %v210_v21  ;;  %6429 = vmatprep.subr.bf16.mxu1 %v8729_v19  ;;  %v8592_v32 = vcombine.low %v206_v20, %v210_v21  ;;  %v9949_v21 = vcombine.low %v9929_v54, %v9931_v55 }
  0x6c   :  { %v338_v23 = vld [vmem:[#allocation5 + $0x760] sm:$0xff]  ;;  %6430 = vmatpush2.bf16.msra.mxu1 %v8728_v25  ;;  %v9957_v25 = vcombine.low %v9937_v59, %v9939_v60 }
  0x6d   :  { %v8721_v27 = vcombine.high %v334_v22, %v338_v23  ;;  %v198_v28 = vld [vmem:[#allocation5 + $0x300] sm:$0xff]  ;;  %6388 = vmatprep.subr.bf16.mxu0 %v8593_v26  ;;  %v8720_v33 = vcombine.low %v334_v22, %v338_v23  ;;  %v9951_v23 = vld [vmem:[#allocation2 + $0x10] sm:$0xff] }
  0x6e   :  { %v202_v29 = vld [vmem:[#allocation5 + $0x320] sm:$0xff]  ;;  %6389 = vmatpush2.bf16.msra.mxu0 %v8592_v32  ;;  %v9965_v32 = vcombine.high %v9951_v23, %v9953_v24 }
  0x6f   :  { %v326_v30 = vld [vmem:[#allocation5 + $0x700] sm:$0xff]  ;;  %v8585_v34 = vcombine.high %v198_v28, %v202_v29  ;;  %6431 = vmatprep.subr.bf16.mxu1 %v8721_v27  ;;  %v8584_v40 = vcombine.low %v198_v28, %v202_v29  ;;  %v9959_v27 = vld [vmem:[#allocation2 + $0x18] sm:$0xff] }
  0x70   :  { %v330_v31 = vld [vmem:[#allocation5 + $0x720] sm:$0xff]  ;;  %6432 = vmatpush2.bf16.msra.mxu1 %v8720_v33  ;;  %v9961_v28 = vld [vmem:[#allocation2 + $0x58] sm:$0xff] }
  0x71   :  { %v8713_v35 = vcombine.high %v326_v30, %v330_v31  ;;  %v190_v36 = vld [vmem:[#allocation5 + $0x2c0] sm:$0xff]  ;;  %6390 = vmatprep.subr.bf16.mxu0 %v8585_v34  ;;  %v8712_v41 = vcombine.low %v326_v30, %v330_v31  ;;  %v9970_v33 = vcombine.high %v9959_v27, %v9961_v28 }
  0x72   :  { %v194_v37 = vld [vmem:[#allocation5 + $0x2e0] sm:$0xff]  ;;  %6391 = vmatpush2.bf16.msra.mxu0 %v8584_v40 }
  0x73   :  { %v318_v38 = vld [vmem:[#allocation5 + $0x6c0] sm:$0xff]  ;;  %v8577_v42 = vcombine.high %v190_v36, %v194_v37  ;;  %6433 = vmatprep.subr.bf16.mxu1 %v8713_v35  ;;  %v8576_v48 = vcombine.low %v190_v36, %v194_v37 }
  0x74   :  { %v322_v39 = vld [vmem:[#allocation5 + $0x6e0] sm:$0xff]  ;;  %6434 = vmatpush2.bf16.msra.mxu1 %v8712_v41 }
  0x75   :  { %v8705_v43 = vcombine.high %v318_v38, %v322_v39  ;;  %v182_v44 = vld [vmem:[#allocation5 + $0x280] sm:$0xff]  ;;  %6392 = vmatprep.subr.bf16.mxu0 %v8577_v42  ;;  %v8704_v49 = vcombine.low %v318_v38, %v322_v39 }
  0x76   :  { %v186_v45 = vld [vmem:[#allocation5 + $0x2a0] sm:$0xff]  ;;  %6393 = vmatpush2.bf16.msra.mxu0 %v8576_v48 }
  0x77   :  { %v310_v46 = vld [vmem:[#allocation5 + $0x680] sm:$0xff]  ;;  %v8569_v50 = vcombine.high %v182_v44, %v186_v45  ;;  %6435 = vmatprep.subr.bf16.mxu1 %v8705_v43  ;;  %v8568_v61 = vcombine.low %v182_v44, %v186_v45 }
  0x78   :  { %v314_v47 = vld [vmem:[#allocation5 + $0x6a0] sm:$0xff]  ;;  %6436 = vmatpush2.bf16.msra.mxu1 %v8704_v49 }
  0x79   :  { %v8697_v51 = vcombine.high %v310_v46, %v314_v47  ;;  %v174_v52 = vld [vmem:[#allocation5 + $0x240] sm:$0xff]  ;;  %6394 = vmatprep.subr.bf16.mxu0 %v8569_v50  ;;  %v8696_v62 = vcombine.low %v310_v46, %v314_v47 }
  0x7a   :  { %v178_v53 = vld [vmem:[#allocation5 + $0x260] sm:$0xff]  ;;  %6395 = vmatpush2.bf16.msra.mxu0 %v8568_v61 }
  0x7b   :  { %v302_v56 = vld [vmem:[#allocation5 + $0x640] sm:$0xff]  ;;  %v8561_v0 = vcombine.high %v174_v52, %v178_v53  ;;  %6437 = vmatprep.subr.bf16.mxu1 %v8697_v51  ;;  %v8560_v6 = vcombine.low %v174_v52, %v178_v53 }
  0x7c   :  { %v306_v57 = vld [vmem:[#allocation5 + $0x660] sm:$0xff]  ;;  %6438 = vmatpush2.bf16.msra.mxu1 %v8696_v62 }
  0x7d   :  { %v8689_v1 = vcombine.high %v302_v56, %v306_v57  ;;  %v166_v2 = vld [vmem:[#allocation5 + $0x200] sm:$0xff]  ;;  %6396 = vmatprep.subr.bf16.mxu0 %v8561_v0  ;;  %v8688_v7 = vcombine.low %v302_v56, %v306_v57 }
  0x7e   :  { %v170_v3 = vld [vmem:[#allocation5 + $0x220] sm:$0xff]  ;;  %6397 = vmatpush2.bf16.msra.mxu0 %v8560_v6 }
  0x7f   :  { %v294_v4 = vld [vmem:[#allocation5 + $0x600] sm:$0xff]  ;;  %v8553_v8 = vcombine.high %v166_v2, %v170_v3  ;;  %6439 = vmatprep.subr.bf16.mxu1 %v8689_v1  ;;  %v8552_v14 = vcombine.low %v166_v2, %v170_v3 }
  0x80   :  { %v298_v5 = vld [vmem:[#allocation5 + $0x620] sm:$0xff]  ;;  %6440 = vmatpush2.bf16.msra.mxu1 %v8688_v7 }
  0x81   :  { %v8681_v9 = vcombine.high %v294_v4, %v298_v5  ;;  %v414_v10 = vld [vmem:[#allocation5 + $0x9c0] sm:$0xff]  ;;  %6398 = vmatprep.subr.bf16.mxu0 %v8553_v8  ;;  %v8680_v15 = vcombine.low %v294_v4, %v298_v5 }
  0x82   :  { %v418_v11 = vld [vmem:[#allocation5 + $0x9e0] sm:$0xff]  ;;  %6399 = vmatpush2.bf16.msra.mxu0 %v8552_v14 }
  0x83   :  { %v542_v12 = vld [vmem:[#allocation5 + $0xdc0] sm:$0xff]  ;;  %v8801_v16 = vcombine.high %v414_v10, %v418_v11  ;;  %6441 = vmatprep.subr.bf16.mxu1 %v8681_v9  ;;  %v8800_v26 = vcombine.low %v414_v10, %v418_v11 }
  0x84   :  { %v546_v13 = vld [vmem:[#allocation5 + $0xde0] sm:$0xff]  ;;  %6442 = vmatpush2.bf16.msra.mxu1 %v8680_v15 }
  0x85   :  { %v8929_v17 = vcombine.high %v542_v12, %v546_v13  ;;  %v406_v18 = vld [vmem:[#allocation5 + $0x980] sm:$0xff]  ;;  %6454 = vmatprep.subr.bf16.mxu0 %v8801_v16  ;;  %v8928_v29 = vcombine.low %v542_v12, %v546_v13  ;;  %6401 = vmatmul.mubr.bf16.vlgmr.msra.gmra.mxu0 %v9949_v21 }
  0x86   :  { %v410_v19 = vld [vmem:[#allocation5 + $0x9a0] sm:$0xff]  ;;  %6455 = vmatpush1.bf16.msra.mxu0 %v8800_v26  ;;  %6486 = vmatprep.mubr.bf16.mxu0 %v9965_v32 }
  0x87   :  { %v534_v20 = vld [vmem:[#allocation5 + $0xd80] sm:$0xff]  ;;  %v8793_v54 = vcombine.high %v406_v18, %v410_v19  ;;  %6497 = vmatprep.subr.bf16.mxu1 %v8929_v17  ;;  %6444 = vmatmul.mubr.bf16.vlgmr.msra.gmra.mxu1 %v9957_v25  ;;  %v8792_v34 = vcombine.low %v406_v18, %v410_v19 }
  0x88   :  { %v538_v22 = vld [vmem:[#allocation5 + $0xda0] sm:$0xff]  ;;  %6498 = vmatpush1.bf16.msra.mxu1 %v8928_v29  ;;  %6529 = vmatprep.mubr.bf16.mxu1 %v9970_v33 }
  0x89   :  { %v8921_v55 = vcombine.high %v534_v20, %v538_v22  ;;  %v398_v30 = vld [vmem:[#allocation5 + $0x940] sm:$0xff]  ;;  %6456 = vmatprep.subr.bf16.mxu0 %v8793_v54  ;;  %v8920_v35 = vcombine.low %v534_v20, %v538_v22 }
  0x8a   :  { %v402_v31 = vld [vmem:[#allocation5 + $0x960] sm:$0xff]  ;;  %6457 = vmatpush1.bf16.msra.mxu0 %v8792_v34 }
  0x8b   :  { %v526_v59 = vld [vmem:[#allocation5 + $0xd40] sm:$0xff]  ;;  %v8785_v36 = vcombine.high %v398_v30, %v402_v31  ;;  %6499 = vmatprep.subr.bf16.mxu1 %v8921_v55  ;;  %v8784_v42 = vcombine.low %v398_v30, %v402_v31 }
  0x8c   :  { %v530_v60 = vld [vmem:[#allocation5 + $0xd60] sm:$0xff]  ;;  %6500 = vmatpush1.bf16.msra.mxu1 %v8920_v35 }
  0x8d   :  { %v390_v37 = vld [vmem:[#allocation5 + $0x900] sm:$0xff]  ;;  %v8913_v39 = vcombine.high %v526_v59, %v530_v60  ;;  %6458 = vmatprep.subr.bf16.mxu0 %v8785_v36  ;;  %v8912_v43 = vcombine.low %v526_v59, %v530_v60 }
  0x8e   :  { %v394_v38 = vld [vmem:[#allocation5 + $0x920] sm:$0xff]  ;;  %6459 = vmatpush1.bf16.msra.mxu0 %v8784_v42 }
  0x8f   :  { %v518_v40 = vld [vmem:[#allocation5 + $0xd00] sm:$0xff]  ;;  %v8777_v44 = vcombine.high %v390_v37, %v394_v38  ;;  %6501 = vmatprep.subr.bf16.mxu1 %v8913_v39  ;;  %v8776_v50 = vcombine.low %v390_v37, %v394_v38 }
  0x90   :  { %v522_v41 = vld [vmem:[#allocation5 + $0xd20] sm:$0xff]  ;;  %6502 = vmatpush1.bf16.msra.mxu1 %v8912_v43 }
  0x91   :  { %v382_v45 = vld [vmem:[#allocation5 + $0x8c0] sm:$0xff]  ;;  %v8905_v48 = vcombine.high %v518_v40, %v522_v41  ;;  %6460 = vmatprep.subr.bf16.mxu0 %v8777_v44  ;;  %v8904_v51 = vcombine.low %v518_v40, %v522_v41 }
  0x92   :  { %v386_v46 = vld [vmem:[#allocation5 + $0x8e0] sm:$0xff]  ;;  %6461 = vmatpush1.bf16.msra.mxu0 %v8776_v50 }
  0x93   :  { %v510_v47 = vld [vmem:[#allocation5 + $0xcc0] sm:$0xff]  ;;  %v8769_v52 = vcombine.high %v382_v45, %v386_v46  ;;  %6503 = vmatprep.subr.bf16.mxu1 %v8905_v48  ;;  %v8768_v0 = vcombine.low %v382_v45, %v386_v46 }
  0x94   :  { %v514_v49 = vld [vmem:[#allocation5 + $0xce0] sm:$0xff]  ;;  %6504 = vmatpush1.bf16.msra.mxu1 %v8904_v51 }
  0x95   :  { %v374_v53 = vld [vmem:[#allocation5 + $0x880] sm:$0xff]  ;;  %v8897_v61 = vcombine.high %v510_v47, %v514_v49  ;;  %6462 = vmatprep.subr.bf16.mxu0 %v8769_v52  ;;  %v8896_v1 = vcombine.low %v510_v47, %v514_v49 }
  0x96   :  { %v378_v56 = vld [vmem:[#allocation5 + $0x8a0] sm:$0xff]  ;;  %6463 = vmatpush1.bf16.msra.mxu0 %v8768_v0 }
  0x97   :  { %v502_v57 = vld [vmem:[#allocation5 + $0xc80] sm:$0xff]  ;;  %v8761_v2 = vcombine.high %v374_v53, %v378_v56  ;;  %6505 = vmatprep.subr.bf16.mxu1 %v8897_v61  ;;  %v8760_v8 = vcombine.low %v374_v53, %v378_v56 }
  0x98   :  { %v506_v62 = vld [vmem:[#allocation5 + $0xca0] sm:$0xff]  ;;  %6506 = vmatpush1.bf16.msra.mxu1 %v8896_v1 }
  0x99   :  { %v366_v3 = vld [vmem:[#allocation5 + $0x840] sm:$0xff]  ;;  %v8889_v6 = vcombine.high %v502_v57, %v506_v62  ;;  %6464 = vmatprep.subr.bf16.mxu0 %v8761_v2  ;;  %v8888_v9 = vcombine.low %v502_v57, %v506_v62 }
  0x9a   :  { %v370_v4 = vld [vmem:[#allocation5 + $0x860] sm:$0xff]  ;;  %6465 = vmatpush1.bf16.msra.mxu0 %v8760_v8 }
  0x9b   :  { %v494_v5 = vld [vmem:[#allocation5 + $0xc40] sm:$0xff]  ;;  %v8753_v10 = vcombine.high %v366_v3, %v370_v4  ;;  %6507 = vmatprep.subr.bf16.mxu1 %v8889_v6  ;;  %v8752_v16 = vcombine.low %v366_v3, %v370_v4 }
  0x9c   :  { %v498_v7 = vld [vmem:[#allocation5 + $0xc60] sm:$0xff]  ;;  %6508 = vmatpush1.bf16.msra.mxu1 %v8888_v9 }
  0x9d   :  { %v358_v11 = vld [vmem:[#allocation5 + $0x800] sm:$0xff]  ;;  %v8881_v14 = vcombine.high %v494_v5, %v498_v7  ;;  %6466 = vmatprep.subr.bf16.mxu0 %v8753_v10  ;;  %v8880_v17 = vcombine.low %v494_v5, %v498_v7 }
  0x9e   :  { %v362_v12 = vld [vmem:[#allocation5 + $0x820] sm:$0xff]  ;;  %6467 = vmatpush1.bf16.msra.mxu0 %v8752_v16 }
  0x9f   :  { %v486_v13 = vld [vmem:[#allocation5 + $0xc00] sm:$0xff]  ;;  %v8745_v18 = vcombine.high %v358_v11, %v362_v12  ;;  %6509 = vmatprep.subr.bf16.mxu1 %v8881_v14  ;;  %v8744_v54 = vcombine.low %v358_v11, %v362_v12 }
  0xa0   :  { %v490_v15 = vld [vmem:[#allocation5 + $0xc20] sm:$0xff]  ;;  %6510 = vmatpush1.bf16.msra.mxu1 %v8880_v17 }
  0xa1   :  { %v478_v19 = vld [vmem:[#allocation5 + $0xbc0] sm:$0xff]  ;;  %v8873_v26 = vcombine.high %v486_v13, %v490_v15  ;;  %6468 = vmatprep.subr.bf16.mxu0 %v8745_v18  ;;  %v8872_v55 = vcombine.low %v486_v13, %v490_v15 }
  0xa2   :  { %v482_v20 = vld [vmem:[#allocation5 + $0xbe0] sm:$0xff]  ;;  %6469 = vmatpush1.bf16.msra.mxu0 %v8744_v54 }
  0xa3   :  { %v606_v22 = vld [vmem:[#allocation5 + $0xfc0] sm:$0xff]  ;;  %v8865_v30 = vcombine.high %v478_v19, %v482_v20  ;;  %6511 = vmatprep.subr.bf16.mxu1 %v8873_v26  ;;  %v8864_v36 = vcombine.low %v478_v19, %v482_v20 }
  0xa4   :  { %v610_v29 = vld [vmem:[#allocation5 + $0xfe0] sm:$0xff]  ;;  %6512 = vmatpush1.bf16.msra.mxu1 %v8872_v55 }
  0xa5   :  { %v470_v31 = vld [vmem:[#allocation5 + $0xb80] sm:$0xff]  ;;  %v8993_v34 = vcombine.high %v606_v22, %v610_v29  ;;  %6470 = vmatprep.subr.bf16.mxu0 %v8865_v30  ;;  %v8992_v37 = vcombine.low %v606_v22, %v610_v29 }
  0xa6   :  { %v474_v59 = vld [vmem:[#allocation5 + $0xba0] sm:$0xff]  ;;  %6471 = vmatpush2.bf16.msra.mxu0 %v8864_v36 }
  0xa7   :  { %v598_v60 = vld [vmem:[#allocation5 + $0xf80] sm:$0xff]  ;;  %v8857_v38 = vcombine.high %v470_v31, %v474_v59  ;;  %6513 = vmatprep.subr.bf16.mxu1 %v8993_v34  ;;  %v8856_v44 = vcombine.low %v470_v31, %v474_v59 }
  0xa8   :  { %v602_v35 = vld [vmem:[#allocation5 + $0xfa0] sm:$0xff]  ;;  %6514 = vmatpush2.bf16.msra.mxu1 %v8992_v37 }
  0xa9   :  { %v462_v39 = vld [vmem:[#allocation5 + $0xb40] sm:$0xff]  ;;  %v8985_v42 = vcombine.high %v598_v60, %v602_v35  ;;  %6472 = vmatprep.subr.bf16.mxu0 %v8857_v38  ;;  %v8984_v45 = vcombine.low %v598_v60, %v602_v35 }
  0xaa   :  { %v466_v40 = vld [vmem:[#allocation5 + $0xb60] sm:$0xff]  ;;  %6473 = vmatpush2.bf16.msra.mxu0 %v8856_v44 }
  0xab   :  { %v590_v41 = vld [vmem:[#allocation5 + $0xf40] sm:$0xff]  ;;  %v8849_v46 = vcombine.high %v462_v39, %v466_v40  ;;  %6515 = vmatprep.subr.bf16.mxu1 %v8985_v42  ;;  %v8848_v52 = vcombine.low %v462_v39, %v466_v40 }
  0xac   :  { %v594_v43 = vld [vmem:[#allocation5 + $0xf60] sm:$0xff]  ;;  %6516 = vmatpush2.bf16.msra.mxu1 %v8984_v45 }
  0xad   :  { %v454_v47 = vld [vmem:[#allocation5 + $0xb00] sm:$0xff]  ;;  %v8977_v50 = vcombine.high %v590_v41, %v594_v43  ;;  %6474 = vmatprep.subr.bf16.mxu0 %v8849_v46  ;;  %v8976_v53 = vcombine.low %v590_v41, %v594_v43 }
  0xae   :  { %v458_v48 = vld [vmem:[#allocation5 + $0xb20] sm:$0xff]  ;;  %6475 = vmatpush2.bf16.msra.mxu0 %v8848_v52  ;;  %v9989_v52 = vld [vmem:[#allocation2 + $0x68] sm:$0xff] }
  0xaf   :  { %v582_v49 = vld [vmem:[#allocation5 + $0xf00] sm:$0xff]  ;;  %v8841_v56 = vcombine.high %v454_v47, %v458_v48  ;;  %6517 = vmatprep.subr.bf16.mxu1 %v8977_v50  ;;  %v8840_v2 = vcombine.low %v454_v47, %v458_v48  ;;  %v9981_v48 = vcombine.low %v9951_v23, %v9953_v24 }
  0xb0   :  { %v586_v51 = vld [vmem:[#allocation5 + $0xf20] sm:$0xff]  ;;  %6518 = vmatpush2.bf16.msra.mxu1 %v8976_v53 }
  0xb1   :  { %v446_v57 = vld [vmem:[#allocation5 + $0xac0] sm:$0xff]  ;;  %v8969_v0 = vcombine.high %v582_v49, %v586_v51  ;;  %6476 = vmatprep.subr.bf16.mxu0 %v8841_v56  ;;  %v8968_v3 = vcombine.low %v582_v49, %v586_v51  ;;  %v9985_v49 = vcombine.low %v9959_v27, %v9961_v28  ;;  %v9987_v51 = vld [vmem:[#allocation2 + $0x28] sm:$0xff] }
  0xb2   :  { %v450_v61 = vld [vmem:[#allocation5 + $0xae0] sm:$0xff]  ;;  %6477 = vmatpush2.bf16.msra.mxu0 %v8840_v2  ;;  %v9998_v27 = vcombine.high %v9987_v51, %v9989_v52 }
  0xb3   :  { %v574_v62 = vld [vmem:[#allocation5 + $0xec0] sm:$0xff]  ;;  %v8833_v4 = vcombine.high %v446_v57, %v450_v61  ;;  %6519 = vmatprep.subr.bf16.mxu1 %v8969_v0  ;;  %v8832_v10 = vcombine.low %v446_v57, %v450_v61 }
  0xb4   :  { %v578_v1 = vld [vmem:[#allocation5 + $0xee0] sm:$0xff]  ;;  %6520 = vmatpush2.bf16.msra.mxu1 %v8968_v3 }
  0xb5   :  { %v438_v5 = vld [vmem:[#allocation5 + $0xa80] sm:$0xff]  ;;  %v8961_v8 = vcombine.high %v574_v62, %v578_v1  ;;  %6478 = vmatprep.subr.bf16.mxu0 %v8833_v4  ;;  %v8960_v11 = vcombine.low %v574_v62, %v578_v1 }
  0xb6   :  { %v442_v6 = vld [vmem:[#allocation5 + $0xaa0] sm:$0xff]  ;;  %6479 = vmatpush2.bf16.msra.mxu0 %v8832_v10 }
  0xb7   :  { %v566_v7 = vld [vmem:[#allocation5 + $0xe80] sm:$0xff]  ;;  %v8825_v12 = vcombine.high %v438_v5, %v442_v6  ;;  %6521 = vmatprep.subr.bf16.mxu1 %v8961_v8  ;;  %v8824_v18 = vcombine.low %v438_v5, %v442_v6 }
  0xb8   :  { %v570_v9 = vld [vmem:[#allocation5 + $0xea0] sm:$0xff]  ;;  %6522 = vmatpush2.bf16.msra.mxu1 %v8960_v11 }
  0xb9   :  { %v430_v13 = vld [vmem:[#allocation5 + $0xa40] sm:$0xff]  ;;  %v8953_v16 = vcombine.high %v566_v7, %v570_v9  ;;  %6480 = vmatprep.subr.bf16.mxu0 %v8825_v12  ;;  %v8952_v19 = vcombine.low %v566_v7, %v570_v9 }
  0xba   :  { %v434_v14 = vld [vmem:[#allocation5 + $0xa60] sm:$0xff]  ;;  %6481 = vmatpush2.bf16.msra.mxu0 %v8824_v18 }
  0xbb   :  { %v558_v15 = vld [vmem:[#allocation5 + $0xe40] sm:$0xff]  ;;  %v8817_v20 = vcombine.high %v430_v13, %v434_v14  ;;  %6523 = vmatprep.subr.bf16.mxu1 %v8953_v16  ;;  %v8816_v30 = vcombine.low %v430_v13, %v434_v14 }
  0xbc   :  { %v562_v17 = vld [vmem:[#allocation5 + $0xe60] sm:$0xff]  ;;  %6524 = vmatpush2.bf16.msra.mxu1 %v8952_v19 }
  0xbd   :  { %v422_v22 = vld [vmem:[#allocation5 + $0xa00] sm:$0xff]  ;;  %v8945_v54 = vcombine.high %v558_v15, %v562_v17  ;;  %6482 = vmatprep.subr.bf16.mxu0 %v8817_v20  ;;  %v8944_v31 = vcombine.low %v558_v15, %v562_v17 }
  0xbe   :  { %v426_v26 = vld [vmem:[#allocation5 + $0xa20] sm:$0xff]  ;;  %6483 = vmatpush2.bf16.msra.mxu0 %v8816_v30 }
  0xbf   :  { %v550_v29 = vld [vmem:[#allocation5 + $0xe00] sm:$0xff]  ;;  %v8809_v59 = vcombine.high %v422_v22, %v426_v26  ;;  %6525 = vmatprep.subr.bf16.mxu1 %v8945_v54  ;;  %v8808_v38 = vcombine.low %v422_v22, %v426_v26 }
  0xc0   :  { %v554_v55 = vld [vmem:[#allocation5 + $0xe20] sm:$0xff]  ;;  %6526 = vmatpush2.bf16.msra.mxu1 %v8944_v31 }
  0xc1   :  { %v670_v60 = vld [vmem:[#allocation5 + $0x11c0] sm:$0xff]  ;;  %v8937_v36 = vcombine.high %v550_v29, %v554_v55  ;;  %6484 = vmatprep.subr.bf16.mxu0 %v8809_v59  ;;  %v8936_v41 = vcombine.low %v550_v29, %v554_v55 }
  0xc2   :  { %v674_v34 = vld [vmem:[#allocation5 + $0x11e0] sm:$0xff]  ;;  %6485 = vmatpush2.bf16.msra.mxu0 %v8808_v38 }
  0xc3   :  { %v798_v35 = vld [vmem:[#allocation5 + $0x15c0] sm:$0xff]  ;;  %v9057_v42 = vcombine.high %v670_v60, %v674_v34  ;;  %6527 = vmatprep.subr.bf16.mxu1 %v8937_v36  ;;  %v9056_v50 = vcombine.low %v670_v60, %v674_v34 }
  0xc4   :  { %v802_v37 = vld [vmem:[#allocation5 + $0x15e0] sm:$0xff]  ;;  %6528 = vmatpush2.bf16.msra.mxu1 %v8936_v41 }
  0xc5   :  { %v662_v39 = vld [vmem:[#allocation5 + $0x1180] sm:$0xff]  ;;  %v9185_v46 = vcombine.high %v798_v35, %v802_v37  ;;  %6540 = vmatprep.subr.bf16.mxu0 %v9057_v42  ;;  %v9184_v53 = vcombine.low %v798_v35, %v802_v37  ;;  %6487 = vmatmul.mubr.bf16.vlgmr.msra.gmra.mxu0 %v9981_v48 }
  0xc6   :  { %v666_v40 = vld [vmem:[#allocation5 + $0x11a0] sm:$0xff]  ;;  %6541 = vmatpush1.bf16.msra.mxu0 %v9056_v50 }
  0xc7   :  { %v790_v43 = vld [vmem:[#allocation5 + $0x1580] sm:$0xff]  ;;  %v9049_v56 = vcombine.high %v662_v39, %v666_v40  ;;  %6583 = vmatprep.subr.bf16.mxu1 %v9185_v46  ;;  %6530 = vmatmul.mubr.bf16.vlgmr.msra.gmra.mxu1 %v9985_v49  ;;  %v9048_v28 = vcombine.low %v662_v39, %v666_v40 }
  0xc8   :  { %v794_v44 = vld [vmem:[#allocation5 + $0x15a0] sm:$0xff]  ;;  %6584 = vmatpush1.bf16.msra.mxu1 %v9184_v53  ;;  %6615 = vmatprep.mubr.bf16.mxu1 %v9998_v27 }
  0xc9   :  { %v9975_v45 = vld [vmem:[#allocation2 + $0x20] sm:$0xff]  ;;  %v9177_v61 = vcombine.high %v790_v43, %v794_v44  ;;  %6542 = vmatprep.subr.bf16.mxu0 %v9049_v56  ;;  %v9176_v1 = vcombine.low %v790_v43, %v794_v44 }
  0xca   :  { %v9977_v47 = vld [vmem:[#allocation2 + $0x60] sm:$0xff]  ;;  %6543 = vmatpush1.bf16.msra.mxu0 %v9048_v28 }
  0xcb   :  { %v654_v57 = vld [vmem:[#allocation5 + $0x1140] sm:$0xff]  ;;  %v9993_v0 = vcombine.high %v9975_v45, %v9977_v47  ;;  %6585 = vmatprep.subr.bf16.mxu1 %v9177_v61 }
  0xcc   :  { %v658_v62 = vld [vmem:[#allocation5 + $0x1160] sm:$0xff]  ;;  %6586 = vmatpush1.bf16.msra.mxu1 %v9176_v1 }
  0xcd   :  { %v782_v23 = vld [vmem:[#allocation5 + $0x1540] sm:$0xff]  ;;  %v9041_v2 = vcombine.high %v654_v57, %v658_v62  ;;  %6572 = vmatprep.mubr.bf16.mxu0 %v9993_v0  ;;  %v9040_v8 = vcombine.low %v654_v57, %v658_v62 }
  0xce   :  { %v786_v24 = vld [vmem:[#allocation5 + $0x1560] sm:$0xff] }
  0xcf   :  { %v646_v3 = vld [vmem:[#allocation5 + $0x1100] sm:$0xff]  ;;  %v9169_v6 = vcombine.high %v782_v23, %v786_v24  ;;  %6544 = vmatprep.subr.bf16.mxu0 %v9041_v2  ;;  %v9168_v9 = vcombine.low %v782_v23, %v786_v24 }
  0xd0   :  { %v650_v4 = vld [vmem:[#allocation5 + $0x1120] sm:$0xff]  ;;  %6545 = vmatpush1.bf16.msra.mxu0 %v9040_v8 }
  0xd1   :  { %v774_v5 = vld [vmem:[#allocation5 + $0x1500] sm:$0xff]  ;;  %v9033_v10 = vcombine.high %v646_v3, %v650_v4  ;;  %6587 = vmatprep.subr.bf16.mxu1 %v9169_v6  ;;  %v9032_v16 = vcombine.low %v646_v3, %v650_v4 }
  0xd2   :  { %v778_v7 = vld [vmem:[#allocation5 + $0x1520] sm:$0xff]  ;;  %6588 = vmatpush1.bf16.msra.mxu1 %v9168_v9 }
  0xd3   :  { %v9161_v11 = vcombine.high %v774_v5, %v778_v7  ;;  %v638_v12 = vld [vmem:[#allocation5 + $0x10c0] sm:$0xff]  ;;  %6546 = vmatprep.subr.bf16.mxu0 %v9033_v10  ;;  %v9160_v17 = vcombine.low %v774_v5, %v778_v7 }
  0xd4   :  { %v642_v13 = vld [vmem:[#allocation5 + $0x10e0] sm:$0xff]  ;;  %6547 = vmatpush1.bf16.msra.mxu0 %v9032_v16 }
  0xd5   :  { %v766_v14 = vld [vmem:[#allocation5 + $0x14c0] sm:$0xff]  ;;  %v9025_v18 = vcombine.high %v638_v12, %v642_v13  ;;  %6589 = vmatprep.subr.bf16.mxu1 %v9161_v11  ;;  %v9024_v54 = vcombine.low %v638_v12, %v642_v13 }
  0xd6   :  { %v770_v15 = vld [vmem:[#allocation5 + $0x14e0] sm:$0xff]  ;;  %6590 = vmatpush1.bf16.msra.mxu1 %v9160_v17 }
  0xd7   :  { %v9153_v19 = vcombine.high %v766_v14, %v770_v15  ;;  %v630_v20 = vld [vmem:[#allocation5 + $0x1080] sm:$0xff]  ;;  %6548 = vmatprep.subr.bf16.mxu0 %v9025_v18  ;;  %v9152_v55 = vcombine.low %v766_v14, %v770_v15 }
  0xd8   :  { %v634_v22 = vld [vmem:[#allocation5 + $0x10a0] sm:$0xff]  ;;  %6549 = vmatpush1.bf16.msra.mxu0 %v9024_v54 }
  0xd9   :  { %v758_v26 = vld [vmem:[#allocation5 + $0x1480] sm:$0xff]  ;;  %v9017_v30 = vcombine.high %v630_v20, %v634_v22  ;;  %6591 = vmatprep.subr.bf16.mxu1 %v9153_v19  ;;  %v9016_v36 = vcombine.low %v630_v20, %v634_v22 }
  0xda   :  { %v762_v29 = vld [vmem:[#allocation5 + $0x14a0] sm:$0xff]  ;;  %6592 = vmatpush1.bf16.msra.mxu1 %v9152_v55 }
  0xdb   :  { %v9145_v31 = vcombine.high %v758_v26, %v762_v29  ;;  %v622_v59 = vld [vmem:[#allocation5 + $0x1040] sm:$0xff]  ;;  %6550 = vmatprep.subr.bf16.mxu0 %v9017_v30  ;;  %v9144_v37 = vcombine.low %v758_v26, %v762_v29 }
  0xdc   :  { %v626_v60 = vld [vmem:[#allocation5 + $0x1060] sm:$0xff]  ;;  %6551 = vmatpush1.bf16.msra.mxu0 %v9016_v36 }
  0xdd   :  { %v750_v34 = vld [vmem:[#allocation5 + $0x1440] sm:$0xff]  ;;  %v9009_v38 = vcombine.high %v622_v59, %v626_v60  ;;  %6593 = vmatprep.subr.bf16.mxu1 %v9145_v31  ;;  %v9008_v44 = vcombine.low %v622_v59, %v626_v60 }
  0xde   :  { %v754_v35 = vld [vmem:[#allocation5 + $0x1460] sm:$0xff]  ;;  %6594 = vmatpush1.bf16.msra.mxu1 %v9144_v37 }
  0xdf   :  { %v9137_v39 = vcombine.high %v750_v34, %v754_v35  ;;  %v614_v40 = vld [vmem:[#allocation5 + $0x1000] sm:$0xff]  ;;  %6552 = vmatprep.subr.bf16.mxu0 %v9009_v38  ;;  %v9136_v46 = vcombine.low %v750_v34, %v754_v35 }
  0xe0   :  { %v618_v41 = vld [vmem:[#allocation5 + $0x1020] sm:$0xff]  ;;  %6553 = vmatpush1.bf16.msra.mxu0 %v9008_v44 }
  0xe1   :  { %v742_v42 = vld [vmem:[#allocation5 + $0x1400] sm:$0xff]  ;;  %v9001_v50 = vcombine.high %v614_v40, %v618_v41  ;;  %6595 = vmatprep.subr.bf16.mxu1 %v9137_v39  ;;  %v9000_v23 = vcombine.low %v614_v40, %v618_v41 }
  0xe2   :  { %v746_v43 = vld [vmem:[#allocation5 + $0x1420] sm:$0xff]  ;;  %6596 = vmatpush1.bf16.msra.mxu1 %v9136_v46 }
  0xe3   :  { %v9129_v53 = vcombine.high %v742_v42, %v746_v43  ;;  %v734_v56 = vld [vmem:[#allocation5 + $0x13c0] sm:$0xff]  ;;  %6554 = vmatprep.subr.bf16.mxu0 %v9001_v50  ;;  %v9128_v24 = vcombine.low %v742_v42, %v746_v43 }
  0xe4   :  { %v738_v57 = vld [vmem:[#allocation5 + $0x13e0] sm:$0xff]  ;;  %6555 = vmatpush1.bf16.msra.mxu0 %v9000_v23 }
  0xe5   :  { %v862_v61 = vld [vmem:[#allocation5 + $0x17c0] sm:$0xff]  ;;  %v9121_v28 = vcombine.high %v734_v56, %v738_v57  ;;  %6597 = vmatprep.subr.bf16.mxu1 %v9129_v53  ;;  %v9120_v6 = vcombine.low %v734_v56, %v738_v57 }
  0xe6   :  { %v866_v62 = vld [vmem:[#allocation5 + $0x17e0] sm:$0xff]  ;;  %6598 = vmatpush1.bf16.msra.mxu1 %v9128_v24 }
  0xe7   :  { %v9249_v1 = vcombine.high %v862_v61, %v866_v62  ;;  %v726_v2 = vld [vmem:[#allocation5 + $0x1380] sm:$0xff]  ;;  %6556 = vmatprep.subr.bf16.mxu0 %v9121_v28  ;;  %v9248_v7 = vcombine.low %v862_v61, %v866_v62 }
  0xe8   :  { %v730_v3 = vld [vmem:[#allocation5 + $0x13a0] sm:$0xff]  ;;  %6557 = vmatpush2.bf16.msra.mxu0 %v9120_v6 }
  0xe9   :  { %v854_v4 = vld [vmem:[#allocation5 + $0x1780] sm:$0xff]  ;;  %v9113_v8 = vcombine.high %v726_v2, %v730_v3  ;;  %6599 = vmatprep.subr.bf16.mxu1 %v9249_v1  ;;  %v9112_v14 = vcombine.low %v726_v2, %v730_v3 }
  0xea   :  { %v858_v5 = vld [vmem:[#allocation5 + $0x17a0] sm:$0xff]  ;;  %6600 = vmatpush2.bf16.msra.mxu1 %v9248_v7 }
  0xeb   :  { %v9241_v9 = vcombine.high %v854_v4, %v858_v5  ;;  %v718_v10 = vld [vmem:[#allocation5 + $0x1340] sm:$0xff]  ;;  %6558 = vmatprep.subr.bf16.mxu0 %v9113_v8  ;;  %v9240_v15 = vcombine.low %v854_v4, %v858_v5 }
  0xec   :  { %v722_v11 = vld [vmem:[#allocation5 + $0x1360] sm:$0xff]  ;;  %6559 = vmatpush2.bf16.msra.mxu0 %v9112_v14 }
  0xed   :  { %v846_v12 = vld [vmem:[#allocation5 + $0x1740] sm:$0xff]  ;;  %v9105_v16 = vcombine.high %v718_v10, %v722_v11  ;;  %6601 = vmatprep.subr.bf16.mxu1 %v9241_v9  ;;  %v9104_v26 = vcombine.low %v718_v10, %v722_v11 }
  0xee   :  { %v850_v13 = vld [vmem:[#allocation5 + $0x1760] sm:$0xff]  ;;  %6602 = vmatpush2.bf16.msra.mxu1 %v9240_v15 }
  0xef   :  { %v9233_v17 = vcombine.high %v846_v12, %v850_v13  ;;  %v710_v18 = vld [vmem:[#allocation5 + $0x1300] sm:$0xff]  ;;  %6560 = vmatprep.subr.bf16.mxu0 %v9105_v16  ;;  %v9232_v29 = vcombine.low %v846_v12, %v850_v13 }
  0xf0   :  { %v714_v19 = vld [vmem:[#allocation5 + $0x1320] sm:$0xff]  ;;  %6561 = vmatpush2.bf16.msra.mxu0 %v9104_v26  ;;  %v10009_v26 = vld [vmem:[#allocation2 + $0x70] sm:$0xff] }
  0xf1   :  { %v838_v20 = vld [vmem:[#allocation5 + $0x1700] sm:$0xff]  ;;  %v9097_v54 = vcombine.high %v710_v18, %v714_v19  ;;  %6603 = vmatprep.subr.bf16.mxu1 %v9233_v17  ;;  %v9096_v34 = vcombine.low %v710_v18, %v714_v19  ;;  %v10005_v19 = vcombine.low %v9975_v45, %v9977_v47 }
  0xf2   :  { %v842_v22 = vld [vmem:[#allocation5 + $0x1720] sm:$0xff]  ;;  %6604 = vmatpush2.bf16.msra.mxu1 %v9232_v29  ;;  %v10013_v29 = vcombine.low %v9987_v51, %v9989_v52 }
  0xf3   :  { %v9225_v55 = vcombine.high %v838_v20, %v842_v22  ;;  %v702_v30 = vld [vmem:[#allocation5 + $0x12c0] sm:$0xff]  ;;  %6562 = vmatprep.subr.bf16.mxu0 %v9097_v54  ;;  %v9224_v35 = vcombine.low %v838_v20, %v842_v22  ;;  %v10007_v22 = vld [vmem:[#allocation2 + $0x30] sm:$0xff] }
  0xf4   :  { %v706_v31 = vld [vmem:[#allocation5 + $0x12e0] sm:$0xff]  ;;  %6563 = vmatpush2.bf16.msra.mxu0 %v9096_v34  ;;  %v10021_v34 = vcombine.high %v10007_v22, %v10009_v26 }
  0xf5   :  { %v830_v59 = vld [vmem:[#allocation5 + $0x16c0] sm:$0xff]  ;;  %v9089_v36 = vcombine.high %v702_v30, %v706_v31  ;;  %6605 = vmatprep.subr.bf16.mxu1 %v9225_v55  ;;  %v9088_v42 = vcombine.low %v702_v30, %v706_v31  ;;  %v10015_v55 = vld [vmem:[#allocation2 + $0x38] sm:$0xff] }
  0xf6   :  { %v834_v60 = vld [vmem:[#allocation5 + $0x16e0] sm:$0xff]  ;;  %6606 = vmatpush2.bf16.msra.mxu1 %v9224_v35  ;;  %v10017_v30 = vld [vmem:[#allocation2 + $0x78] sm:$0xff] }
  0xf7   :  { %v9217_v37 = vcombine.high %v830_v59, %v834_v60  ;;  %v694_v38 = vld [vmem:[#allocation5 + $0x1280] sm:$0xff]  ;;  %6564 = vmatprep.subr.bf16.mxu0 %v9089_v36  ;;  %v9216_v43 = vcombine.low %v830_v59, %v834_v60  ;;  %v10026_v35 = vcombine.high %v10015_v55, %v10017_v30 }
  0xf8   :  { %v698_v39 = vld [vmem:[#allocation5 + $0x12a0] sm:$0xff]  ;;  %6565 = vmatpush2.bf16.msra.mxu0 %v9088_v42 }
  0xf9   :  { %v822_v40 = vld [vmem:[#allocation5 + $0x1680] sm:$0xff]  ;;  %v9081_v44 = vcombine.high %v694_v38, %v698_v39  ;;  %6607 = vmatprep.subr.bf16.mxu1 %v9217_v37  ;;  %v9080_v61 = vcombine.low %v694_v38, %v698_v39 }
  0xfa   :  { %v826_v41 = vld [vmem:[#allocation5 + $0x16a0] sm:$0xff]  ;;  %6608 = vmatpush2.bf16.msra.mxu1 %v9216_v43 }
  0xfb   :  { %v9209_v46 = vcombine.high %v822_v40, %v826_v41  ;;  %v686_v50 = vld [vmem:[#allocation5 + $0x1240] sm:$0xff]  ;;  %6566 = vmatprep.subr.bf16.mxu0 %v9081_v44  ;;  %v9208_v62 = vcombine.low %v822_v40, %v826_v41 }
  0xfc   :  { %v690_v53 = vld [vmem:[#allocation5 + $0x1260] sm:$0xff]  ;;  %6567 = vmatpush2.bf16.msra.mxu0 %v9080_v61 }
  0xfd   :  { %v814_v56 = vld [vmem:[#allocation5 + $0x1640] sm:$0xff]  ;;  %v9073_v23 = vcombine.high %v686_v50, %v690_v53  ;;  %6609 = vmatprep.subr.bf16.mxu1 %v9209_v46  ;;  %v9072_v4 = vcombine.low %v686_v50, %v690_v53 }
  0xfe   :  { %v818_v57 = vld [vmem:[#allocation5 + $0x1660] sm:$0xff]  ;;  %6610 = vmatpush2.bf16.msra.mxu1 %v9208_v62 }
  0xff   :  { %v9201_v24 = vcombine.high %v814_v56, %v818_v57  ;;  %v678_v28 = vld [vmem:[#allocation5 + $0x1200] sm:$0xff]  ;;  %6568 = vmatprep.subr.bf16.mxu0 %v9073_v23  ;;  %v9200_v5 = vcombine.low %v814_v56, %v818_v57 }
 0x100   :  { %v682_v1 = vld [vmem:[#allocation5 + $0x1220] sm:$0xff]  ;;  %6569 = vmatpush2.bf16.msra.mxu0 %v9072_v4 }
 0x101   :  { %v806_v2 = vld [vmem:[#allocation5 + $0x1600] sm:$0xff]  ;;  %v9065_v6 = vcombine.high %v678_v28, %v682_v1  ;;  %6611 = vmatprep.subr.bf16.mxu1 %v9201_v24  ;;  %v9064_v12 = vcombine.low %v678_v28, %v682_v1 }
 0x102   :  { %v810_v3 = vld [vmem:[#allocation5 + $0x1620] sm:$0xff]  ;;  %6612 = vmatpush2.bf16.msra.mxu1 %v9200_v5 }
 0x103   :  { %v9193_v7 = vcombine.high %v806_v2, %v810_v3  ;;  %v926_v8 = vld [vmem:[#allocation5 + $0x19c0] sm:$0xff]  ;;  %6570 = vmatprep.subr.bf16.mxu0 %v9065_v6  ;;  %v9192_v13 = vcombine.low %v806_v2, %v810_v3 }
 0x104   :  { %v930_v9 = vld [vmem:[#allocation5 + $0x19e0] sm:$0xff]  ;;  %6571 = vmatpush2.bf16.msra.mxu0 %v9064_v12 }
 0x105   :  { %v1054_v10 = vld [vmem:[#allocation5 + $0x1dc0] sm:$0xff]  ;;  %v9313_v14 = vcombine.high %v926_v8, %v930_v9  ;;  %6613 = vmatprep.subr.bf16.mxu1 %v9193_v7  ;;  %v9312_v54 = vcombine.low %v926_v8, %v930_v9 }
 0x106   :  { %v1058_v11 = vld [vmem:[#allocation5 + $0x1de0] sm:$0xff]  ;;  %6614 = vmatpush2.bf16.msra.mxu1 %v9192_v13 }
 0x107   :  { %v9441_v15 = vcombine.high %v1054_v10, %v1058_v11  ;;  %v918_v16 = vld [vmem:[#allocation5 + $0x1980] sm:$0xff]  ;;  %6626 = vmatprep.subr.bf16.mxu0 %v9313_v14  ;;  %v9440_v31 = vcombine.low %v1054_v10, %v1058_v11  ;;  %6573 = vmatmul.mubr.bf16.vlgmr.msra.gmra.mxu0 %v10005_v19 }
 0x108   :  { %v922_v17 = vld [vmem:[#allocation5 + $0x19a0] sm:$0xff]  ;;  %6627 = vmatpush1.bf16.msra.mxu0 %v9312_v54  ;;  %6658 = vmatprep.mubr.bf16.mxu0 %v10021_v34 }
 0x109   :  { %v1046_v18 = vld [vmem:[#allocation5 + $0x1d80] sm:$0xff]  ;;  %v9305_v45 = vcombine.high %v918_v16, %v922_v17  ;;  %6669 = vmatprep.subr.bf16.mxu1 %v9441_v15  ;;  %6616 = vmatmul.mubr.bf16.vlgmr.msra.gmra.mxu1 %v10013_v29  ;;  %v9304_v36 = vcombine.low %v918_v16, %v922_v17 }
 0x10a   :  { %v1050_v20 = vld [vmem:[#allocation5 + $0x1da0] sm:$0xff]  ;;  %6670 = vmatpush1.bf16.msra.mxu1 %v9440_v31  ;;  %6701 = vmatprep.mubr.bf16.mxu1 %v10026_v35 }
 0x10b   :  { %v9433_v47 = vcombine.high %v1046_v18, %v1050_v20  ;;  %v910_v59 = vld [vmem:[#allocation5 + $0x1940] sm:$0xff]  ;;  %6628 = vmatprep.subr.bf16.mxu0 %v9305_v45  ;;  %v9432_v37 = vcombine.low %v1046_v18, %v1050_v20 }
 0x10c   :  { %v914_v60 = vld [vmem:[#allocation5 + $0x1960] sm:$0xff]  ;;  %6629 = vmatpush1.bf16.msra.mxu0 %v9304_v36 }
 0x10d   :  { %v1038_v51 = vld [vmem:[#allocation5 + $0x1d40] sm:$0xff]  ;;  %v9297_v38 = vcombine.high %v910_v59, %v914_v60  ;;  %6671 = vmatprep.subr.bf16.mxu1 %v9433_v47  ;;  %v9296_v44 = vcombine.low %v910_v59, %v914_v60 }
 0x10e   :  { %v1042_v52 = vld [vmem:[#allocation5 + $0x1d60] sm:$0xff]  ;;  %6672 = vmatpush1.bf16.msra.mxu1 %v9432_v37 }
 0x10f   :  { %v9425_v39 = vcombine.high %v1038_v51, %v1042_v52  ;;  %v902_v40 = vld [vmem:[#allocation5 + $0x1900] sm:$0xff]  ;;  %6630 = vmatprep.subr.bf16.mxu0 %v9297_v38  ;;  %v9424_v46 = vcombine.low %v1038_v51, %v1042_v52 }
 0x110   :  { %v906_v41 = vld [vmem:[#allocation5 + $0x1920] sm:$0xff]  ;;  %6631 = vmatpush1.bf16.msra.mxu0 %v9296_v44 }
 0x111   :  { %v1030_v42 = vld [vmem:[#allocation5 + $0x1d00] sm:$0xff]  ;;  %v9289_v50 = vcombine.high %v902_v40, %v906_v41  ;;  %6673 = vmatprep.subr.bf16.mxu1 %v9425_v39  ;;  %v9288_v23 = vcombine.low %v902_v40, %v906_v41 }
 0x112   :  { %v1034_v43 = vld [vmem:[#allocation5 + $0x1d20] sm:$0xff]  ;;  %6674 = vmatpush1.bf16.msra.mxu1 %v9424_v46 }
 0x113   :  { %v9417_v53 = vcombine.high %v1030_v42, %v1034_v43  ;;  %v894_v56 = vld [vmem:[#allocation5 + $0x18c0] sm:$0xff]  ;;  %6632 = vmatprep.subr.bf16.mxu0 %v9289_v50  ;;  %v9416_v24 = vcombine.low %v1030_v42, %v1034_v43 }
 0x114   :  { %v898_v57 = vld [vmem:[#allocation5 + $0x18e0] sm:$0xff]  ;;  %6633 = vmatpush1.bf16.msra.mxu0 %v9288_v23 }
 0x115   :  { %v1022_v61 = vld [vmem:[#allocation5 + $0x1cc0] sm:$0xff]  ;;  %v9281_v28 = vcombine.high %v894_v56, %v898_v57  ;;  %6675 = vmatprep.subr.bf16.mxu1 %v9417_v53  ;;  %v9280_v6 = vcombine.low %v894_v56, %v898_v57 }
 0x116   :  { %v1026_v62 = vld [vmem:[#allocation5 + $0x1ce0] sm:$0xff]  ;;  %6676 = vmatpush1.bf16.msra.mxu1 %v9416_v24 }
 0x117   :  { %v9409_v1 = vcombine.high %v1022_v61, %v1026_v62  ;;  %v886_v2 = vld [vmem:[#allocation5 + $0x1880] sm:$0xff]  ;;  %6634 = vmatprep.subr.bf16.mxu0 %v9281_v28  ;;  %v9408_v7 = vcombine.low %v1022_v61, %v1026_v62 }
 0x118   :  { %v890_v3 = vld [vmem:[#allocation5 + $0x18a0] sm:$0xff]  ;;  %6635 = vmatpush1.bf16.msra.mxu0 %v9280_v6 }
 0x119   :  { %v1014_v4 = vld [vmem:[#allocation5 + $0x1c80] sm:$0xff]  ;;  %v9273_v8 = vcombine.high %v886_v2, %v890_v3  ;;  %6677 = vmatprep.subr.bf16.mxu1 %v9409_v1  ;;  %v9272_v14 = vcombine.low %v886_v2, %v890_v3 }
 0x11a   :  { %v1018_v5 = vld [vmem:[#allocation5 + $0x1ca0] sm:$0xff]  ;;  %6678 = vmatpush1.bf16.msra.mxu1 %v9408_v7 }
 0x11b   :  { %v9401_v9 = vcombine.high %v1014_v4, %v1018_v5  ;;  %v878_v10 = vld [vmem:[#allocation5 + $0x1840] sm:$0xff]  ;;  %6636 = vmatprep.subr.bf16.mxu0 %v9273_v8  ;;  %v9400_v15 = vcombine.low %v1014_v4, %v1018_v5 }
 0x11c   :  { %v882_v11 = vld [vmem:[#allocation5 + $0x1860] sm:$0xff]  ;;  %6637 = vmatpush1.bf16.msra.mxu0 %v9272_v14 }
 0x11d   :  { %v1006_v12 = vld [vmem:[#allocation5 + $0x1c40] sm:$0xff]  ;;  %v9265_v16 = vcombine.high %v878_v10, %v882_v11  ;;  %6679 = vmatprep.subr.bf16.mxu1 %v9401_v9  ;;  %v9264_v45 = vcombine.low %v878_v10, %v882_v11 }
 0x11e   :  { %v1010_v13 = vld [vmem:[#allocation5 + $0x1c60] sm:$0xff]  ;;  %6680 = vmatpush1.bf16.msra.mxu1 %v9400_v15 }
 0x11f   :  { %v9393_v17 = vcombine.high %v1006_v12, %v1010_v13  ;;  %v870_v18 = vld [vmem:[#allocation5 + $0x1800] sm:$0xff]  ;;  %6638 = vmatprep.subr.bf16.mxu0 %v9265_v16  ;;  %v9392_v47 = vcombine.low %v1006_v12, %v1010_v13 }
 0x120   :  { %v874_v20 = vld [vmem:[#allocation5 + $0x1820] sm:$0xff]  ;;  %6639 = vmatpush1.bf16.msra.mxu0 %v9264_v45 }
 0x121   :  { %v998_v54 = vld [vmem:[#allocation5 + $0x1c00] sm:$0xff]  ;;  %v9257_v59 = vcombine.high %v870_v18, %v874_v20  ;;  %6681 = vmatprep.subr.bf16.mxu1 %v9393_v17  ;;  %v9256_v38 = vcombine.low %v870_v18, %v874_v20 }
 0x122   :  { %v1002_v31 = vld [vmem:[#allocation5 + $0x1c20] sm:$0xff]  ;;  %6682 = vmatpush1.bf16.msra.mxu1 %v9392_v47 }
 0x123   :  { %v9385_v60 = vcombine.high %v998_v54, %v1002_v31  ;;  %v990_v51 = vld [vmem:[#allocation5 + $0x1bc0] sm:$0xff]  ;;  %6640 = vmatprep.subr.bf16.mxu0 %v9257_v59  ;;  %v9384_v39 = vcombine.low %v998_v54, %v1002_v31 }
 0x124   :  { %v994_v52 = vld [vmem:[#allocation5 + $0x1be0] sm:$0xff]  ;;  %6641 = vmatpush1.bf16.msra.mxu0 %v9256_v38 }
 0x125   :  { %v1118_v36 = vld [vmem:[#allocation5 + $0x1fc0] sm:$0xff]  ;;  %v9377_v40 = vcombine.high %v990_v51, %v994_v52  ;;  %6683 = vmatprep.subr.bf16.mxu1 %v9385_v60  ;;  %v9376_v50 = vcombine.low %v990_v51, %v994_v52 }
 0x126   :  { %v1122_v37 = vld [vmem:[#allocation5 + $0x1fe0] sm:$0xff]  ;;  %6684 = vmatpush1.bf16.msra.mxu1 %v9384_v39 }
 0x127   :  { %v9505_v41 = vcombine.high %v1118_v36, %v1122_v37  ;;  %v982_v42 = vld [vmem:[#allocation5 + $0x1b80] sm:$0xff]  ;;  %6642 = vmatprep.subr.bf16.mxu0 %v9377_v40  ;;  %v9504_v53 = vcombine.low %v1118_v36, %v1122_v37 }
 0x128   :  { %v986_v43 = vld [vmem:[#allocation5 + $0x1ba0] sm:$0xff]  ;;  %6643 = vmatpush2.bf16.msra.mxu0 %v9376_v50 }
 0x129   :  { %v1110_v44 = vld [vmem:[#allocation5 + $0x1f80] sm:$0xff]  ;;  %v9369_v56 = vcombine.high %v982_v42, %v986_v43  ;;  %6685 = vmatprep.subr.bf16.mxu1 %v9505_v41  ;;  %v9368_v28 = vcombine.low %v982_v42, %v986_v43  ;;  %v1128_v41 = vlaneseq }
 0x12a   :  { %v1114_v46 = vld [vmem:[#allocation5 + $0x1fa0] sm:$0xff]  ;;  %6686 = vmatpush2.bf16.msra.mxu1 %v9504_v53 }
 0x12b   :  { %v9497_v57 = vcombine.high %v1110_v44, %v1114_v46  ;;  %v974_v61 = vld [vmem:[#allocation5 + $0x1b40] sm:$0xff]  ;;  %6644 = vmatprep.subr.bf16.mxu0 %v9369_v56  ;;  %v9496_v1 = vcombine.low %v1110_v44, %v1114_v46 }
 0x12c   :  { %v978_v62 = vld [vmem:[#allocation5 + $0x1b60] sm:$0xff]  ;;  %6645 = vmatpush2.bf16.msra.mxu0 %v9368_v28  ;;  %v159_v28 = vld [vmem:[#allocation5 + $0x1c8] sm:$0xff] }
 0x12d   :  { %v1102_v23 = vld [vmem:[#allocation5 + $0x1f40] sm:$0xff]  ;;  %v9361_v2 = vcombine.high %v974_v61, %v978_v62  ;;  %6687 = vmatprep.subr.bf16.mxu1 %v9497_v57  ;;  %v9360_v8 = vcombine.low %v974_v61, %v978_v62  ;;  %v10031_v61 = vshrl.u32 %v1128_v41, 7 }
 0x12e   :  { %v1106_v24 = vld [vmem:[#allocation5 + $0x1f60] sm:$0xff]  ;;  %6688 = vmatpush2.bf16.msra.mxu1 %v9496_v1  ;;  %v163_v1 = vld [vmem:[#allocation5 + $0x1e8] sm:$0xff] }
 0x12f   :  { %v9489_v3 = vcombine.high %v1102_v23, %v1106_v24  ;;  %v966_v4 = vld [vmem:[#allocation5 + $0x1b00] sm:$0xff]  ;;  %6646 = vmatprep.subr.bf16.mxu0 %v9361_v2  ;;  %v9488_v9 = vcombine.low %v1102_v23, %v1106_v24  ;;  %v287_v2 = vld [vmem:[#allocation5 + $0x5c8] sm:$0xff] }
 0x130   :  { %v970_v5 = vld [vmem:[#allocation5 + $0x1b20] sm:$0xff]  ;;  %6647 = vmatpush2.bf16.msra.mxu0 %v9360_v8  ;;  %v8547_v8 = vcombine.high %v159_v28, %v163_v1 }
 0x131   :  { %v1094_v6 = vld [vmem:[#allocation5 + $0x1f00] sm:$0xff]  ;;  %v9353_v10 = vcombine.high %v966_v4, %v970_v5  ;;  %6689 = vmatprep.subr.bf16.mxu1 %v9489_v3  ;;  %v9352_v16 = vcombine.low %v966_v4, %v970_v5  ;;  %v291_v3 = vld [vmem:[#allocation5 + $0x5e8] sm:$0xff]  ;;  %v1130_v5 = vsub.s32 0, %v10031_v61 }
 0x132   :  { %v1098_v7 = vld [vmem:[#allocation5 + $0x1f20] sm:$0xff]  ;;  %6690 = vmatpush2.bf16.msra.mxu1 %v9488_v9  ;;  %v8675_v9 = vcombine.high %v287_v2, %v291_v3 }
 0x133   :  { %v9481_v11 = vcombine.high %v1094_v6, %v1098_v7  ;;  %v958_v12 = vld [vmem:[#allocation5 + $0x1ac0] sm:$0xff]  ;;  %6648 = vmatprep.subr.bf16.mxu0 %v9353_v10  ;;  %v9480_v17 = vcombine.low %v1094_v6, %v1098_v7  ;;  %v151_v10 = vld [vmem:[#allocation5 + $0x188] sm:$0xff] }
 0x134   :  { %v962_v13 = vld [vmem:[#allocation5 + $0x1ae0] sm:$0xff]  ;;  %6649 = vmatpush2.bf16.msra.mxu0 %v9352_v16  ;;  %v10040_v16 = vcombine.low %v10015_v55, %v10017_v30 }
 0x135   :  { %v1086_v14 = vld [vmem:[#allocation5 + $0x1ec0] sm:$0xff]  ;;  %v9345_v18 = vcombine.high %v958_v12, %v962_v13  ;;  %6691 = vmatprep.subr.bf16.mxu1 %v9481_v11  ;;  %v9344_v59 = vcombine.low %v958_v12, %v962_v13  ;;  %v155_v11 = vld [vmem:[#allocation5 + $0x1a8] sm:$0xff]  ;;  %v10036_v12 = vcombine.low %v10007_v22, %v10009_v26 }
 0x136   :  { %v1090_v15 = vld [vmem:[#allocation5 + $0x1ee0] sm:$0xff]  ;;  %6692 = vmatpush2.bf16.msra.mxu1 %v9480_v17  ;;  %v279_v13 = vld [vmem:[#allocation5 + $0x588] sm:$0xff]  ;;  %v8546_v17 = vcombine.low %v159_v28, %v163_v1  ;;  %v8538_v55 = vcombine.low %v151_v10, %v155_v11 }
 0x137   :  { %v9473_v20 = vcombine.high %v1086_v14, %v1090_v15  ;;  %v950_v54 = vld [vmem:[#allocation5 + $0x1a80] sm:$0xff]  ;;  %6650 = vmatprep.subr.bf16.mxu0 %v9345_v18  ;;  %v9472_v60 = vcombine.low %v1086_v14, %v1090_v15  ;;  %v283_v14 = vld [vmem:[#allocation5 + $0x5a8] sm:$0xff]  ;;  %v8674_v18 = vcombine.low %v287_v2, %v291_v3 }
 0x138   :  { %v954_v31 = vld [vmem:[#allocation5 + $0x1aa0] sm:$0xff]  ;;  %6651 = vmatpush2.bf16.msra.mxu0 %v9344_v59  ;;  %v271_v22 = vld [vmem:[#allocation5 + $0x548] sm:$0xff] }
 0x139   :  { %v1078_v45 = vld [vmem:[#allocation5 + $0x1e80] sm:$0xff]  ;;  %v9337_v51 = vcombine.high %v950_v54, %v954_v31  ;;  %6693 = vmatprep.subr.bf16.mxu1 %v9473_v20  ;;  %v9336_v40 = vcombine.low %v950_v54, %v954_v31  ;;  %v8539_v20 = vcombine.high %v151_v10, %v155_v11  ;;  %v8667_v54 = vcombine.high %v279_v13, %v283_v14  ;;  %v143_v31 = vld [vmem:[#allocation5 + $0x148] sm:$0xff] }
 0x13a   :  { %v1082_v47 = vld [vmem:[#allocation5 + $0x1ea0] sm:$0xff]  ;;  %6694 = vmatpush2.bf16.msra.mxu1 %v9472_v60  ;;  %v275_v26 = vld [vmem:[#allocation5 + $0x568] sm:$0xff] }
 0x13b   :  { %v9465_v52 = vcombine.high %v1078_v45, %v1082_v47  ;;  %v942_v36 = vld [vmem:[#allocation5 + $0x1a40] sm:$0xff]  ;;  %6652 = vmatprep.subr.bf16.mxu0 %v9337_v51  ;;  %v9464_v42 = vcombine.low %v1078_v45, %v1082_v47  ;;  %v147_v45 = vld [vmem:[#allocation5 + $0x168] sm:$0xff]  ;;  %v8666_v51 = vcombine.low %v279_v13, %v283_v14 }
 0x13c   :  { %v946_v37 = vld [vmem:[#allocation5 + $0x1a60] sm:$0xff]  ;;  %6653 = vmatpush2.bf16.msra.mxu0 %v9336_v40  ;;  %v139_v40 = vld [vmem:[#allocation5 + $0x128] sm:$0xff] }
 0x13d   :  { %v1070_v38 = vld [vmem:[#allocation5 + $0x1e40] sm:$0xff]  ;;  %v9329_v43 = vcombine.high %v942_v36, %v946_v37  ;;  %6695 = vmatprep.subr.bf16.mxu1 %v9465_v52  ;;  %v9328_v57 = vcombine.low %v942_v36, %v946_v37  ;;  %v8531_v52 = vcombine.high %v143_v31, %v147_v45  ;;  %v255_v28 = vld [vmem:[#allocation5 + $0x4c8] sm:$0xff] }
 0x13e   :  { %v1074_v39 = vld [vmem:[#allocation5 + $0x1e60] sm:$0xff]  ;;  %6696 = vmatpush2.bf16.msra.mxu1 %v9464_v42  ;;  %v263_v42 = vld [vmem:[#allocation5 + $0x508] sm:$0xff] }
 0x13f   :  { %v9457_v44 = vcombine.high %v1070_v38, %v1074_v39  ;;  %v934_v46 = vld [vmem:[#allocation5 + $0x1a00] sm:$0xff]  ;;  %6654 = vmatprep.subr.bf16.mxu0 %v9329_v43  ;;  %v9456_v62 = vcombine.low %v1070_v38, %v1074_v39  ;;  %v8659_v38 = vcombine.high %v271_v22, %v275_v26  ;;  %v135_v39 = vld [vmem:[#allocation5 + $0x108] sm:$0xff] }
 0x140   :  { %v938_v50 = vld [vmem:[#allocation5 + $0x1a20] sm:$0xff]  ;;  %6655 = vmatpush2.bf16.msra.mxu0 %v9328_v57  ;;  %v267_v43 = vld [vmem:[#allocation5 + $0x528] sm:$0xff]  ;;  %v8522_v2 = vcombine.low %v135_v39, %v139_v40 }
 0x141   :  { %v1062_v53 = vld [vmem:[#allocation5 + $0x1e00] sm:$0xff]  ;;  %v9321_v23 = vcombine.high %v934_v46, %v938_v50  ;;  %6697 = vmatprep.subr.bf16.mxu1 %v9457_v44  ;;  %v9320_v4 = vcombine.low %v934_v46, %v938_v50  ;;  %v8530_v46 = vcombine.low %v143_v31, %v147_v45  ;;  %v259_v1 = vld [vmem:[#allocation5 + $0x4e8] sm:$0xff]  ;;  %v8650_v3 = vcombine.low %v263_v42, %v267_v43 }
 0x142   :  { %v1066_v56 = vld [vmem:[#allocation5 + $0x1e20] sm:$0xff]  ;;  %6698 = vmatpush2.bf16.msra.mxu1 %v9456_v62  ;;  %v8651_v62 = vcombine.high %v263_v42, %v267_v43  ;;  %v8642_v11 = vcombine.low %v255_v28, %v259_v1  ;;  %v355_v42 = vld [vmem:[#allocation5 + $0x7e8] sm:$0xff] }
 0x143   :  { %v9449_v24 = vcombine.high %v1062_v53, %v1066_v56  ;;  %6656 = vmatprep.subr.bf16.mxu0 %v9321_v23  ;;  %v9448_v6 = vcombine.low %v1062_v53, %v1066_v56  ;;  %v1126_v7 = vld [vmem:[#allocation7] sm:$0xff]  ;;  %v8658_v53 = vcombine.low %v271_v22, %v275_v26  ;;  %v8523_v56 = vcombine.high %v135_v39, %v139_v40  ;;  %v127_v23 = vld [vmem:[#allocation5 + $0xc8] sm:$0xff] }
 0x144   :  { %6657 = vmatpush2.bf16.msra.mxu0 %v9320_v4  ;;  %v1131_v15 = vrot.slane %v1126_v7, %v1130_v5  ;;  %v8643_v5 = vcombine.high %v255_v28, %v259_v1  ;;  %v123_v7 = vld [vmem:[#allocation5 + $0xa8] sm:$0xff] }
 0x145   :  { %6699 = vmatprep.subr.bf16.mxu1 %v9449_v24  ;;  %6712 = vmatprep.subr.bf16.mxu0 %v8547_v8  ;;  %v6402_v47 = vpop.f32.mrf.mxu0  ;;  %v131_v24 = vld [vmem:[#allocation5 + $0xe8] sm:$0xff] }
 0x146   :  { %6700 = vmatpush2.bf16.msra.mxu1 %v9448_v6  ;;  %v6403_v59 = vadd.f32 %v6402_v47, %v1131_v15  ;;  %v8515_v4 = vcombine.high %v127_v23, %v131_v24  ;;  %v119_v6 = vld [vmem:[#allocation5 + $0x88] sm:$0xff]  ;;  %v8514_v10 = vcombine.low %v127_v23, %v131_v24 }
 0x147   :  { %6755 = vmatprep.subr.bf16.mxu1 %v8675_v9  ;;  %6659 = vmatmul.mubr.bf16.vlgmr.msra.gmra.mxu0 %v10036_v12  ;;  %v6445_v60 = vpop.f32.mrf.mxu1  ;;  %v10044_v30 = vpop.f32.mrf.mxu0  ;;  %v247_v8 = vld [vmem:[#allocation5 + $0x488] sm:$0xff]  ;;  %v8507_v13 = vcombine.high %v119_v6, %v123_v7 }
 0x148   :  { %6713 = vmatpush1.bf16.msra.mxu0 %v8546_v17  ;;  %v10046_v36 = vadd.f32 %v6445_v60, %v6403_v59  ;;  %6744 = vmatprep.mubr.bf16.mxu0 %v9935_v58  ;;  %v251_v9 = vld [vmem:[#allocation5 + $0x4a8] sm:$0xff] }
 0x149   :  { %6702 = vmatmul.mubr.bf16.vlgmr.msra.gmra.mxu1 %v10040_v16  ;;  %6714 = vmatprep.subr.bf16.mxu0 %v8539_v20  ;;  %v10048_v37 = vpop.f32.mrf.mxu1  ;;  %v6406_v41 = vpop.f32.mrf.mxu0  ;;  %v8635_v14 = vcombine.high %v247_v8, %v251_v9  ;;  %v115_v17 = vld [vmem:[#allocation5 + $0x68] sm:$0xff]  ;;  %v8634_v31 = vcombine.low %v247_v8, %v251_v9 }
 0x14a   :  { %6756 = vmatpush1.bf16.msra.mxu1 %v8674_v18  ;;  %6787 = vmatprep.mubr.bf16.mxu1 %v9943_v63  ;;  %v6407_v44 = vadd.f32 %v6406_v41, %v1131_v15  ;;  %v111_v15 = vld [vmem:[#allocation5 + $0x48] sm:$0xff] }
 0x14b   :  { %6757 = vmatprep.subr.bf16.mxu1 %v8667_v54  ;;  %v6449_v50 = vpop.f32.mrf.mxu1  ;;  %v239_v18 = vld [vmem:[#allocation5 + $0x448] sm:$0xff]  ;;  %v8506_v54 = vcombine.low %v119_v6, %v123_v7  ;;  %v8499_v45 = vcombine.high %v111_v15, %v115_v17 }
 0x14c   :  { %6715 = vmatpush1.bf16.msra.mxu0 %v8538_v55  ;;  %v10052_v57 = vadd.f32 %v6449_v50, %v6407_v44  ;;  %v243_v20 = vld [vmem:[#allocation5 + $0x468] sm:$0xff]  ;;  %v8498_v55 = vcombine.low %v111_v15, %v115_v17 }
 0x14d   :  { %6716 = vmatprep.subr.bf16.mxu0 %v8531_v52  ;;  %v8627_v47 = vcombine.high %v239_v18, %v243_v20  ;;  %v103_v22 = vld [vmem:[#allocation5 + $0x8] sm:$0xff] }
 0x14e   :  { %6758 = vmatpush1.bf16.msra.mxu1 %v8666_v51  ;;  %v107_v26 = vld [vmem:[#allocation5 + $0x28] sm:$0xff]  ;;  %v8626_v51 = vcombine.low %v239_v18, %v243_v20 }
 0x14f   :  { %6759 = vmatprep.subr.bf16.mxu1 %v8659_v38  ;;  %v231_v59 = vld [vmem:[#allocation5 + $0x408] sm:$0xff]  ;;  %v8491_v52 = vcombine.high %v103_v22, %v107_v26  ;;  %v8490_v43 = vcombine.low %v103_v22, %v107_v26 }
 0x150   :  { %6717 = vmatpush1.bf16.msra.mxu0 %v8530_v46  ;;  %v235_v60 = vld [vmem:[#allocation5 + $0x428] sm:$0xff] }
 0x151   :  { %6718 = vmatprep.subr.bf16.mxu0 %v8523_v56  ;;  %v8619_v38 = vcombine.high %v231_v59, %v235_v60  ;;  %v223_v39 = vld [vmem:[#allocation5 + $0x3c8] sm:$0xff]  ;;  %v8618_v44 = vcombine.low %v231_v59, %v235_v60 }
 0x152   :  { %6760 = vmatpush1.bf16.msra.mxu1 %v8658_v53  ;;  %v227_v40 = vld [vmem:[#allocation5 + $0x3e8] sm:$0xff] }
 0x153   :  { %6761 = vmatprep.subr.bf16.mxu1 %v8651_v62  ;;  %v351_v41 = vld [vmem:[#allocation5 + $0x7c8] sm:$0xff]  ;;  %v8611_v46 = vcombine.high %v223_v39, %v227_v40  ;;  %v8610_v24 = vcombine.low %v223_v39, %v227_v40 }
 0x154   :  { %6719 = vmatpush1.bf16.msra.mxu0 %v8522_v2  ;;  %v8739_v50 = vcombine.high %v351_v41, %v355_v42  ;;  %v215_v53 = vld [vmem:[#allocation5 + $0x388] sm:$0xff]  ;;  %v8738_v28 = vcombine.low %v351_v41, %v355_v42 }
 0x155   :  { %6720 = vmatprep.subr.bf16.mxu0 %v8515_v4  ;;  %v219_v56 = vld [vmem:[#allocation5 + $0x3a8] sm:$0xff] }
 0x156   :  { %6762 = vmatpush1.bf16.msra.mxu1 %v8650_v3  ;;  %v343_v62 = vld [vmem:[#allocation5 + $0x788] sm:$0xff]  ;;  %v8603_v1 = vcombine.high %v215_v53, %v219_v56  ;;  %v8602_v7 = vcombine.low %v215_v53, %v219_v56 }
 0x157   :  { %6763 = vmatprep.subr.bf16.mxu1 %v8643_v5  ;;  %v347_v23 = vld [vmem:[#allocation5 + $0x7a8] sm:$0xff] }
 0x158   :  { %6721 = vmatpush1.bf16.msra.mxu0 %v8514_v10  ;;  %v8731_v2 = vcombine.high %v343_v62, %v347_v23  ;;  %v207_v3 = vld [vmem:[#allocation5 + $0x348] sm:$0xff]  ;;  %v8730_v8 = vcombine.low %v343_v62, %v347_v23 }
 0x159   :  { %6722 = vmatprep.subr.bf16.mxu0 %v8507_v13  ;;  %v211_v4 = vld [vmem:[#allocation5 + $0x368] sm:$0xff] }
 0x15a   :  { %6764 = vmatpush1.bf16.msra.mxu1 %v8642_v11  ;;  %v335_v5 = vld [vmem:[#allocation5 + $0x748] sm:$0xff]  ;;  %v8595_v9 = vcombine.high %v207_v3, %v211_v4  ;;  %v8594_v17 = vcombine.low %v207_v3, %v211_v4 }
 0x15b   :  { %6765 = vmatprep.subr.bf16.mxu1 %v8635_v14  ;;  %v339_v6 = vld [vmem:[#allocation5 + $0x768] sm:$0xff] }
 0x15c   :  { %6723 = vmatpush1.bf16.msra.mxu0 %v8506_v54  ;;  %v8723_v10 = vcombine.high %v335_v5, %v339_v6  ;;  %v199_v11 = vld [vmem:[#allocation5 + $0x308] sm:$0xff]  ;;  %v8722_v18 = vcombine.low %v335_v5, %v339_v6 }
 0x15d   :  { %6724 = vmatprep.subr.bf16.mxu0 %v8499_v45  ;;  %v203_v13 = vld [vmem:[#allocation5 + $0x328] sm:$0xff] }
 0x15e   :  { %6766 = vmatpush1.bf16.msra.mxu1 %v8634_v31  ;;  %v327_v14 = vld [vmem:[#allocation5 + $0x708] sm:$0xff]  ;;  %v8587_v20 = vcombine.high %v199_v11, %v203_v13  ;;  %v8586_v26 = vcombine.low %v199_v11, %v203_v13 }
 0x15f   :  { %6767 = vmatprep.subr.bf16.mxu1 %v8627_v47  ;;  %v331_v15 = vld [vmem:[#allocation5 + $0x728] sm:$0xff] }
 0x160   :  { %6725 = vmatpush1.bf16.msra.mxu0 %v8498_v55  ;;  %v8715_v54 = vcombine.high %v327_v14, %v331_v15  ;;  %v191_v31 = vld [vmem:[#allocation5 + $0x2c8] sm:$0xff]  ;;  %v8714_v59 = vcombine.low %v327_v14, %v331_v15 }
 0x161   :  { %6726 = vmatprep.subr.bf16.mxu0 %v8491_v52  ;;  %v195_v45 = vld [vmem:[#allocation5 + $0x2e8] sm:$0xff] }
 0x162   :  { %6768 = vmatpush1.bf16.msra.mxu1 %v8626_v51  ;;  %v319_v47 = vld [vmem:[#allocation5 + $0x6c8] sm:$0xff]  ;;  %v8579_v60 = vcombine.high %v191_v31, %v195_v45  ;;  %v8578_v40 = vcombine.low %v191_v31, %v195_v45 }
 0x163   :  { %6769 = vmatprep.subr.bf16.mxu1 %v8619_v38  ;;  %v323_v22 = vld [vmem:[#allocation5 + $0x6e8] sm:$0xff] }
 0x164   :  { %6727 = vmatpush1.bf16.msra.mxu0 %v8490_v43  ;;  %v8707_v55 = vcombine.high %v319_v47, %v323_v22  ;;  %v183_v51 = vld [vmem:[#allocation5 + $0x288] sm:$0xff]  ;;  %v8706_v41 = vcombine.low %v319_v47, %v323_v22  ;;  %v10054_v47 = vpop.f32.mrf.mxu0 }
 0x165   :  { %6728 = vmatprep.subr.bf16.mxu0 %v8611_v46  ;;  %v187_v52 = vld [vmem:[#allocation5 + $0x2a8] sm:$0xff] }
 0x166   :  { %6770 = vmatpush1.bf16.msra.mxu1 %v8618_v44  ;;  %v311_v38 = vld [vmem:[#allocation5 + $0x688] sm:$0xff]  ;;  %v8571_v42 = vcombine.high %v183_v51, %v187_v52  ;;  %v8570_v56 = vcombine.low %v183_v51, %v187_v52 }
 0x167   :  { %6771 = vmatprep.subr.bf16.mxu1 %v8739_v50  ;;  %v315_v39 = vld [vmem:[#allocation5 + $0x6a8] sm:$0xff] }
 0x168   :  { %6729 = vmatpush2.bf16.msra.mxu0 %v8610_v24  ;;  %v8699_v43 = vcombine.high %v311_v38, %v315_v39  ;;  %v175_v44 = vld [vmem:[#allocation5 + $0x248] sm:$0xff]  ;;  %v8698_v62 = vcombine.low %v311_v38, %v315_v39 }
 0x169   :  { %6730 = vmatprep.subr.bf16.mxu0 %v8603_v1  ;;  %v179_v46 = vld [vmem:[#allocation5 + $0x268] sm:$0xff] }
 0x16a   :  { %6772 = vmatpush2.bf16.msra.mxu1 %v8738_v28  ;;  %v303_v50 = vld [vmem:[#allocation5 + $0x648] sm:$0xff]  ;;  %v8563_v23 = vcombine.high %v175_v44, %v179_v46  ;;  %v8562_v4 = vcombine.low %v175_v44, %v179_v46 }
 0x16b   :  { %6773 = vmatprep.subr.bf16.mxu1 %v8731_v2  ;;  %v307_v53 = vld [vmem:[#allocation5 + $0x668] sm:$0xff] }
 0x16c   :  { %6731 = vmatpush2.bf16.msra.mxu0 %v8602_v7  ;;  %v8691_v24 = vcombine.high %v303_v50, %v307_v53  ;;  %v167_v28 = vld [vmem:[#allocation5 + $0x208] sm:$0xff]  ;;  %v8690_v5 = vcombine.low %v303_v50, %v307_v53 }
 0x16d   :  { %6732 = vmatprep.subr.bf16.mxu0 %v8595_v9  ;;  %v171_v1 = vld [vmem:[#allocation5 + $0x228] sm:$0xff] }
 0x16e   :  { %6774 = vmatpush2.bf16.msra.mxu1 %v8730_v8  ;;  %v295_v2 = vld [vmem:[#allocation5 + $0x608] sm:$0xff]  ;;  %v8555_v6 = vcombine.high %v167_v28, %v171_v1  ;;  %v8554_v13 = vcombine.low %v167_v28, %v171_v1 }
 0x16f   :  { %6775 = vmatprep.subr.bf16.mxu1 %v8723_v10  ;;  %v299_v3 = vld [vmem:[#allocation5 + $0x628] sm:$0xff] }
 0x170   :  { %6733 = vmatpush2.bf16.msra.mxu0 %v8594_v17  ;;  %v8683_v7 = vcombine.high %v295_v2, %v299_v3  ;;  %v415_v8 = vld [vmem:[#allocation5 + $0x9c8] sm:$0xff]  ;;  %v8682_v14 = vcombine.low %v295_v2, %v299_v3 }
 0x171   :  { %6734 = vmatprep.subr.bf16.mxu0 %v8587_v20  ;;  %v419_v9 = vld [vmem:[#allocation5 + $0x9e8] sm:$0xff] }
 0x172   :  { %6776 = vmatpush2.bf16.msra.mxu1 %v8722_v18  ;;  %v543_v10 = vld [vmem:[#allocation5 + $0xdc8] sm:$0xff]  ;;  %v8803_v15 = vcombine.high %v415_v8, %v419_v9  ;;  %v8802_v45 = vcombine.low %v415_v8, %v419_v9 }
 0x173   :  { %6777 = vmatprep.subr.bf16.mxu1 %v8715_v54  ;;  %v547_v11 = vld [vmem:[#allocation5 + $0xde8] sm:$0xff] }
 0x174   :  { %6735 = vmatpush2.bf16.msra.mxu0 %v8586_v26  ;;  %v8931_v17 = vcombine.high %v543_v10, %v547_v11  ;;  %v407_v18 = vld [vmem:[#allocation5 + $0x988] sm:$0xff]  ;;  %v8930_v22 = vcombine.low %v543_v10, %v547_v11 }
 0x175   :  { %6736 = vmatprep.subr.bf16.mxu0 %v8579_v60  ;;  %v411_v20 = vld [vmem:[#allocation5 + $0x9a8] sm:$0xff] }
 0x176   :  { %6778 = vmatpush2.bf16.msra.mxu1 %v8714_v59  ;;  %v535_v54 = vld [vmem:[#allocation5 + $0xd88] sm:$0xff]  ;;  %v8795_v26 = vcombine.high %v407_v18, %v411_v20  ;;  %v10056_v59 = vpop.f32.mrf.mxu1 }
 0x177   :  { %6779 = vmatprep.subr.bf16.mxu1 %v8707_v55  ;;  %v539_v31 = vld [vmem:[#allocation5 + $0xda8] sm:$0xff] }
 0x178   :  { %6737 = vmatpush2.bf16.msra.mxu0 %v8578_v40  ;;  %v8923_v60 = vcombine.high %v535_v54, %v539_v31  ;;  %v399_v55 = vld [vmem:[#allocation5 + $0x948] sm:$0xff]  ;;  %v8922_v44 = vcombine.low %v535_v54, %v539_v31 }
 0x179   :  { %6738 = vmatprep.subr.bf16.mxu0 %v8571_v42  ;;  %v403_v51 = vld [vmem:[#allocation5 + $0x968] sm:$0xff]  ;;  %v8794_v42 = vcombine.low %v407_v18, %v411_v20 }
 0x17a   :  { %6780 = vmatpush2.bf16.msra.mxu1 %v8706_v41  ;;  %v527_v38 = vld [vmem:[#allocation5 + $0xd48] sm:$0xff]  ;;  %v8787_v46 = vcombine.high %v399_v55, %v403_v51  ;;  %v8786_v2 = vcombine.low %v399_v55, %v403_v51 }
 0x17b   :  { %6781 = vmatprep.subr.bf16.mxu1 %v8699_v43  ;;  %v531_v39 = vld [vmem:[#allocation5 + $0xd68] sm:$0xff] }
 0x17c   :  { %6739 = vmatpush2.bf16.msra.mxu0 %v8570_v56  ;;  %v8915_v56 = vcombine.high %v527_v38, %v531_v39  ;;  %v523_v28 = vld [vmem:[#allocation5 + $0xd28] sm:$0xff] }
 0x17d   :  { %6740 = vmatprep.subr.bf16.mxu0 %v8563_v23  ;;  %v395_v23 = vld [vmem:[#allocation5 + $0x928] sm:$0xff] }
 0x17e   :  { %6782 = vmatpush2.bf16.msra.mxu1 %v8698_v62  ;;  %v391_v62 = vld [vmem:[#allocation5 + $0x908] sm:$0xff] }
 0x17f   :  { %6783 = vmatprep.subr.bf16.mxu1 %v8691_v24  ;;  %v519_v24 = vld [vmem:[#allocation5 + $0xd08] sm:$0xff] }
 0x180   :  { %6741 = vmatpush2.bf16.msra.mxu0 %v8562_v4  ;;  %v8914_v4 = vcombine.low %v527_v38, %v531_v39  ;;  %v383_v8 = vld [vmem:[#allocation5 + $0x8c8] sm:$0xff] }
 0x181   :  { %6742 = vmatprep.subr.bf16.mxu0 %v8555_v6  ;;  %v387_v9 = vld [vmem:[#allocation5 + $0x8e8] sm:$0xff] }
 0x182   :  { %6784 = vmatpush2.bf16.msra.mxu1 %v8690_v5  ;;  %v8779_v5 = vcombine.high %v391_v62, %v395_v23  ;;  %v511_v10 = vld [vmem:[#allocation5 + $0xcc8] sm:$0xff]  ;;  %v8770_v31 = vcombine.low %v383_v8, %v387_v9 }
 0x183   :  { %6785 = vmatprep.subr.bf16.mxu1 %v8683_v7  ;;  %v8907_v7 = vcombine.high %v519_v24, %v523_v28  ;;  %v515_v11 = vld [vmem:[#allocation5 + $0xce8] sm:$0xff] }
 0x184   :  { %6743 = vmatpush2.bf16.msra.mxu0 %v8554_v13  ;;  %v8778_v13 = vcombine.low %v391_v62, %v395_v23  ;;  %v379_v18 = vld [vmem:[#allocation5 + $0x8a8] sm:$0xff] }
 0x185   :  { %6798 = vmatprep.subr.bf16.mxu0 %v8803_v15  ;;  %v6488_v52 = vpop.f32.mrf.mxu0  ;;  %v8899_v15 = vcombine.high %v511_v10, %v515_v11  ;;  %v503_v20 = vld [vmem:[#allocation5 + $0xc88] sm:$0xff] }
 0x186   :  { %6786 = vmatpush2.bf16.msra.mxu1 %v8682_v14  ;;  %v6489_v40 = vadd.f32 %v6488_v52, %v10046_v36  ;;  %v8771_v14 = vcombine.high %v383_v8, %v387_v9  ;;  %v507_v54 = vld [vmem:[#allocation5 + $0xca8] sm:$0xff] }
 0x187   :  { %6841 = vmatprep.subr.bf16.mxu1 %v8931_v17  ;;  %6745 = vmatmul.mubr.bf16.vlgmr.msra.gmra.mxu0 %v9949_v21  ;;  %v6531_v41 = vpop.f32.mrf.mxu1  ;;  %v10061_v43 = vpop.f32.mrf.mxu0  ;;  %v375_v17 = vld [vmem:[#allocation5 + $0x888] sm:$0xff]  ;;  %v8890_v39 = vcombine.low %v503_v20, %v507_v54 }
 0x188   :  { %6799 = vmatpush1.bf16.msra.mxu0 %v8802_v45  ;;  %v10063_v50 = vadd.f32 %v6531_v41, %v6489_v40  ;;  %6830 = vmatprep.mubr.bf16.mxu0 %v9965_v32  ;;  %v8898_v45 = vcombine.low %v511_v10, %v515_v11  ;;  %v371_v55 = vld [vmem:[#allocation5 + $0x868] sm:$0xff]  ;;  %v8762_v38 = vcombine.low %v375_v17, %v379_v18 }
 0x189   :  { %6788 = vmatmul.mubr.bf16.vlgmr.msra.gmra.mxu1 %v9957_v25  ;;  %6800 = vmatprep.subr.bf16.mxu0 %v8795_v26  ;;  %v10065_v53 = vpop.f32.mrf.mxu1  ;;  %v6492_v36 = vpop.f32.mrf.mxu0  ;;  %v8891_v26 = vcombine.high %v503_v20, %v507_v54  ;;  %v495_v51 = vld [vmem:[#allocation5 + $0xc48] sm:$0xff] }
 0x18a   :  { %6842 = vmatpush1.bf16.msra.mxu1 %v8930_v22  ;;  %6873 = vmatprep.mubr.bf16.mxu1 %v9970_v33  ;;  %v6493_v1 = vadd.f32 %v6492_v36, %v10052_v57  ;;  %v8906_v57 = vcombine.low %v519_v24, %v523_v28  ;;  %v8763_v22 = vcombine.high %v375_v17, %v379_v18  ;;  %v499_v52 = vld [vmem:[#allocation5 + $0xc68] sm:$0xff] }
 0x18b   :  { %6843 = vmatprep.subr.bf16.mxu1 %v8923_v60  ;;  %v6535_v3 = vpop.f32.mrf.mxu1  ;;  %v367_v60 = vld [vmem:[#allocation5 + $0x848] sm:$0xff]  ;;  %v8883_v41 = vcombine.high %v495_v51, %v499_v52  ;;  %v8882_v23 = vcombine.low %v495_v51, %v499_v52 }
 0x18c   :  { %6801 = vmatpush1.bf16.msra.mxu0 %v8794_v42  ;;  %v10070_v6 = vadd.f32 %v6535_v3, %v6493_v1  ;;  %v8755_v40 = vcombine.high %v367_v60, %v371_v55  ;;  %v359_v42 = vld [vmem:[#allocation5 + $0x808] sm:$0xff]  ;;  %v8754_v62 = vcombine.low %v367_v60, %v371_v55 }
 0x18d   :  { %6802 = vmatprep.subr.bf16.mxu0 %v8787_v46  ;;  %v487_v46 = vld [vmem:[#allocation5 + $0xc08] sm:$0xff] }
 0x18e   :  { %6844 = vmatpush1.bf16.msra.mxu1 %v8922_v44  ;;  %v363_v44 = vld [vmem:[#allocation5 + $0x828] sm:$0xff] }
 0x18f   :  { %6845 = vmatprep.subr.bf16.mxu1 %v8915_v56  ;;  %v491_v56 = vld [vmem:[#allocation5 + $0xc28] sm:$0xff]  ;;  %v8747_v36 = vcombine.high %v359_v42, %v363_v44 }
 0x190   :  { %6803 = vmatpush1.bf16.msra.mxu0 %v8786_v2  ;;  %v8875_v24 = vcombine.high %v487_v46, %v491_v56  ;;  %v479_v28 = vld [vmem:[#allocation5 + $0xbc8] sm:$0xff] }
 0x191   :  { %6804 = vmatprep.subr.bf16.mxu0 %v8779_v5  ;;  %v483_v1 = vld [vmem:[#allocation5 + $0xbe8] sm:$0xff]  ;;  %v8874_v5 = vcombine.low %v487_v46, %v491_v56 }
 0x192   :  { %6846 = vmatpush1.bf16.msra.mxu1 %v8914_v4  ;;  %v607_v2 = vld [vmem:[#allocation5 + $0xfc8] sm:$0xff]  ;;  %v8746_v4 = vcombine.low %v359_v42, %v363_v44 }
 0x193   :  { %6847 = vmatprep.subr.bf16.mxu1 %v8907_v7  ;;  %v611_v3 = vld [vmem:[#allocation5 + $0xfe8] sm:$0xff]  ;;  %v8867_v7 = vcombine.high %v479_v28, %v483_v1 }
 0x194   :  { %6805 = vmatpush1.bf16.msra.mxu0 %v8778_v13  ;;  %v8995_v8 = vcombine.high %v607_v2, %v611_v3  ;;  %v471_v9 = vld [vmem:[#allocation5 + $0xb88] sm:$0xff] }
 0x195   :  { %6806 = vmatprep.subr.bf16.mxu0 %v8771_v14  ;;  %v475_v10 = vld [vmem:[#allocation5 + $0xba8] sm:$0xff]  ;;  %v8994_v14 = vcombine.low %v607_v2, %v611_v3 }
 0x196   :  { %6848 = vmatpush1.bf16.msra.mxu1 %v8906_v57  ;;  %v599_v11 = vld [vmem:[#allocation5 + $0xf88] sm:$0xff]  ;;  %v8866_v57 = vcombine.low %v479_v28, %v483_v1 }
 0x197   :  { %6849 = vmatprep.subr.bf16.mxu1 %v8899_v15  ;;  %v603_v13 = vld [vmem:[#allocation5 + $0xfa8] sm:$0xff]  ;;  %v8859_v15 = vcombine.high %v471_v9, %v475_v10 }
 0x198   :  { %6807 = vmatpush1.bf16.msra.mxu0 %v8770_v31  ;;  %v8987_v17 = vcombine.high %v599_v11, %v603_v13  ;;  %v463_v18 = vld [vmem:[#allocation5 + $0xb48] sm:$0xff] }
 0x199   :  { %6808 = vmatprep.subr.bf16.mxu0 %v8763_v22  ;;  %v467_v20 = vld [vmem:[#allocation5 + $0xb68] sm:$0xff]  ;;  %v8986_v22 = vcombine.low %v599_v11, %v603_v13 }
 0x19a   :  { %6850 = vmatpush1.bf16.msra.mxu1 %v8898_v45  ;;  %v591_v54 = vld [vmem:[#allocation5 + $0xf48] sm:$0xff]  ;;  %v8858_v45 = vcombine.low %v471_v9, %v475_v10 }
 0x19b   :  { %6851 = vmatprep.subr.bf16.mxu1 %v8891_v26  ;;  %v595_v31 = vld [vmem:[#allocation5 + $0xf68] sm:$0xff]  ;;  %v8851_v26 = vcombine.high %v463_v18, %v467_v20 }
 0x19c   :  { %6809 = vmatpush1.bf16.msra.mxu0 %v8762_v38  ;;  %v8979_v60 = vcombine.high %v591_v54, %v595_v31  ;;  %v455_v55 = vld [vmem:[#allocation5 + $0xb08] sm:$0xff] }
 0x19d   :  { %6810 = vmatprep.subr.bf16.mxu0 %v8755_v40  ;;  %v459_v51 = vld [vmem:[#allocation5 + $0xb28] sm:$0xff]  ;;  %v8978_v40 = vcombine.low %v591_v54, %v595_v31 }
 0x19e   :  { %6852 = vmatpush1.bf16.msra.mxu1 %v8890_v39  ;;  %v583_v52 = vld [vmem:[#allocation5 + $0xf08] sm:$0xff]  ;;  %v8850_v39 = vcombine.low %v463_v18, %v467_v20 }
 0x19f   :  { %6853 = vmatprep.subr.bf16.mxu1 %v8883_v41  ;;  %v587_v38 = vld [vmem:[#allocation5 + $0xf28] sm:$0xff]  ;;  %v8843_v41 = vcombine.high %v455_v55, %v459_v51 }
 0x1a0   :  { %6811 = vmatpush1.bf16.msra.mxu0 %v8754_v62  ;;  %v8971_v42 = vcombine.high %v583_v52, %v587_v38  ;;  %v447_v44 = vld [vmem:[#allocation5 + $0xac8] sm:$0xff] }
 0x1a1   :  { %6812 = vmatprep.subr.bf16.mxu0 %v8747_v36  ;;  %v451_v46 = vld [vmem:[#allocation5 + $0xae8] sm:$0xff]  ;;  %v8970_v36 = vcombine.low %v583_v52, %v587_v38 }
 0x1a2   :  { %6854 = vmatpush1.bf16.msra.mxu1 %v8882_v23  ;;  %v575_v56 = vld [vmem:[#allocation5 + $0xec8] sm:$0xff]  ;;  %v8842_v23 = vcombine.low %v455_v55, %v459_v51 }
 0x1a3   :  { %6855 = vmatprep.subr.bf16.mxu1 %v8875_v24  ;;  %v579_v62 = vld [vmem:[#allocation5 + $0xee8] sm:$0xff]  ;;  %v8835_v24 = vcombine.high %v447_v44, %v451_v46 }
 0x1a4   :  { %6813 = vmatpush1.bf16.msra.mxu0 %v8746_v4  ;;  %v8963_v28 = vcombine.high %v575_v56, %v579_v62  ;;  %v439_v1 = vld [vmem:[#allocation5 + $0xa88] sm:$0xff] }
 0x1a5   :  { %6814 = vmatprep.subr.bf16.mxu0 %v8867_v7  ;;  %v443_v2 = vld [vmem:[#allocation5 + $0xaa8] sm:$0xff]  ;;  %v8962_v7 = vcombine.low %v575_v56, %v579_v62 }
 0x1a6   :  { %6856 = vmatpush1.bf16.msra.mxu1 %v8874_v5  ;;  %v567_v3 = vld [vmem:[#allocation5 + $0xe88] sm:$0xff]  ;;  %v8834_v5 = vcombine.low %v447_v44, %v451_v46 }
 0x1a7   :  { %6857 = vmatprep.subr.bf16.mxu1 %v8995_v8  ;;  %v571_v4 = vld [vmem:[#allocation5 + $0xea8] sm:$0xff]  ;;  %v8827_v8 = vcombine.high %v439_v1, %v443_v2 }
 0x1a8   :  { %6815 = vmatpush2.bf16.msra.mxu0 %v8866_v57  ;;  %v8955_v9 = vcombine.high %v567_v3, %v571_v4  ;;  %v431_v10 = vld [vmem:[#allocation5 + $0xa48] sm:$0xff] }
 0x1a9   :  { %6816 = vmatprep.subr.bf16.mxu0 %v8859_v15  ;;  %v435_v11 = vld [vmem:[#allocation5 + $0xa68] sm:$0xff]  ;;  %v8954_v15 = vcombine.low %v567_v3, %v571_v4 }
 0x1aa   :  { %6858 = vmatpush2.bf16.msra.mxu1 %v8994_v14  ;;  %v559_v13 = vld [vmem:[#allocation5 + $0xe48] sm:$0xff]  ;;  %v8826_v14 = vcombine.low %v439_v1, %v443_v2  ;;  %v10074_v2 = vpop.f32.mrf.mxu1 }
 0x1ab   :  { %6859 = vmatprep.subr.bf16.mxu1 %v8987_v17  ;;  %v563_v57 = vld [vmem:[#allocation5 + $0xe68] sm:$0xff]  ;;  %v8819_v17 = vcombine.high %v431_v10, %v435_v11 }
 0x1ac   :  { %6817 = vmatpush2.bf16.msra.mxu0 %v8858_v45  ;;  %v8947_v18 = vcombine.high %v559_v13, %v563_v57  ;;  %v423_v20 = vld [vmem:[#allocation5 + $0xa08] sm:$0xff] }
 0x1ad   :  { %6818 = vmatprep.subr.bf16.mxu0 %v8851_v26  ;;  %v427_v54 = vld [vmem:[#allocation5 + $0xa28] sm:$0xff]  ;;  %v8946_v26 = vcombine.low %v559_v13, %v563_v57 }
 0x1ae   :  { %6860 = vmatpush2.bf16.msra.mxu1 %v8986_v22  ;;  %v551_v31 = vld [vmem:[#allocation5 + $0xe08] sm:$0xff]  ;;  %v8818_v22 = vcombine.low %v431_v10, %v435_v11 }
 0x1af   :  { %6861 = vmatprep.subr.bf16.mxu1 %v8979_v60  ;;  %v555_v45 = vld [vmem:[#allocation5 + $0xe28] sm:$0xff]  ;;  %v8811_v60 = vcombine.high %v423_v20, %v427_v54 }
 0x1b0   :  { %6819 = vmatpush2.bf16.msra.mxu0 %v8850_v39  ;;  %v8939_v55 = vcombine.high %v551_v31, %v555_v45  ;;  %v671_v51 = vld [vmem:[#allocation5 + $0x11c8] sm:$0xff] }
 0x1b1   :  { %6820 = vmatprep.subr.bf16.mxu0 %v8843_v41  ;;  %v675_v52 = vld [vmem:[#allocation5 + $0x11e8] sm:$0xff]  ;;  %v8938_v41 = vcombine.low %v551_v31, %v555_v45 }
 0x1b2   :  { %6862 = vmatpush2.bf16.msra.mxu1 %v8978_v40  ;;  %v799_v38 = vld [vmem:[#allocation5 + $0x15c8] sm:$0xff]  ;;  %v8810_v40 = vcombine.low %v423_v20, %v427_v54 }
 0x1b3   :  { %6863 = vmatprep.subr.bf16.mxu1 %v8971_v42  ;;  %v803_v39 = vld [vmem:[#allocation5 + $0x15e8] sm:$0xff]  ;;  %v9059_v42 = vcombine.high %v671_v51, %v675_v52 }
 0x1b4   :  { %6821 = vmatpush2.bf16.msra.mxu0 %v8842_v23  ;;  %v9187_v44 = vcombine.high %v799_v38, %v803_v39  ;;  %v663_v46 = vld [vmem:[#allocation5 + $0x1188] sm:$0xff] }
 0x1b5   :  { %6822 = vmatprep.subr.bf16.mxu0 %v8835_v24  ;;  %v667_v56 = vld [vmem:[#allocation5 + $0x11a8] sm:$0xff]  ;;  %v10072_v24 = vpop.f32.mrf.mxu0 }
 0x1b6   :  { %6864 = vmatpush2.bf16.msra.mxu1 %v8970_v36  ;;  %v791_v62 = vld [vmem:[#allocation5 + $0x1588] sm:$0xff]  ;;  %v9058_v36 = vcombine.low %v671_v51, %v675_v52  ;;  %v9051_v1 = vcombine.high %v663_v46, %v667_v56  ;;  %v9050_v13 = vcombine.low %v663_v46, %v667_v56 }
 0x1b7   :  { %6865 = vmatprep.subr.bf16.mxu1 %v8963_v28  ;;  %v795_v23 = vld [vmem:[#allocation5 + $0x15a8] sm:$0xff]  ;;  %v9186_v28 = vcombine.low %v799_v38, %v803_v39 }
 0x1b8   :  { %6823 = vmatpush2.bf16.msra.mxu0 %v8834_v5  ;;  %v9179_v3 = vcombine.high %v791_v62, %v795_v23  ;;  %v655_v4 = vld [vmem:[#allocation5 + $0x1148] sm:$0xff] }
 0x1b9   :  { %6824 = vmatprep.subr.bf16.mxu0 %v8827_v8  ;;  %v659_v5 = vld [vmem:[#allocation5 + $0x1168] sm:$0xff] }
 0x1ba   :  { %6866 = vmatpush2.bf16.msra.mxu1 %v8962_v7  ;;  %v783_v8 = vld [vmem:[#allocation5 + $0x1548] sm:$0xff] }
 0x1bb   :  { %6867 = vmatprep.subr.bf16.mxu1 %v8955_v9  ;;  %v787_v9 = vld [vmem:[#allocation5 + $0x1568] sm:$0xff] }
 0x1bc   :  { %6825 = vmatpush2.bf16.msra.mxu0 %v8826_v14  ;;  %v9178_v14 = vcombine.low %v791_v62, %v795_v23  ;;  %v9171_v20 = vcombine.high %v783_v8, %v787_v9  ;;  %v647_v54 = vld [vmem:[#allocation5 + $0x1108] sm:$0xff]  ;;  %v9170_v51 = vcombine.low %v783_v8, %v787_v9 }
 0x1bd   :  { %6826 = vmatprep.subr.bf16.mxu0 %v8819_v17  ;;  %v651_v31 = vld [vmem:[#allocation5 + $0x1128] sm:$0xff] }
 0x1be   :  { %6868 = vmatpush2.bf16.msra.mxu1 %v8954_v15  ;;  %v9043_v15 = vcombine.high %v655_v4, %v659_v5  ;;  %v775_v45 = vld [vmem:[#allocation5 + $0x1508] sm:$0xff]  ;;  %v9035_v52 = vcombine.high %v647_v54, %v651_v31  ;;  %v9034_v46 = vcombine.low %v647_v54, %v651_v31 }
 0x1bf   :  { %6869 = vmatprep.subr.bf16.mxu1 %v8947_v18  ;;  %v631_v23 = vld [vmem:[#allocation5 + $0x1088] sm:$0xff] }
 0x1c0   :  { %6827 = vmatpush2.bf16.msra.mxu0 %v8818_v22  ;;  %v779_v22 = vld [vmem:[#allocation5 + $0x1528] sm:$0xff] }
 0x1c1   :  { %6828 = vmatprep.subr.bf16.mxu0 %v8811_v60  ;;  %v9042_v60 = vcombine.low %v655_v4, %v659_v5  ;;  %v9163_v39 = vcombine.high %v775_v45, %v779_v22  ;;  %v623_v8 = vld [vmem:[#allocation5 + $0x1048] sm:$0xff] }
 0x1c2   :  { %6870 = vmatpush2.bf16.msra.mxu1 %v8946_v26  ;;  %v627_v9 = vld [vmem:[#allocation5 + $0x1068] sm:$0xff] }
 0x1c3   :  { %6871 = vmatprep.subr.bf16.mxu1 %v8939_v55  ;;  %v615_v54 = vld [vmem:[#allocation5 + $0x1008] sm:$0xff] }
 0x1c4   :  { %6829 = vmatpush2.bf16.msra.mxu0 %v8810_v40  ;;  %v639_v40 = vld [vmem:[#allocation5 + $0x10c8] sm:$0xff] }
 0x1c5   :  { %6884 = vmatprep.subr.bf16.mxu0 %v9059_v42  ;;  %v767_v42 = vld [vmem:[#allocation5 + $0x14c8] sm:$0xff] }
 0x1c6   :  { %6872 = vmatpush2.bf16.msra.mxu1 %v8938_v41  ;;  %v643_v41 = vld [vmem:[#allocation5 + $0x10e8] sm:$0xff] }
 0x1c7   :  { %6927 = vmatprep.subr.bf16.mxu1 %v9187_v44  ;;  %v6574_v7 = vpop.f32.mrf.mxu0  ;;  %6831 = vmatmul.mubr.bf16.vlgmr.msra.gmra.mxu0 %v9981_v48  ;;  %v771_v44 = vld [vmem:[#allocation5 + $0x14e8] sm:$0xff]  ;;  %v9027_v56 = vcombine.high %v639_v40, %v643_v41 }
 0x1c8   :  { %v6575_v10 = vadd.f32 %v6574_v7, %v10063_v50  ;;  %6885 = vmatpush1.bf16.msra.mxu0 %v9058_v36  ;;  %6916 = vmatprep.mubr.bf16.mxu0 %v9993_v0  ;;  %v9155_v62 = vcombine.high %v767_v42, %v771_v44  ;;  %v635_v36 = vld [vmem:[#allocation5 + $0x10a8] sm:$0xff]  ;;  %v9154_v4 = vcombine.low %v767_v42, %v771_v44 }
 0x1c9   :  { %v6617_v11 = vpop.f32.mrf.mxu1  ;;  %6874 = vmatmul.mubr.bf16.vlgmr.msra.gmra.mxu1 %v9985_v49  ;;  %v10079_v57 = vpop.f32.mrf.mxu0  ;;  %6886 = vmatprep.subr.bf16.mxu0 %v9051_v1  ;;  %v763_v1 = vld [vmem:[#allocation5 + $0x14a8] sm:$0xff]  ;;  %v9019_v5 = vcombine.high %v631_v23, %v635_v36 }
 0x1ca   :  { %6928 = vmatpush1.bf16.msra.mxu1 %v9186_v28  ;;  %v10081_v17 = vadd.f32 %v6617_v11, %v6575_v10  ;;  %6959 = vmatprep.mubr.bf16.mxu1 %v9998_v27  ;;  %v759_v28 = vld [vmem:[#allocation5 + $0x1488] sm:$0xff] }
 0x1cb   :  { %v10083_v18 = vpop.f32.mrf.mxu1  ;;  %6929 = vmatprep.subr.bf16.mxu1 %v9179_v3  ;;  %v6578_v50 = vpop.f32.mrf.mxu0  ;;  %v9026_v3 = vcombine.low %v639_v40, %v643_v41  ;;  %v9147_v7 = vcombine.high %v759_v28, %v763_v1  ;;  %v751_v10 = vld [vmem:[#allocation5 + $0x1448] sm:$0xff] }
 0x1cc   :  { %v6579_v26 = vadd.f32 %v6578_v50, %v10070_v6  ;;  %6887 = vmatpush1.bf16.msra.mxu0 %v9050_v13  ;;  %v9162_v6 = vcombine.low %v775_v45, %v779_v22  ;;  %v755_v11 = vld [vmem:[#allocation5 + $0x1468] sm:$0xff]  ;;  %v9018_v13 = vcombine.low %v631_v23, %v635_v36  ;;  %v9010_v22 = vcombine.low %v623_v8, %v627_v9 }
 0x1cd   :  { %v6621_v55 = vpop.f32.mrf.mxu1  ;;  %6888 = vmatprep.subr.bf16.mxu0 %v9043_v15  ;;  %v9011_v15 = vcombine.high %v623_v8, %v627_v9  ;;  %v619_v31 = vld [vmem:[#allocation5 + $0x1028] sm:$0xff] }
 0x1ce   :  { %6930 = vmatpush1.bf16.msra.mxu1 %v9178_v14  ;;  %v10088_v38 = vadd.f32 %v6621_v55, %v6579_v26  ;;  %v9146_v14 = vcombine.low %v759_v28, %v763_v1  ;;  %v743_v50 = vld [vmem:[#allocation5 + $0x1408] sm:$0xff]  ;;  %v9138_v26 = vcombine.low %v751_v10, %v755_v11  ;;  %v9002_v41 = vcombine.low %v615_v54, %v619_v31 }
 0x1cf   :  { %6931 = vmatprep.subr.bf16.mxu1 %v9171_v20  ;;  %v9139_v20 = vcombine.high %v751_v10, %v755_v11  ;;  %v747_v45 = vld [vmem:[#allocation5 + $0x1428] sm:$0xff] }
 0x1d0   :  { %6889 = vmatpush1.bf16.msra.mxu0 %v9042_v60  ;;  %v9003_v60 = vcombine.high %v615_v54, %v619_v31  ;;  %v9131_v55 = vcombine.high %v743_v50, %v747_v45  ;;  %v867_v40 = vld [vmem:[#allocation5 + $0x17e8] sm:$0xff]  ;;  %v9130_v42 = vcombine.low %v743_v50, %v747_v45 }
 0x1d1   :  { %6890 = vmatprep.subr.bf16.mxu0 %v9035_v52  ;;  %v739_v52 = vld [vmem:[#allocation5 + $0x13e8] sm:$0xff] }
 0x1d2   :  { %6932 = vmatpush1.bf16.msra.mxu1 %v9170_v51  ;;  %v735_v51 = vld [vmem:[#allocation5 + $0x13c8] sm:$0xff] }
 0x1d3   :  { %6933 = vmatprep.subr.bf16.mxu1 %v9163_v39  ;;  %v863_v39 = vld [vmem:[#allocation5 + $0x17c8] sm:$0xff]  ;;  %v9123_v44 = vcombine.high %v735_v51, %v739_v52  ;;  %v9122_v36 = vcombine.low %v735_v51, %v739_v52 }
 0x1d4   :  { %6891 = vmatpush1.bf16.msra.mxu0 %v9034_v46  ;;  %v9251_v46 = vcombine.high %v863_v39, %v867_v40  ;;  %v859_v23 = vld [vmem:[#allocation5 + $0x17a8] sm:$0xff]  ;;  %v9250_v28 = vcombine.low %v863_v39, %v867_v40 }
 0x1d5   :  { %6892 = vmatprep.subr.bf16.mxu0 %v9027_v56  ;;  %v731_v56 = vld [vmem:[#allocation5 + $0x13a8] sm:$0xff] }
 0x1d6   :  { %6934 = vmatpush1.bf16.msra.mxu1 %v9162_v6  ;;  %v727_v6 = vld [vmem:[#allocation5 + $0x1388] sm:$0xff] }
 0x1d7   :  { %6935 = vmatprep.subr.bf16.mxu1 %v9155_v62  ;;  %v855_v62 = vld [vmem:[#allocation5 + $0x1788] sm:$0xff]  ;;  %v9115_v1 = vcombine.high %v727_v6, %v731_v56  ;;  %v9114_v9 = vcombine.low %v727_v6, %v731_v56 }
 0x1d8   :  { %6893 = vmatpush1.bf16.msra.mxu0 %v9026_v3  ;;  %v9243_v3 = vcombine.high %v855_v62, %v859_v23  ;;  %v851_v8 = vld [vmem:[#allocation5 + $0x1768] sm:$0xff]  ;;  %v9242_v10 = vcombine.low %v855_v62, %v859_v23 }
 0x1d9   :  { %6894 = vmatprep.subr.bf16.mxu0 %v9019_v5  ;;  %v723_v5 = vld [vmem:[#allocation5 + $0x1368] sm:$0xff] }
 0x1da   :  { %6936 = vmatpush1.bf16.msra.mxu1 %v9154_v4  ;;  %v719_v4 = vld [vmem:[#allocation5 + $0x1348] sm:$0xff] }
 0x1db   :  { %6937 = vmatprep.subr.bf16.mxu1 %v9147_v7  ;;  %v847_v7 = vld [vmem:[#allocation5 + $0x1748] sm:$0xff]  ;;  %v9107_v11 = vcombine.high %v719_v4, %v723_v5  ;;  %v9106_v31 = vcombine.low %v719_v4, %v723_v5 }
 0x1dc   :  { %6895 = vmatpush1.bf16.msra.mxu0 %v9018_v13  ;;  %v9235_v13 = vcombine.high %v847_v7, %v851_v8  ;;  %v843_v54 = vld [vmem:[#allocation5 + $0x1728] sm:$0xff]  ;;  %v9234_v50 = vcombine.low %v847_v7, %v851_v8 }
 0x1dd   :  { %6896 = vmatprep.subr.bf16.mxu0 %v9011_v15  ;;  %v715_v15 = vld [vmem:[#allocation5 + $0x1328] sm:$0xff] }
 0x1de   :  { %6938 = vmatpush1.bf16.msra.mxu1 %v9146_v14  ;;  %v711_v14 = vld [vmem:[#allocation5 + $0x1308] sm:$0xff] }
 0x1df   :  { %6939 = vmatprep.subr.bf16.mxu1 %v9139_v20  ;;  %v839_v20 = vld [vmem:[#allocation5 + $0x1708] sm:$0xff]  ;;  %v9099_v45 = vcombine.high %v711_v14, %v715_v15  ;;  %v9098_v52 = vcombine.low %v711_v14, %v715_v15 }
 0x1e0   :  { %6897 = vmatpush1.bf16.msra.mxu0 %v9010_v22  ;;  %v9227_v22 = vcombine.high %v839_v20, %v843_v54  ;;  %v835_v51 = vld [vmem:[#allocation5 + $0x16e8] sm:$0xff]  ;;  %v9226_v39 = vcombine.low %v839_v20, %v843_v54 }
 0x1e1   :  { %6898 = vmatprep.subr.bf16.mxu0 %v9003_v60  ;;  %v707_v60 = vld [vmem:[#allocation5 + $0x12e8] sm:$0xff] }
 0x1e2   :  { %6940 = vmatpush1.bf16.msra.mxu1 %v9138_v26  ;;  %v703_v26 = vld [vmem:[#allocation5 + $0x12c8] sm:$0xff] }
 0x1e3   :  { %6941 = vmatprep.subr.bf16.mxu1 %v9131_v55  ;;  %v831_v55 = vld [vmem:[#allocation5 + $0x16c8] sm:$0xff]  ;;  %v9091_v40 = vcombine.high %v703_v26, %v707_v60  ;;  %v9090_v56 = vcombine.low %v703_v26, %v707_v60 }
 0x1e4   :  { %6899 = vmatpush1.bf16.msra.mxu0 %v9002_v41  ;;  %v9219_v41 = vcombine.high %v831_v55, %v835_v51  ;;  %v827_v6 = vld [vmem:[#allocation5 + $0x16a8] sm:$0xff]  ;;  %v9218_v62 = vcombine.low %v831_v55, %v835_v51 }
 0x1e5   :  { %6900 = vmatprep.subr.bf16.mxu0 %v9123_v44  ;;  %v699_v44 = vld [vmem:[#allocation5 + $0x12a8] sm:$0xff] }
 0x1e6   :  { %6942 = vmatpush1.bf16.msra.mxu1 %v9130_v42  ;;  %v695_v42 = vld [vmem:[#allocation5 + $0x1288] sm:$0xff] }
 0x1e7   :  { %6943 = vmatprep.subr.bf16.mxu1 %v9251_v46  ;;  %v823_v46 = vld [vmem:[#allocation5 + $0x1688] sm:$0xff]  ;;  %v9083_v23 = vcombine.high %v695_v42, %v699_v44  ;;  %v9082_v5 = vcombine.low %v695_v42, %v699_v44 }
 0x1e8   :  { %6901 = vmatpush2.bf16.msra.mxu0 %v9122_v36  ;;  %v9211_v36 = vcombine.high %v823_v46, %v827_v6  ;;  %v819_v4 = vld [vmem:[#allocation5 + $0x1668] sm:$0xff]  ;;  %v9210_v7 = vcombine.low %v823_v46, %v827_v6  ;;  %v10090_v46 = vpop.f32.mrf.mxu0 }
 0x1e9   :  { %6902 = vmatprep.subr.bf16.mxu0 %v9115_v1  ;;  %v691_v1 = vld [vmem:[#allocation5 + $0x1268] sm:$0xff] }
 0x1ea   :  { %6944 = vmatpush2.bf16.msra.mxu1 %v9250_v28  ;;  %v687_v28 = vld [vmem:[#allocation5 + $0x1248] sm:$0xff] }
 0x1eb   :  { %6945 = vmatprep.subr.bf16.mxu1 %v9243_v3  ;;  %v815_v3 = vld [vmem:[#allocation5 + $0x1648] sm:$0xff]  ;;  %v9075_v8 = vcombine.high %v687_v28, %v691_v1  ;;  %v9074_v15 = vcombine.low %v687_v28, %v691_v1 }
 0x1ec   :  { %6903 = vmatpush2.bf16.msra.mxu0 %v9114_v9  ;;  %v9203_v9 = vcombine.high %v815_v3, %v819_v4  ;;  %v811_v14 = vld [vmem:[#allocation5 + $0x1628] sm:$0xff]  ;;  %v9202_v20 = vcombine.low %v815_v3, %v819_v4 }
 0x1ed   :  { %6904 = vmatprep.subr.bf16.mxu0 %v9107_v11  ;;  %v683_v11 = vld [vmem:[#allocation5 + $0x1228] sm:$0xff] }
 0x1ee   :  { %6946 = vmatpush2.bf16.msra.mxu1 %v9242_v10  ;;  %v679_v10 = vld [vmem:[#allocation5 + $0x1208] sm:$0xff] }
 0x1ef   :  { %6947 = vmatprep.subr.bf16.mxu1 %v9235_v13  ;;  %v807_v13 = vld [vmem:[#allocation5 + $0x1608] sm:$0xff]  ;;  %v9067_v54 = vcombine.high %v679_v10, %v683_v11  ;;  %v9066_v60 = vcombine.low %v679_v10, %v683_v11 }
 0x1f0   :  { %6905 = vmatpush2.bf16.msra.mxu0 %v9106_v31  ;;  %v9195_v31 = vcombine.high %v807_v13, %v811_v14  ;;  %v1059_v26 = vld [vmem:[#allocation5 + $0x1de8] sm:$0xff]  ;;  %v9194_v55 = vcombine.low %v807_v13, %v811_v14 }
 0x1f1   :  { %6906 = vmatprep.subr.bf16.mxu0 %v9099_v45  ;;  %v931_v45 = vld [vmem:[#allocation5 + $0x19e8] sm:$0xff] }
 0x1f2   :  { %6948 = vmatpush2.bf16.msra.mxu1 %v9234_v50  ;;  %v927_v50 = vld [vmem:[#allocation5 + $0x19c8] sm:$0xff] }
 0x1f3   :  { %6949 = vmatprep.subr.bf16.mxu1 %v9227_v22  ;;  %v1055_v22 = vld [vmem:[#allocation5 + $0x1dc8] sm:$0xff]  ;;  %v9315_v51 = vcombine.high %v927_v50, %v931_v45  ;;  %v9314_v44 = vcombine.low %v927_v50, %v931_v45 }
 0x1f4   :  { %6907 = vmatpush2.bf16.msra.mxu0 %v9098_v52  ;;  %v9443_v52 = vcombine.high %v1055_v22, %v1059_v26  ;;  %v1051_v42 = vld [vmem:[#allocation5 + $0x1da8] sm:$0xff]  ;;  %v9442_v6 = vcombine.low %v1055_v22, %v1059_v26 }
 0x1f5   :  { %6908 = vmatprep.subr.bf16.mxu0 %v9091_v40  ;;  %v923_v40 = vld [vmem:[#allocation5 + $0x19a8] sm:$0xff] }
 0x1f6   :  { %6950 = vmatpush2.bf16.msra.mxu1 %v9226_v39  ;;  %v919_v39 = vld [vmem:[#allocation5 + $0x1988] sm:$0xff] }
 0x1f7   :  { %6951 = vmatprep.subr.bf16.mxu1 %v9219_v41  ;;  %v1047_v41 = vld [vmem:[#allocation5 + $0x1d88] sm:$0xff] }
 0x1f8   :  { %6909 = vmatpush2.bf16.msra.mxu0 %v9090_v56  ;;  %v9307_v56 = vcombine.high %v919_v39, %v923_v40  ;;  %v915_v28 = vld [vmem:[#allocation5 + $0x1968] sm:$0xff]  ;;  %v9434_v10 = vcombine.low %v1047_v41, %v1051_v42 }
 0x1f9   :  { %6910 = vmatprep.subr.bf16.mxu0 %v9083_v23  ;;  %v9435_v23 = vcombine.high %v1047_v41, %v1051_v42  ;;  %v1039_v3 = vld [vmem:[#allocation5 + $0x1d48] sm:$0xff] }
 0x1fa   :  { %6952 = vmatpush2.bf16.msra.mxu1 %v9218_v62  ;;  %v10092_v62 = vpop.f32.mrf.mxu1  ;;  %v1043_v4 = vld [vmem:[#allocation5 + $0x1d68] sm:$0xff] }
 0x1fb   :  { %6953 = vmatprep.subr.bf16.mxu1 %v9211_v36  ;;  %v911_v36 = vld [vmem:[#allocation5 + $0x1948] sm:$0xff] }
 0x1fc   :  { %6911 = vmatpush2.bf16.msra.mxu0 %v9082_v5  ;;  %v9299_v11 = vcombine.high %v911_v36, %v915_v28  ;;  %v1035_v50 = vld [vmem:[#allocation5 + $0x1d28] sm:$0xff]  ;;  %v9298_v22 = vcombine.low %v911_v36, %v915_v28 }
 0x1fd   :  { %6912 = vmatprep.subr.bf16.mxu0 %v9075_v8  ;;  %v9306_v8 = vcombine.low %v919_v39, %v923_v40  ;;  %v895_v39 = vld [vmem:[#allocation5 + $0x18c8] sm:$0xff] }
 0x1fe   :  { %6954 = vmatpush2.bf16.msra.mxu1 %v9210_v7  ;;  %v899_v40 = vld [vmem:[#allocation5 + $0x18e8] sm:$0xff] }
 0x1ff   :  { %6955 = vmatprep.subr.bf16.mxu1 %v9203_v9  ;;  %v1023_v41 = vld [vmem:[#allocation5 + $0x1cc8] sm:$0xff] }
 0x200   :  { %6913 = vmatpush2.bf16.msra.mxu0 %v9074_v15  ;;  %v9427_v15 = vcombine.high %v1039_v3, %v1043_v4  ;;  %v1027_v42 = vld [vmem:[#allocation5 + $0x1ce8] sm:$0xff] }
 0x201   :  { %6914 = vmatprep.subr.bf16.mxu0 %v9067_v54  ;;  %v907_v54 = vld [vmem:[#allocation5 + $0x1928] sm:$0xff]  ;;  %v9411_v28 = vcombine.high %v1023_v41, %v1027_v42 }
 0x202   :  { %6956 = vmatpush2.bf16.msra.mxu1 %v9202_v20  ;;  %v903_v20 = vld [vmem:[#allocation5 + $0x1908] sm:$0xff] }
 0x203   :  { %6957 = vmatprep.subr.bf16.mxu1 %v9195_v31  ;;  %v1031_v31 = vld [vmem:[#allocation5 + $0x1d08] sm:$0xff] }
 0x204   :  { %6915 = vmatpush2.bf16.msra.mxu0 %v9066_v60  ;;  %v9426_v60 = vcombine.low %v1039_v3, %v1043_v4  ;;  %v891_v3 = vld [vmem:[#allocation5 + $0x18a8] sm:$0xff] }
 0x205   :  { %6970 = vmatprep.subr.bf16.mxu0 %v9315_v51  ;;  %v1015_v4 = vld [vmem:[#allocation5 + $0x1c88] sm:$0xff] }
 0x206   :  { %6958 = vmatpush2.bf16.msra.mxu1 %v9194_v55  ;;  %v9291_v55 = vcombine.high %v903_v20, %v907_v54 }
 0x207   :  { %7013 = vmatprep.subr.bf16.mxu1 %v9443_v52  ;;  %v6660_v1 = vpop.f32.mrf.mxu0  ;;  %6917 = vmatmul.mubr.bf16.vlgmr.msra.gmra.mxu0 %v10005_v19  ;;  %v9419_v52 = vcombine.high %v1031_v31, %v1035_v50 }
 0x208   :  { %v6661_v5 = vadd.f32 %v6660_v1, %v10081_v17  ;;  %6971 = vmatpush1.bf16.msra.mxu0 %v9314_v44  ;;  %7002 = vmatprep.mubr.bf16.mxu0 %v10021_v34  ;;  %v887_v1 = vld [vmem:[#allocation5 + $0x1888] sm:$0xff] }
 0x209   :  { %v6703_v7 = vpop.f32.mrf.mxu1  ;;  %6960 = vmatmul.mubr.bf16.vlgmr.msra.gmra.mxu1 %v10013_v29  ;;  %v10097_v9 = vpop.f32.mrf.mxu0  ;;  %6972 = vmatprep.subr.bf16.mxu0 %v9307_v56  ;;  %v9290_v56 = vcombine.low %v903_v20, %v907_v54  ;;  %v1007_v20 = vld [vmem:[#allocation5 + $0x1c48] sm:$0xff] }
 0x20a   :  { %7014 = vmatpush1.bf16.msra.mxu1 %v9442_v6  ;;  %v6704_v13 = vadd.f32 %v6703_v7, %v6661_v5  ;;  %7045 = vmatprep.mubr.bf16.mxu1 %v10026_v35  ;;  %v1019_v5 = vld [vmem:[#allocation5 + $0x1ca8] sm:$0xff]  ;;  %v9282_v7 = vcombine.low %v895_v39, %v899_v40 }
 0x20b   :  { %v10099_v14 = vpop.f32.mrf.mxu1  ;;  %7015 = vmatprep.subr.bf16.mxu1 %v9435_v23  ;;  %v6664_v17 = vpop.f32.mrf.mxu0  ;;  %v9283_v23 = vcombine.high %v895_v39, %v899_v40  ;;  %v1011_v54 = vld [vmem:[#allocation5 + $0x1c68] sm:$0xff] }
 0x20c   :  { %v6665_v45 = vadd.f32 %v6664_v17, %v10088_v38  ;;  %6973 = vmatpush1.bf16.msra.mxu0 %v9306_v8  ;;  %v7744_v44 = vmax.f32 %v6704_v13, 0.0  ;;  %v9418_v38 = vcombine.low %v1031_v31, %v1035_v50  ;;  %v9410_v8 = vcombine.low %v1023_v41, %v1027_v42  ;;  %v879_v13 = vld [vmem:[#allocation5 + $0x1848] sm:$0xff] }
 0x20d   :  { %v6707_v26 = vpop.f32.mrf.mxu1  ;;  %6974 = vmatprep.subr.bf16.mxu0 %v9299_v11  ;;  %v9403_v11 = vcombine.high %v1015_v4, %v1019_v5  ;;  %v9274_v17 = vcombine.low %v887_v1, %v891_v3  ;;  %v9402_v31 = vcombine.low %v1015_v4, %v1019_v5  ;;  %v991_v41 = vld [vmem:[#allocation5 + $0x1bc8] sm:$0xff] }
 0x20e   :  { %7016 = vmatpush1.bf16.msra.mxu1 %v9434_v10  ;;  %v6708_v51 = vadd.f32 %v6707_v26, %v6665_v45  ;;  %v9275_v10 = vcombine.high %v887_v1, %v891_v3  ;;  %v9395_v45 = vcombine.high %v1007_v20, %v1011_v54  ;;  %v875_v26 = vld [vmem:[#allocation5 + $0x1828] sm:$0xff] }
 0x20f   :  { %7017 = vmatprep.subr.bf16.mxu1 %v9427_v15  ;;  %v883_v15 = vld [vmem:[#allocation5 + $0x1868] sm:$0xff] }
 0x210   :  { %v7752_v6 = vmax.f32 %v6708_v51, 0.0  ;;  %6975 = vmatpush1.bf16.msra.mxu0 %v9298_v22  ;;  %v9267_v50 = vcombine.high %v879_v13, %v883_v15  ;;  %v871_v22 = vld [vmem:[#allocation5 + $0x1808] sm:$0xff]  ;;  %v9266_v51 = vcombine.low %v879_v13, %v883_v15 }
 0x211   :  { %6976 = vmatprep.subr.bf16.mxu0 %v9291_v55  ;;  %v1003_v55 = vld [vmem:[#allocation5 + $0x1c28] sm:$0xff]  ;;  %v9259_v39 = vcombine.high %v871_v22, %v875_v26 }
 0x212   :  { %7018 = vmatpush1.bf16.msra.mxu1 %v9426_v60  ;;  %v10104_v36 = vpack.c.bf16 %v7752_v6, %v7744_v44  ;;  %v999_v60 = vld [vmem:[#allocation5 + $0x1c08] sm:$0xff] }
 0x213   :  { %7019 = vmatprep.subr.bf16.mxu1 %v9419_v52  ;;  %v9394_v52 = vcombine.low %v1007_v20, %v1011_v54  ;;  %v9387_v40 = vcombine.high %v999_v60, %v1003_v55  ;;  %v995_v42 = vld [vmem:[#allocation5 + $0x1be8] sm:$0xff] }
 0x214   :  { %10360 = vst [vmem:[#allocation16_spill] sm:$0xff] %v10104_v36  ;;  %6977 = vmatpush1.bf16.msra.mxu0 %v9290_v56  ;;  %v1119_v44 = vld [vmem:[#allocation5 + $0x1fc8] sm:$0xff]  ;;  %v9258_v56 = vcombine.low %v871_v22, %v875_v26 }
 0x215   :  { %6978 = vmatprep.subr.bf16.mxu0 %v9283_v23  ;;  %v1123_v6 = vld [vmem:[#allocation5 + $0x1fe8] sm:$0xff]  ;;  %v9379_v23 = vcombine.high %v991_v41, %v995_v42 }
 0x216   :  { %7020 = vmatpush1.bf16.msra.mxu1 %v9418_v38  ;;  %v9386_v38 = vcombine.low %v999_v60, %v1003_v55  ;;  %v983_v1 = vld [vmem:[#allocation5 + $0x1b88] sm:$0xff] }
 0x217   :  { %7021 = vmatprep.subr.bf16.mxu1 %v9411_v28  ;;  %v9507_v28 = vcombine.high %v1119_v44, %v1123_v6  ;;  %v987_v3 = vld [vmem:[#allocation5 + $0x1ba8] sm:$0xff] }
 0x218   :  { %6979 = vmatpush1.bf16.msra.mxu0 %v9282_v7  ;;  %v1111_v4 = vld [vmem:[#allocation5 + $0x1f88] sm:$0xff]  ;;  %v9378_v7 = vcombine.low %v991_v41, %v995_v42 }
 0x219   :  { %6980 = vmatprep.subr.bf16.mxu0 %v9275_v10  ;;  %v1115_v5 = vld [vmem:[#allocation5 + $0x1fa8] sm:$0xff]  ;;  %v9371_v10 = vcombine.high %v983_v1, %v987_v3 }
 0x21a   :  { %7022 = vmatpush1.bf16.msra.mxu1 %v9410_v8  ;;  %v9506_v8 = vcombine.low %v1119_v44, %v1123_v6  ;;  %v975_v13 = vld [vmem:[#allocation5 + $0x1b48] sm:$0xff] }
 0x21b   :  { %7023 = vmatprep.subr.bf16.mxu1 %v9403_v11  ;;  %v9499_v11 = vcombine.high %v1111_v4, %v1115_v5  ;;  %v979_v15 = vld [vmem:[#allocation5 + $0x1b68] sm:$0xff] }
 0x21c   :  { %6981 = vmatpush1.bf16.msra.mxu0 %v9274_v17  ;;  %v1103_v20 = vld [vmem:[#allocation5 + $0x1f48] sm:$0xff]  ;;  %v9370_v17 = vcombine.low %v983_v1, %v987_v3 }
 0x21d   :  { %6982 = vmatprep.subr.bf16.mxu0 %v9267_v50  ;;  %v1107_v54 = vld [vmem:[#allocation5 + $0x1f68] sm:$0xff]  ;;  %v9363_v50 = vcombine.high %v975_v13, %v979_v15 }
 0x21e   :  { %7024 = vmatpush1.bf16.msra.mxu1 %v9402_v31  ;;  %v9498_v31 = vcombine.low %v1111_v4, %v1115_v5  ;;  %v967_v22 = vld [vmem:[#allocation5 + $0x1b08] sm:$0xff] }
 0x21f   :  { %7025 = vmatprep.subr.bf16.mxu1 %v9395_v45  ;;  %v9491_v45 = vcombine.high %v1103_v20, %v1107_v54  ;;  %v971_v26 = vld [vmem:[#allocation5 + $0x1b28] sm:$0xff] }
 0x220   :  { %6983 = vmatpush1.bf16.msra.mxu0 %v9266_v51  ;;  %v1095_v60 = vld [vmem:[#allocation5 + $0x1f08] sm:$0xff]  ;;  %v9362_v51 = vcombine.low %v975_v13, %v979_v15 }
 0x221   :  { %6984 = vmatprep.subr.bf16.mxu0 %v9259_v39  ;;  %v1099_v55 = vld [vmem:[#allocation5 + $0x1f28] sm:$0xff]  ;;  %v9355_v39 = vcombine.high %v967_v22, %v971_v26 }
 0x222   :  { %7026 = vmatpush1.bf16.msra.mxu1 %v9394_v52  ;;  %v9490_v52 = vcombine.low %v1103_v20, %v1107_v54  ;;  %v959_v41 = vld [vmem:[#allocation5 + $0x1ac8] sm:$0xff] }
 0x223   :  { %7027 = vmatprep.subr.bf16.mxu1 %v9387_v40  ;;  %v9483_v40 = vcombine.high %v1095_v60, %v1099_v55  ;;  %v963_v42 = vld [vmem:[#allocation5 + $0x1ae8] sm:$0xff] }
 0x224   :  { %6985 = vmatpush1.bf16.msra.mxu0 %v9258_v56  ;;  %v1087_v44 = vld [vmem:[#allocation5 + $0x1ec8] sm:$0xff]  ;;  %v9354_v56 = vcombine.low %v967_v22, %v971_v26 }
 0x225   :  { %6986 = vmatprep.subr.bf16.mxu0 %v9379_v23  ;;  %v1091_v6 = vld [vmem:[#allocation5 + $0x1ee8] sm:$0xff]  ;;  %v9347_v23 = vcombine.high %v959_v41, %v963_v42 }
 0x226   :  { %7028 = vmatpush1.bf16.msra.mxu1 %v9386_v38  ;;  %v9482_v38 = vcombine.low %v1095_v60, %v1099_v55  ;;  %v951_v1 = vld [vmem:[#allocation5 + $0x1a88] sm:$0xff] }
 0x227   :  { %7029 = vmatprep.subr.bf16.mxu1 %v9507_v28  ;;  %v9475_v28 = vcombine.high %v1087_v44, %v1091_v6  ;;  %v955_v3 = vld [vmem:[#allocation5 + $0x1aa8] sm:$0xff] }
 0x228   :  { %6987 = vmatpush2.bf16.msra.mxu0 %v9378_v7  ;;  %v1079_v4 = vld [vmem:[#allocation5 + $0x1e88] sm:$0xff]  ;;  %v9346_v7 = vcombine.low %v959_v41, %v963_v42  ;;  %v160_v41 = vld [vmem:[#allocation5 + $0x1d0] sm:$0xff] }
 0x229   :  { %6988 = vmatprep.subr.bf16.mxu0 %v9371_v10  ;;  %v1083_v5 = vld [vmem:[#allocation5 + $0x1ea8] sm:$0xff]  ;;  %v9339_v10 = vcombine.high %v951_v1, %v955_v3  ;;  %v164_v42 = vld [vmem:[#allocation5 + $0x1f0] sm:$0xff] }
 0x22a   :  { %7030 = vmatpush2.bf16.msra.mxu1 %v9506_v8  ;;  %v9474_v8 = vcombine.low %v1087_v44, %v1091_v6  ;;  %v943_v13 = vld [vmem:[#allocation5 + $0x1a48] sm:$0xff]  ;;  %v288_v44 = vld [vmem:[#allocation5 + $0x5d0] sm:$0xff] }
 0x22b   :  { %7031 = vmatprep.subr.bf16.mxu1 %v9499_v11  ;;  %v9467_v11 = vcombine.high %v1079_v4, %v1083_v5  ;;  %v947_v15 = vld [vmem:[#allocation5 + $0x1a68] sm:$0xff]  ;;  %v292_v6 = vld [vmem:[#allocation5 + $0x5f0] sm:$0xff] }
 0x22c   :  { %6989 = vmatpush2.bf16.msra.mxu0 %v9370_v17  ;;  %v1071_v20 = vld [vmem:[#allocation5 + $0x1e48] sm:$0xff]  ;;  %v9338_v17 = vcombine.low %v951_v1, %v955_v3  ;;  %v152_v1 = vld [vmem:[#allocation5 + $0x190] sm:$0xff] }
 0x22d   :  { %6990 = vmatprep.subr.bf16.mxu0 %v9363_v50  ;;  %v1075_v54 = vld [vmem:[#allocation5 + $0x1e68] sm:$0xff]  ;;  %v9331_v50 = vcombine.high %v943_v13, %v947_v15  ;;  %v156_v3 = vld [vmem:[#allocation5 + $0x1b0] sm:$0xff] }
 0x22e   :  { %7032 = vmatpush2.bf16.msra.mxu1 %v9498_v31  ;;  %v9466_v31 = vcombine.low %v1079_v4, %v1083_v5  ;;  %v935_v22 = vld [vmem:[#allocation5 + $0x1a08] sm:$0xff]  ;;  %v280_v4 = vld [vmem:[#allocation5 + $0x590] sm:$0xff] }
 0x22f   :  { %7033 = vmatprep.subr.bf16.mxu1 %v9491_v45  ;;  %v9459_v45 = vcombine.high %v1071_v20, %v1075_v54  ;;  %v939_v26 = vld [vmem:[#allocation5 + $0x1a28] sm:$0xff]  ;;  %v284_v5 = vld [vmem:[#allocation5 + $0x5b0] sm:$0xff] }
 0x230   :  { %6991 = vmatpush2.bf16.msra.mxu0 %v9362_v51  ;;  %v1063_v60 = vld [vmem:[#allocation5 + $0x1e08] sm:$0xff]  ;;  %v9330_v51 = vcombine.low %v943_v13, %v947_v15  ;;  %v144_v13 = vld [vmem:[#allocation5 + $0x150] sm:$0xff] }
 0x231   :  { %6992 = vmatprep.subr.bf16.mxu0 %v9355_v39  ;;  %v1067_v55 = vld [vmem:[#allocation5 + $0x1e28] sm:$0xff]  ;;  %v9323_v39 = vcombine.high %v935_v22, %v939_v26  ;;  %v148_v15 = vld [vmem:[#allocation5 + $0x170] sm:$0xff] }
 0x232   :  { %7034 = vmatpush2.bf16.msra.mxu1 %v9490_v52  ;;  %v9458_v52 = vcombine.low %v1071_v20, %v1075_v54  ;;  %v272_v20 = vld [vmem:[#allocation5 + $0x550] sm:$0xff] }
 0x233   :  { %7035 = vmatprep.subr.bf16.mxu1 %v9483_v40  ;;  %v9451_v40 = vcombine.high %v1063_v60, %v1067_v55  ;;  %v276_v54 = vld [vmem:[#allocation5 + $0x570] sm:$0xff] }
 0x234   :  { %6993 = vmatpush2.bf16.msra.mxu0 %v9354_v56  ;;  %v9322_v56 = vcombine.low %v935_v22, %v939_v26  ;;  %v136_v22 = vld [vmem:[#allocation5 + $0x110] sm:$0xff] }
 0x235   :  { %6994 = vmatprep.subr.bf16.mxu0 %v9347_v23  ;;  %v8549_v23 = vcombine.high %v160_v41, %v164_v42  ;;  %v140_v26 = vld [vmem:[#allocation5 + $0x130] sm:$0xff] }
 0x236   :  { %7036 = vmatpush2.bf16.msra.mxu1 %v9482_v38  ;;  %v9450_v38 = vcombine.low %v1063_v60, %v1067_v55  ;;  %v264_v60 = vld [vmem:[#allocation5 + $0x510] sm:$0xff] }
 0x237   :  { %7037 = vmatprep.subr.bf16.mxu1 %v9475_v28  ;;  %v8677_v28 = vcombine.high %v288_v44, %v292_v6  ;;  %v268_v55 = vld [vmem:[#allocation5 + $0x530] sm:$0xff] }
 0x238   :  { %6995 = vmatpush2.bf16.msra.mxu0 %v9346_v7  ;;  %v8548_v7 = vcombine.low %v160_v41, %v164_v42  ;;  %v128_v41 = vld [vmem:[#allocation5 + $0xd0] sm:$0xff] }
 0x239   :  { %6996 = vmatprep.subr.bf16.mxu0 %v9339_v10  ;;  %v8541_v10 = vcombine.high %v152_v1, %v156_v3  ;;  %v132_v42 = vld [vmem:[#allocation5 + $0xf0] sm:$0xff] }
 0x23a   :  { %7038 = vmatpush2.bf16.msra.mxu1 %v9474_v8  ;;  %v8676_v8 = vcombine.low %v288_v44, %v292_v6  ;;  %v256_v44 = vld [vmem:[#allocation5 + $0x4d0] sm:$0xff] }
 0x23b   :  { %7039 = vmatprep.subr.bf16.mxu1 %v9467_v11  ;;  %v8669_v11 = vcombine.high %v280_v4, %v284_v5  ;;  %v260_v6 = vld [vmem:[#allocation5 + $0x4f0] sm:$0xff] }
 0x23c   :  { %6997 = vmatpush2.bf16.msra.mxu0 %v9338_v17  ;;  %v8540_v17 = vcombine.low %v152_v1, %v156_v3  ;;  %v120_v1 = vld [vmem:[#allocation5 + $0x90] sm:$0xff] }
 0x23d   :  { %6998 = vmatprep.subr.bf16.mxu0 %v9331_v50  ;;  %v8533_v50 = vcombine.high %v144_v13, %v148_v15  ;;  %v124_v3 = vld [vmem:[#allocation5 + $0xb0] sm:$0xff] }
 0x23e   :  { %7040 = vmatpush2.bf16.msra.mxu1 %v9466_v31  ;;  %v8668_v31 = vcombine.low %v280_v4, %v284_v5  ;;  %v248_v4 = vld [vmem:[#allocation5 + $0x490] sm:$0xff] }
 0x23f   :  { %7041 = vmatprep.subr.bf16.mxu1 %v9459_v45  ;;  %v8661_v45 = vcombine.high %v272_v20, %v276_v54  ;;  %v252_v5 = vld [vmem:[#allocation5 + $0x4b0] sm:$0xff] }
 0x240   :  { %6999 = vmatpush2.bf16.msra.mxu0 %v9330_v51  ;;  %v8532_v51 = vcombine.low %v144_v13, %v148_v15  ;;  %v112_v13 = vld [vmem:[#allocation5 + $0x50] sm:$0xff] }
 0x241   :  { %7000 = vmatprep.subr.bf16.mxu0 %v9323_v39  ;;  %v8525_v39 = vcombine.high %v136_v22, %v140_v26  ;;  %v116_v15 = vld [vmem:[#allocation5 + $0x70] sm:$0xff] }
 0x242   :  { %7042 = vmatpush2.bf16.msra.mxu1 %v9458_v52  ;;  %v8660_v52 = vcombine.low %v272_v20, %v276_v54  ;;  %v240_v20 = vld [vmem:[#allocation5 + $0x450] sm:$0xff] }
 0x243   :  { %7043 = vmatprep.subr.bf16.mxu1 %v9451_v40  ;;  %v8653_v40 = vcombine.high %v264_v60, %v268_v55  ;;  %v244_v54 = vld [vmem:[#allocation5 + $0x470] sm:$0xff] }
 0x244   :  { %7001 = vmatpush2.bf16.msra.mxu0 %v9322_v56  ;;  %v8524_v56 = vcombine.low %v136_v22, %v140_v26  ;;  %v104_v22 = vld [vmem:[#allocation5 + $0x10] sm:$0xff] }
 0x245   :  { %7056 = vmatprep.subr.bf16.mxu0 %v8549_v23  ;;  %v8517_v23 = vcombine.high %v128_v41, %v132_v42  ;;  %v108_v26 = vld [vmem:[#allocation5 + $0x30] sm:$0xff] }
 0x246   :  { %7044 = vmatpush2.bf16.msra.mxu1 %v9450_v38  ;;  %v8652_v38 = vcombine.low %v264_v60, %v268_v55  ;;  %v232_v60 = vld [vmem:[#allocation5 + $0x410] sm:$0xff] }
 0x247   :  { %7099 = vmatprep.subr.bf16.mxu1 %v8677_v28  ;;  %7003 = vmatmul.mubr.bf16.vlgmr.msra.gmra.mxu0 %v10036_v12  ;;  %v8645_v28 = vcombine.high %v256_v44, %v260_v6  ;;  %v236_v55 = vld [vmem:[#allocation5 + $0x430] sm:$0xff] }
 0x248   :  { %7057 = vmatpush1.bf16.msra.mxu0 %v8548_v7  ;;  %7088 = vmatprep.mubr.bf16.mxu0 %v9935_v58  ;;  %v8516_v7 = vcombine.low %v128_v41, %v132_v42  ;;  %v224_v41 = vld [vmem:[#allocation5 + $0x3d0] sm:$0xff] }
 0x249   :  { %7046 = vmatmul.mubr.bf16.vlgmr.msra.gmra.mxu1 %v10040_v16  ;;  %7058 = vmatprep.subr.bf16.mxu0 %v8541_v10  ;;  %v8509_v10 = vcombine.high %v120_v1, %v124_v3  ;;  %v228_v42 = vld [vmem:[#allocation5 + $0x3f0] sm:$0xff] }
 0x24a   :  { %7100 = vmatpush1.bf16.msra.mxu1 %v8676_v8  ;;  %7131 = vmatprep.mubr.bf16.mxu1 %v9943_v63  ;;  %v8644_v8 = vcombine.low %v256_v44, %v260_v6  ;;  %v352_v44 = vld [vmem:[#allocation5 + $0x7d0] sm:$0xff] }
 0x24b   :  { %7101 = vmatprep.subr.bf16.mxu1 %v8669_v11  ;;  %v8637_v11 = vcombine.high %v248_v4, %v252_v5  ;;  %v356_v6 = vld [vmem:[#allocation5 + $0x7f0] sm:$0xff] }
 0x24c   :  { %7059 = vmatpush1.bf16.msra.mxu0 %v8540_v17  ;;  %v8508_v17 = vcombine.low %v120_v1, %v124_v3  ;;  %v216_v1 = vld [vmem:[#allocation5 + $0x390] sm:$0xff] }
 0x24d   :  { %7060 = vmatprep.subr.bf16.mxu0 %v8533_v50  ;;  %v8501_v50 = vcombine.high %v112_v13, %v116_v15  ;;  %v220_v3 = vld [vmem:[#allocation5 + $0x3b0] sm:$0xff] }
 0x24e   :  { %7102 = vmatpush1.bf16.msra.mxu1 %v8668_v31  ;;  %v8636_v31 = vcombine.low %v248_v4, %v252_v5  ;;  %v344_v4 = vld [vmem:[#allocation5 + $0x790] sm:$0xff] }
 0x24f   :  { %7103 = vmatprep.subr.bf16.mxu1 %v8661_v45  ;;  %v8629_v45 = vcombine.high %v240_v20, %v244_v54  ;;  %v348_v5 = vld [vmem:[#allocation5 + $0x7b0] sm:$0xff] }
 0x250   :  { %7061 = vmatpush1.bf16.msra.mxu0 %v8532_v51  ;;  %v8500_v51 = vcombine.low %v112_v13, %v116_v15  ;;  %v208_v13 = vld [vmem:[#allocation5 + $0x350] sm:$0xff] }
 0x251   :  { %7062 = vmatprep.subr.bf16.mxu0 %v8525_v39  ;;  %v8493_v39 = vcombine.high %v104_v22, %v108_v26  ;;  %v212_v15 = vld [vmem:[#allocation5 + $0x370] sm:$0xff] }
 0x252   :  { %7104 = vmatpush1.bf16.msra.mxu1 %v8660_v52  ;;  %v8628_v52 = vcombine.low %v240_v20, %v244_v54  ;;  %v336_v20 = vld [vmem:[#allocation5 + $0x750] sm:$0xff] }
 0x253   :  { %7105 = vmatprep.subr.bf16.mxu1 %v8653_v40  ;;  %v8621_v40 = vcombine.high %v232_v60, %v236_v55  ;;  %v340_v54 = vld [vmem:[#allocation5 + $0x770] sm:$0xff] }
 0x254   :  { %7063 = vmatpush1.bf16.msra.mxu0 %v8524_v56  ;;  %v8492_v56 = vcombine.low %v104_v22, %v108_v26  ;;  %v200_v22 = vld [vmem:[#allocation5 + $0x310] sm:$0xff] }
 0x255   :  { %7064 = vmatprep.subr.bf16.mxu0 %v8517_v23  ;;  %v8613_v23 = vcombine.high %v224_v41, %v228_v42  ;;  %v204_v26 = vld [vmem:[#allocation5 + $0x330] sm:$0xff] }
 0x256   :  { %7106 = vmatpush1.bf16.msra.mxu1 %v8652_v38  ;;  %v8620_v38 = vcombine.low %v232_v60, %v236_v55  ;;  %v328_v60 = vld [vmem:[#allocation5 + $0x710] sm:$0xff] }
 0x257   :  { %7107 = vmatprep.subr.bf16.mxu1 %v8645_v28  ;;  %v8741_v28 = vcombine.high %v352_v44, %v356_v6  ;;  %v332_v55 = vld [vmem:[#allocation5 + $0x730] sm:$0xff] }
 0x258   :  { %7065 = vmatpush1.bf16.msra.mxu0 %v8516_v7  ;;  %v8612_v7 = vcombine.low %v224_v41, %v228_v42  ;;  %v192_v41 = vld [vmem:[#allocation5 + $0x2d0] sm:$0xff] }
 0x259   :  { %7066 = vmatprep.subr.bf16.mxu0 %v8509_v10  ;;  %v8605_v10 = vcombine.high %v216_v1, %v220_v3  ;;  %v196_v42 = vld [vmem:[#allocation5 + $0x2f0] sm:$0xff] }
 0x25a   :  { %7108 = vmatpush1.bf16.msra.mxu1 %v8644_v8  ;;  %v8740_v8 = vcombine.low %v352_v44, %v356_v6  ;;  %v320_v44 = vld [vmem:[#allocation5 + $0x6d0] sm:$0xff] }
 0x25b   :  { %7109 = vmatprep.subr.bf16.mxu1 %v8637_v11  ;;  %v8733_v11 = vcombine.high %v344_v4, %v348_v5  ;;  %v324_v6 = vld [vmem:[#allocation5 + $0x6f0] sm:$0xff] }
 0x25c   :  { %7067 = vmatpush1.bf16.msra.mxu0 %v8508_v17  ;;  %v8604_v17 = vcombine.low %v216_v1, %v220_v3  ;;  %v184_v1 = vld [vmem:[#allocation5 + $0x290] sm:$0xff] }
 0x25d   :  { %7068 = vmatprep.subr.bf16.mxu0 %v8501_v50  ;;  %v8597_v50 = vcombine.high %v208_v13, %v212_v15  ;;  %v188_v3 = vld [vmem:[#allocation5 + $0x2b0] sm:$0xff] }
 0x25e   :  { %7110 = vmatpush1.bf16.msra.mxu1 %v8636_v31  ;;  %v8732_v31 = vcombine.low %v344_v4, %v348_v5  ;;  %v312_v4 = vld [vmem:[#allocation5 + $0x690] sm:$0xff] }
 0x25f   :  { %7111 = vmatprep.subr.bf16.mxu1 %v8629_v45  ;;  %v8725_v45 = vcombine.high %v336_v20, %v340_v54  ;;  %v316_v5 = vld [vmem:[#allocation5 + $0x6b0] sm:$0xff] }
 0x260   :  { %7069 = vmatpush1.bf16.msra.mxu0 %v8500_v51  ;;  %v8596_v51 = vcombine.low %v208_v13, %v212_v15  ;;  %v176_v13 = vld [vmem:[#allocation5 + $0x250] sm:$0xff] }
 0x261   :  { %7070 = vmatprep.subr.bf16.mxu0 %v8493_v39  ;;  %v8589_v39 = vcombine.high %v200_v22, %v204_v26  ;;  %v180_v15 = vld [vmem:[#allocation5 + $0x270] sm:$0xff] }
 0x262   :  { %7112 = vmatpush1.bf16.msra.mxu1 %v8628_v52  ;;  %v8724_v52 = vcombine.low %v336_v20, %v340_v54  ;;  %v304_v20 = vld [vmem:[#allocation5 + $0x650] sm:$0xff] }
 0x263   :  { %7113 = vmatprep.subr.bf16.mxu1 %v8621_v40  ;;  %v8717_v40 = vcombine.high %v328_v60, %v332_v55  ;;  %v308_v54 = vld [vmem:[#allocation5 + $0x670] sm:$0xff] }
 0x264   :  { %7071 = vmatpush1.bf16.msra.mxu0 %v8492_v56  ;;  %v8588_v56 = vcombine.low %v200_v22, %v204_v26  ;;  %v168_v22 = vld [vmem:[#allocation5 + $0x210] sm:$0xff] }
 0x265   :  { %7072 = vmatprep.subr.bf16.mxu0 %v8613_v23  ;;  %v8581_v23 = vcombine.high %v192_v41, %v196_v42  ;;  %v172_v26 = vld [vmem:[#allocation5 + $0x230] sm:$0xff] }
 0x266   :  { %7114 = vmatpush1.bf16.msra.mxu1 %v8620_v38  ;;  %v8716_v38 = vcombine.low %v328_v60, %v332_v55  ;;  %v296_v60 = vld [vmem:[#allocation5 + $0x610] sm:$0xff] }
 0x267   :  { %7115 = vmatprep.subr.bf16.mxu1 %v8741_v28  ;;  %v8709_v28 = vcombine.high %v320_v44, %v324_v6  ;;  %v300_v55 = vld [vmem:[#allocation5 + $0x630] sm:$0xff] }
 0x268   :  { %7073 = vmatpush2.bf16.msra.mxu0 %v8612_v7  ;;  %v8580_v7 = vcombine.low %v192_v41, %v196_v42  ;;  %v416_v41 = vld [vmem:[#allocation5 + $0x9d0] sm:$0xff] }
 0x269   :  { %7074 = vmatprep.subr.bf16.mxu0 %v8605_v10  ;;  %v8573_v10 = vcombine.high %v184_v1, %v188_v3  ;;  %v420_v42 = vld [vmem:[#allocation5 + $0x9f0] sm:$0xff] }
 0x26a   :  { %7116 = vmatpush2.bf16.msra.mxu1 %v8740_v8  ;;  %v8708_v8 = vcombine.low %v320_v44, %v324_v6  ;;  %v544_v44 = vld [vmem:[#allocation5 + $0xdd0] sm:$0xff] }
 0x26b   :  { %7117 = vmatprep.subr.bf16.mxu1 %v8733_v11  ;;  %v8701_v11 = vcombine.high %v312_v4, %v316_v5  ;;  %v548_v6 = vld [vmem:[#allocation5 + $0xdf0] sm:$0xff] }
 0x26c   :  { %7075 = vmatpush2.bf16.msra.mxu0 %v8604_v17  ;;  %v8572_v17 = vcombine.low %v184_v1, %v188_v3  ;;  %v408_v1 = vld [vmem:[#allocation5 + $0x990] sm:$0xff] }
 0x26d   :  { %7076 = vmatprep.subr.bf16.mxu0 %v8597_v50  ;;  %v8565_v50 = vcombine.high %v176_v13, %v180_v15  ;;  %v412_v3 = vld [vmem:[#allocation5 + $0x9b0] sm:$0xff] }
 0x26e   :  { %7118 = vmatpush2.bf16.msra.mxu1 %v8732_v31  ;;  %v8700_v31 = vcombine.low %v312_v4, %v316_v5  ;;  %v536_v4 = vld [vmem:[#allocation5 + $0xd90] sm:$0xff] }
 0x26f   :  { %7119 = vmatprep.subr.bf16.mxu1 %v8725_v45  ;;  %v8693_v45 = vcombine.high %v304_v20, %v308_v54  ;;  %v540_v5 = vld [vmem:[#allocation5 + $0xdb0] sm:$0xff] }
 0x270   :  { %7077 = vmatpush2.bf16.msra.mxu0 %v8596_v51  ;;  %v8564_v51 = vcombine.low %v176_v13, %v180_v15  ;;  %v400_v13 = vld [vmem:[#allocation5 + $0x950] sm:$0xff] }
 0x271   :  { %7078 = vmatprep.subr.bf16.mxu0 %v8589_v39  ;;  %v8557_v39 = vcombine.high %v168_v22, %v172_v26  ;;  %v404_v15 = vld [vmem:[#allocation5 + $0x970] sm:$0xff] }
 0x272   :  { %7120 = vmatpush2.bf16.msra.mxu1 %v8724_v52  ;;  %v8692_v52 = vcombine.low %v304_v20, %v308_v54  ;;  %v528_v20 = vld [vmem:[#allocation5 + $0xd50] sm:$0xff] }
 0x273   :  { %7121 = vmatprep.subr.bf16.mxu1 %v8717_v40  ;;  %v8685_v40 = vcombine.high %v296_v60, %v300_v55  ;;  %v532_v54 = vld [vmem:[#allocation5 + $0xd70] sm:$0xff] }
 0x274   :  { %7079 = vmatpush2.bf16.msra.mxu0 %v8588_v56  ;;  %v8556_v56 = vcombine.low %v168_v22, %v172_v26  ;;  %v392_v22 = vld [vmem:[#allocation5 + $0x910] sm:$0xff] }
 0x275   :  { %7080 = vmatprep.subr.bf16.mxu0 %v8581_v23  ;;  %v8805_v23 = vcombine.high %v416_v41, %v420_v42  ;;  %v396_v26 = vld [vmem:[#allocation5 + $0x930] sm:$0xff] }
 0x276   :  { %7122 = vmatpush2.bf16.msra.mxu1 %v8716_v38  ;;  %v8684_v38 = vcombine.low %v296_v60, %v300_v55  ;;  %v520_v60 = vld [vmem:[#allocation5 + $0xd10] sm:$0xff] }
 0x277   :  { %7123 = vmatprep.subr.bf16.mxu1 %v8709_v28  ;;  %v8933_v28 = vcombine.high %v544_v44, %v548_v6  ;;  %v524_v55 = vld [vmem:[#allocation5 + $0xd30] sm:$0xff] }
 0x278   :  { %7081 = vmatpush2.bf16.msra.mxu0 %v8580_v7  ;;  %v8804_v7 = vcombine.low %v416_v41, %v420_v42  ;;  %v384_v41 = vld [vmem:[#allocation5 + $0x8d0] sm:$0xff] }
 0x279   :  { %7082 = vmatprep.subr.bf16.mxu0 %v8573_v10  ;;  %v8797_v10 = vcombine.high %v408_v1, %v412_v3  ;;  %v388_v42 = vld [vmem:[#allocation5 + $0x8f0] sm:$0xff] }
 0x27a   :  { %7124 = vmatpush2.bf16.msra.mxu1 %v8708_v8  ;;  %v8932_v8 = vcombine.low %v544_v44, %v548_v6  ;;  %v512_v44 = vld [vmem:[#allocation5 + $0xcd0] sm:$0xff] }
 0x27b   :  { %7125 = vmatprep.subr.bf16.mxu1 %v8701_v11  ;;  %v8925_v11 = vcombine.high %v536_v4, %v540_v5  ;;  %v516_v6 = vld [vmem:[#allocation5 + $0xcf0] sm:$0xff] }
 0x27c   :  { %7083 = vmatpush2.bf16.msra.mxu0 %v8572_v17  ;;  %v8796_v17 = vcombine.low %v408_v1, %v412_v3  ;;  %v376_v1 = vld [vmem:[#allocation5 + $0x890] sm:$0xff] }
 0x27d   :  { %7084 = vmatprep.subr.bf16.mxu0 %v8565_v50  ;;  %v8789_v50 = vcombine.high %v400_v13, %v404_v15  ;;  %v380_v3 = vld [vmem:[#allocation5 + $0x8b0] sm:$0xff] }
 0x27e   :  { %7126 = vmatpush2.bf16.msra.mxu1 %v8700_v31  ;;  %v8924_v31 = vcombine.low %v536_v4, %v540_v5  ;;  %v504_v4 = vld [vmem:[#allocation5 + $0xc90] sm:$0xff] }
 0x27f   :  { %7127 = vmatprep.subr.bf16.mxu1 %v8693_v45  ;;  %v8917_v45 = vcombine.high %v528_v20, %v532_v54  ;;  %v508_v5 = vld [vmem:[#allocation5 + $0xcb0] sm:$0xff] }
 0x280   :  { %7085 = vmatpush2.bf16.msra.mxu0 %v8564_v51  ;;  %v8788_v51 = vcombine.low %v400_v13, %v404_v15  ;;  %v368_v13 = vld [vmem:[#allocation5 + $0x850] sm:$0xff] }
 0x281   :  { %7086 = vmatprep.subr.bf16.mxu0 %v8557_v39  ;;  %v8781_v39 = vcombine.high %v392_v22, %v396_v26  ;;  %v372_v15 = vld [vmem:[#allocation5 + $0x870] sm:$0xff] }
 0x282   :  { %7128 = vmatpush2.bf16.msra.mxu1 %v8692_v52  ;;  %v8916_v52 = vcombine.low %v528_v20, %v532_v54  ;;  %v496_v20 = vld [vmem:[#allocation5 + $0xc50] sm:$0xff] }
 0x283   :  { %7129 = vmatprep.subr.bf16.mxu1 %v8685_v40  ;;  %v8909_v40 = vcombine.high %v520_v60, %v524_v55  ;;  %v500_v54 = vld [vmem:[#allocation5 + $0xc70] sm:$0xff] }
 0x284   :  { %7087 = vmatpush2.bf16.msra.mxu0 %v8556_v56  ;;  %v8780_v56 = vcombine.low %v392_v22, %v396_v26  ;;  %v360_v22 = vld [vmem:[#allocation5 + $0x810] sm:$0xff] }
 0x285   :  { %7142 = vmatprep.subr.bf16.mxu0 %v8805_v23  ;;  %v8773_v23 = vcombine.high %v384_v41, %v388_v42  ;;  %v364_v26 = vld [vmem:[#allocation5 + $0x830] sm:$0xff] }
 0x286   :  { %7130 = vmatpush2.bf16.msra.mxu1 %v8684_v38  ;;  %v8908_v38 = vcombine.low %v520_v60, %v524_v55  ;;  %v488_v60 = vld [vmem:[#allocation5 + $0xc10] sm:$0xff] }
 0x287   :  { %7185 = vmatprep.subr.bf16.mxu1 %v8933_v28  ;;  %7089 = vmatmul.mubr.bf16.vlgmr.msra.gmra.mxu0 %v9949_v21  ;;  %v8901_v28 = vcombine.high %v512_v44, %v516_v6  ;;  %v492_v55 = vld [vmem:[#allocation5 + $0xc30] sm:$0xff] }
 0x288   :  { %7143 = vmatpush1.bf16.msra.mxu0 %v8804_v7  ;;  %7174 = vmatprep.mubr.bf16.mxu0 %v9965_v32  ;;  %v8772_v7 = vcombine.low %v384_v41, %v388_v42  ;;  %v480_v41 = vld [vmem:[#allocation5 + $0xbd0] sm:$0xff] }
 0x289   :  { %7132 = vmatmul.mubr.bf16.vlgmr.msra.gmra.mxu1 %v9957_v25  ;;  %7144 = vmatprep.subr.bf16.mxu0 %v8797_v10  ;;  %v8765_v10 = vcombine.high %v376_v1, %v380_v3  ;;  %v484_v42 = vld [vmem:[#allocation5 + $0xbf0] sm:$0xff] }
 0x28a   :  { %7186 = vmatpush1.bf16.msra.mxu1 %v8932_v8  ;;  %7217 = vmatprep.mubr.bf16.mxu1 %v9970_v33  ;;  %v8900_v8 = vcombine.low %v512_v44, %v516_v6  ;;  %v608_v44 = vld [vmem:[#allocation5 + $0xfd0] sm:$0xff] }
 0x28b   :  { %7187 = vmatprep.subr.bf16.mxu1 %v8925_v11  ;;  %v8893_v11 = vcombine.high %v504_v4, %v508_v5  ;;  %v612_v6 = vld [vmem:[#allocation5 + $0xff0] sm:$0xff] }
 0x28c   :  { %7145 = vmatpush1.bf16.msra.mxu0 %v8796_v17  ;;  %v8764_v17 = vcombine.low %v376_v1, %v380_v3  ;;  %v472_v1 = vld [vmem:[#allocation5 + $0xb90] sm:$0xff] }
 0x28d   :  { %7146 = vmatprep.subr.bf16.mxu0 %v8789_v50  ;;  %v8757_v50 = vcombine.high %v368_v13, %v372_v15  ;;  %v476_v3 = vld [vmem:[#allocation5 + $0xbb0] sm:$0xff] }
 0x28e   :  { %7188 = vmatpush1.bf16.msra.mxu1 %v8924_v31  ;;  %v8892_v31 = vcombine.low %v504_v4, %v508_v5  ;;  %v600_v4 = vld [vmem:[#allocation5 + $0xf90] sm:$0xff] }
 0x28f   :  { %7189 = vmatprep.subr.bf16.mxu1 %v8917_v45  ;;  %v8885_v45 = vcombine.high %v496_v20, %v500_v54  ;;  %v604_v5 = vld [vmem:[#allocation5 + $0xfb0] sm:$0xff] }
 0x290   :  { %7147 = vmatpush1.bf16.msra.mxu0 %v8788_v51  ;;  %v8756_v51 = vcombine.low %v368_v13, %v372_v15  ;;  %v464_v13 = vld [vmem:[#allocation5 + $0xb50] sm:$0xff] }
 0x291   :  { %7148 = vmatprep.subr.bf16.mxu0 %v8781_v39  ;;  %v8749_v39 = vcombine.high %v360_v22, %v364_v26  ;;  %v468_v15 = vld [vmem:[#allocation5 + $0xb70] sm:$0xff] }
 0x292   :  { %7190 = vmatpush1.bf16.msra.mxu1 %v8916_v52  ;;  %v8884_v52 = vcombine.low %v496_v20, %v500_v54  ;;  %v592_v20 = vld [vmem:[#allocation5 + $0xf50] sm:$0xff] }
 0x293   :  { %7191 = vmatprep.subr.bf16.mxu1 %v8909_v40  ;;  %v8877_v40 = vcombine.high %v488_v60, %v492_v55  ;;  %v596_v54 = vld [vmem:[#allocation5 + $0xf70] sm:$0xff] }
 0x294   :  { %7149 = vmatpush1.bf16.msra.mxu0 %v8780_v56  ;;  %v8748_v56 = vcombine.low %v360_v22, %v364_v26  ;;  %v456_v22 = vld [vmem:[#allocation5 + $0xb10] sm:$0xff] }
 0x295   :  { %7150 = vmatprep.subr.bf16.mxu0 %v8773_v23  ;;  %v8869_v23 = vcombine.high %v480_v41, %v484_v42  ;;  %v460_v26 = vld [vmem:[#allocation5 + $0xb30] sm:$0xff] }
 0x296   :  { %7192 = vmatpush1.bf16.msra.mxu1 %v8908_v38  ;;  %v8876_v38 = vcombine.low %v488_v60, %v492_v55  ;;  %v584_v60 = vld [vmem:[#allocation5 + $0xf10] sm:$0xff] }
 0x297   :  { %7193 = vmatprep.subr.bf16.mxu1 %v8901_v28  ;;  %v8997_v28 = vcombine.high %v608_v44, %v612_v6  ;;  %v588_v55 = vld [vmem:[#allocation5 + $0xf30] sm:$0xff] }
 0x298   :  { %7151 = vmatpush1.bf16.msra.mxu0 %v8772_v7  ;;  %v8868_v7 = vcombine.low %v480_v41, %v484_v42  ;;  %v448_v41 = vld [vmem:[#allocation5 + $0xad0] sm:$0xff] }
 0x299   :  { %7152 = vmatprep.subr.bf16.mxu0 %v8765_v10  ;;  %v8861_v10 = vcombine.high %v472_v1, %v476_v3  ;;  %v452_v42 = vld [vmem:[#allocation5 + $0xaf0] sm:$0xff] }
 0x29a   :  { %7194 = vmatpush1.bf16.msra.mxu1 %v8900_v8  ;;  %v8996_v8 = vcombine.low %v608_v44, %v612_v6  ;;  %v576_v44 = vld [vmem:[#allocation5 + $0xed0] sm:$0xff] }
 0x29b   :  { %7195 = vmatprep.subr.bf16.mxu1 %v8893_v11  ;;  %v8989_v11 = vcombine.high %v600_v4, %v604_v5  ;;  %v580_v6 = vld [vmem:[#allocation5 + $0xef0] sm:$0xff] }
 0x29c   :  { %7153 = vmatpush1.bf16.msra.mxu0 %v8764_v17  ;;  %v8860_v17 = vcombine.low %v472_v1, %v476_v3  ;;  %v440_v1 = vld [vmem:[#allocation5 + $0xa90] sm:$0xff] }
 0x29d   :  { %7154 = vmatprep.subr.bf16.mxu0 %v8757_v50  ;;  %v8853_v50 = vcombine.high %v464_v13, %v468_v15  ;;  %v444_v3 = vld [vmem:[#allocation5 + $0xab0] sm:$0xff] }
 0x29e   :  { %7196 = vmatpush1.bf16.msra.mxu1 %v8892_v31  ;;  %v8988_v31 = vcombine.low %v600_v4, %v604_v5  ;;  %v568_v4 = vld [vmem:[#allocation5 + $0xe90] sm:$0xff] }
 0x29f   :  { %7197 = vmatprep.subr.bf16.mxu1 %v8885_v45  ;;  %v8981_v45 = vcombine.high %v592_v20, %v596_v54  ;;  %v572_v5 = vld [vmem:[#allocation5 + $0xeb0] sm:$0xff] }
 0x2a0   :  { %7155 = vmatpush1.bf16.msra.mxu0 %v8756_v51  ;;  %v8852_v51 = vcombine.low %v464_v13, %v468_v15  ;;  %v432_v13 = vld [vmem:[#allocation5 + $0xa50] sm:$0xff] }
 0x2a1   :  { %7156 = vmatprep.subr.bf16.mxu0 %v8749_v39  ;;  %v8845_v39 = vcombine.high %v456_v22, %v460_v26  ;;  %v436_v15 = vld [vmem:[#allocation5 + $0xa70] sm:$0xff] }
 0x2a2   :  { %7198 = vmatpush1.bf16.msra.mxu1 %v8884_v52  ;;  %v8980_v52 = vcombine.low %v592_v20, %v596_v54  ;;  %v560_v20 = vld [vmem:[#allocation5 + $0xe50] sm:$0xff] }
 0x2a3   :  { %7199 = vmatprep.subr.bf16.mxu1 %v8877_v40  ;;  %v8973_v40 = vcombine.high %v584_v60, %v588_v55  ;;  %v564_v54 = vld [vmem:[#allocation5 + $0xe70] sm:$0xff] }
 0x2a4   :  { %7157 = vmatpush1.bf16.msra.mxu0 %v8748_v56  ;;  %v8844_v56 = vcombine.low %v456_v22, %v460_v26  ;;  %v424_v22 = vld [vmem:[#allocation5 + $0xa10] sm:$0xff] }
 0x2a5   :  { %7158 = vmatprep.subr.bf16.mxu0 %v8869_v23  ;;  %v8837_v23 = vcombine.high %v448_v41, %v452_v42  ;;  %v428_v26 = vld [vmem:[#allocation5 + $0xa30] sm:$0xff] }
 0x2a6   :  { %7200 = vmatpush1.bf16.msra.mxu1 %v8876_v38  ;;  %v8972_v38 = vcombine.low %v584_v60, %v588_v55  ;;  %v552_v60 = vld [vmem:[#allocation5 + $0xe10] sm:$0xff] }
 0x2a7   :  { %7201 = vmatprep.subr.bf16.mxu1 %v8997_v28  ;;  %v8965_v28 = vcombine.high %v576_v44, %v580_v6  ;;  %v556_v55 = vld [vmem:[#allocation5 + $0xe30] sm:$0xff] }
 0x2a8   :  { %7159 = vmatpush2.bf16.msra.mxu0 %v8868_v7  ;;  %v8836_v7 = vcombine.low %v448_v41, %v452_v42  ;;  %v672_v41 = vld [vmem:[#allocation5 + $0x11d0] sm:$0xff] }
 0x2a9   :  { %7160 = vmatprep.subr.bf16.mxu0 %v8861_v10  ;;  %v8829_v10 = vcombine.high %v440_v1, %v444_v3  ;;  %v676_v42 = vld [vmem:[#allocation5 + $0x11f0] sm:$0xff] }
 0x2aa   :  { %7202 = vmatpush2.bf16.msra.mxu1 %v8996_v8  ;;  %v8964_v8 = vcombine.low %v576_v44, %v580_v6  ;;  %v800_v44 = vld [vmem:[#allocation5 + $0x15d0] sm:$0xff] }
 0x2ab   :  { %7203 = vmatprep.subr.bf16.mxu1 %v8989_v11  ;;  %v8957_v11 = vcombine.high %v568_v4, %v572_v5  ;;  %v804_v6 = vld [vmem:[#allocation5 + $0x15f0] sm:$0xff] }
 0x2ac   :  { %7161 = vmatpush2.bf16.msra.mxu0 %v8860_v17  ;;  %v8828_v17 = vcombine.low %v440_v1, %v444_v3  ;;  %v664_v1 = vld [vmem:[#allocation5 + $0x1190] sm:$0xff] }
 0x2ad   :  { %7162 = vmatprep.subr.bf16.mxu0 %v8853_v50  ;;  %v8821_v50 = vcombine.high %v432_v13, %v436_v15  ;;  %v668_v3 = vld [vmem:[#allocation5 + $0x11b0] sm:$0xff] }
 0x2ae   :  { %7204 = vmatpush2.bf16.msra.mxu1 %v8988_v31  ;;  %v8956_v31 = vcombine.low %v568_v4, %v572_v5  ;;  %v792_v4 = vld [vmem:[#allocation5 + $0x1590] sm:$0xff] }
 0x2af   :  { %7205 = vmatprep.subr.bf16.mxu1 %v8981_v45  ;;  %v8949_v45 = vcombine.high %v560_v20, %v564_v54  ;;  %v796_v5 = vld [vmem:[#allocation5 + $0x15b0] sm:$0xff] }
 0x2b0   :  { %7163 = vmatpush2.bf16.msra.mxu0 %v8852_v51  ;;  %v8820_v51 = vcombine.low %v432_v13, %v436_v15  ;;  %v656_v13 = vld [vmem:[#allocation5 + $0x1150] sm:$0xff] }
 0x2b1   :  { %7164 = vmatprep.subr.bf16.mxu0 %v8845_v39  ;;  %v8813_v39 = vcombine.high %v424_v22, %v428_v26  ;;  %v660_v15 = vld [vmem:[#allocation5 + $0x1170] sm:$0xff] }
 0x2b2   :  { %7206 = vmatpush2.bf16.msra.mxu1 %v8980_v52  ;;  %v8948_v52 = vcombine.low %v560_v20, %v564_v54  ;;  %v784_v20 = vld [vmem:[#allocation5 + $0x1550] sm:$0xff] }
 0x2b3   :  { %7207 = vmatprep.subr.bf16.mxu1 %v8973_v40  ;;  %v8941_v40 = vcombine.high %v552_v60, %v556_v55  ;;  %v788_v54 = vld [vmem:[#allocation5 + $0x1570] sm:$0xff] }
 0x2b4   :  { %7165 = vmatpush2.bf16.msra.mxu0 %v8844_v56  ;;  %v8812_v56 = vcombine.low %v424_v22, %v428_v26  ;;  %v648_v22 = vld [vmem:[#allocation5 + $0x1110] sm:$0xff] }
 0x2b5   :  { %7166 = vmatprep.subr.bf16.mxu0 %v8837_v23  ;;  %v9061_v23 = vcombine.high %v672_v41, %v676_v42  ;;  %v652_v26 = vld [vmem:[#allocation5 + $0x1130] sm:$0xff] }
 0x2b6   :  { %7208 = vmatpush2.bf16.msra.mxu1 %v8972_v38  ;;  %v8940_v38 = vcombine.low %v552_v60, %v556_v55  ;;  %v776_v60 = vld [vmem:[#allocation5 + $0x1510] sm:$0xff] }
 0x2b7   :  { %7209 = vmatprep.subr.bf16.mxu1 %v8965_v28  ;;  %v9189_v28 = vcombine.high %v800_v44, %v804_v6  ;;  %v780_v55 = vld [vmem:[#allocation5 + $0x1530] sm:$0xff] }
 0x2b8   :  { %7167 = vmatpush2.bf16.msra.mxu0 %v8836_v7  ;;  %v9060_v7 = vcombine.low %v672_v41, %v676_v42  ;;  %v640_v41 = vld [vmem:[#allocation5 + $0x10d0] sm:$0xff] }
 0x2b9   :  { %7168 = vmatprep.subr.bf16.mxu0 %v8829_v10  ;;  %v9053_v10 = vcombine.high %v664_v1, %v668_v3  ;;  %v644_v42 = vld [vmem:[#allocation5 + $0x10f0] sm:$0xff] }
 0x2ba   :  { %7210 = vmatpush2.bf16.msra.mxu1 %v8964_v8  ;;  %v9188_v8 = vcombine.low %v800_v44, %v804_v6  ;;  %v768_v44 = vld [vmem:[#allocation5 + $0x14d0] sm:$0xff] }
 0x2bb   :  { %7211 = vmatprep.subr.bf16.mxu1 %v8957_v11  ;;  %v9181_v11 = vcombine.high %v792_v4, %v796_v5  ;;  %v772_v6 = vld [vmem:[#allocation5 + $0x14f0] sm:$0xff] }
 0x2bc   :  { %7169 = vmatpush2.bf16.msra.mxu0 %v8828_v17  ;;  %v9052_v17 = vcombine.low %v664_v1, %v668_v3  ;;  %v632_v1 = vld [vmem:[#allocation5 + $0x1090] sm:$0xff] }
 0x2bd   :  { %7170 = vmatprep.subr.bf16.mxu0 %v8821_v50  ;;  %v9045_v50 = vcombine.high %v656_v13, %v660_v15  ;;  %v636_v3 = vld [vmem:[#allocation5 + $0x10b0] sm:$0xff] }
 0x2be   :  { %7212 = vmatpush2.bf16.msra.mxu1 %v8956_v31  ;;  %v9180_v31 = vcombine.low %v792_v4, %v796_v5  ;;  %v760_v4 = vld [vmem:[#allocation5 + $0x1490] sm:$0xff] }
 0x2bf   :  { %7213 = vmatprep.subr.bf16.mxu1 %v8949_v45  ;;  %v9173_v45 = vcombine.high %v784_v20, %v788_v54  ;;  %v764_v5 = vld [vmem:[#allocation5 + $0x14b0] sm:$0xff] }
 0x2c0   :  { %7171 = vmatpush2.bf16.msra.mxu0 %v8820_v51  ;;  %v9044_v51 = vcombine.low %v656_v13, %v660_v15  ;;  %v624_v13 = vld [vmem:[#allocation5 + $0x1050] sm:$0xff] }
 0x2c1   :  { %7172 = vmatprep.subr.bf16.mxu0 %v8813_v39  ;;  %v9037_v39 = vcombine.high %v648_v22, %v652_v26  ;;  %v628_v15 = vld [vmem:[#allocation5 + $0x1070] sm:$0xff] }
 0x2c2   :  { %7214 = vmatpush2.bf16.msra.mxu1 %v8948_v52  ;;  %v9172_v52 = vcombine.low %v784_v20, %v788_v54  ;;  %v752_v20 = vld [vmem:[#allocation5 + $0x1450] sm:$0xff] }
 0x2c3   :  { %7215 = vmatprep.subr.bf16.mxu1 %v8941_v40  ;;  %v9165_v40 = vcombine.high %v776_v60, %v780_v55  ;;  %v756_v54 = vld [vmem:[#allocation5 + $0x1470] sm:$0xff] }
 0x2c4   :  { %7173 = vmatpush2.bf16.msra.mxu0 %v8812_v56  ;;  %v9036_v56 = vcombine.low %v648_v22, %v652_v26  ;;  %v616_v22 = vld [vmem:[#allocation5 + $0x1010] sm:$0xff] }
 0x2c5   :  { %7228 = vmatprep.subr.bf16.mxu0 %v9061_v23  ;;  %v9029_v23 = vcombine.high %v640_v41, %v644_v42  ;;  %v620_v26 = vld [vmem:[#allocation5 + $0x1030] sm:$0xff] }
 0x2c6   :  { %7216 = vmatpush2.bf16.msra.mxu1 %v8940_v38  ;;  %v9164_v38 = vcombine.low %v776_v60, %v780_v55  ;;  %v744_v60 = vld [vmem:[#allocation5 + $0x1410] sm:$0xff] }
 0x2c7   :  { %7271 = vmatprep.subr.bf16.mxu1 %v9189_v28  ;;  %7175 = vmatmul.mubr.bf16.vlgmr.msra.gmra.mxu0 %v9981_v48  ;;  %v9157_v28 = vcombine.high %v768_v44, %v772_v6  ;;  %v748_v55 = vld [vmem:[#allocation5 + $0x1430] sm:$0xff] }
 0x2c8   :  { %7229 = vmatpush1.bf16.msra.mxu0 %v9060_v7  ;;  %7260 = vmatprep.mubr.bf16.mxu0 %v9993_v0  ;;  %v9028_v7 = vcombine.low %v640_v41, %v644_v42  ;;  %v736_v41 = vld [vmem:[#allocation5 + $0x13d0] sm:$0xff] }
 0x2c9   :  { %7218 = vmatmul.mubr.bf16.vlgmr.msra.gmra.mxu1 %v9985_v49  ;;  %7230 = vmatprep.subr.bf16.mxu0 %v9053_v10  ;;  %v9021_v10 = vcombine.high %v632_v1, %v636_v3  ;;  %v740_v42 = vld [vmem:[#allocation5 + $0x13f0] sm:$0xff] }
 0x2ca   :  { %7272 = vmatpush1.bf16.msra.mxu1 %v9188_v8  ;;  %7303 = vmatprep.mubr.bf16.mxu1 %v9998_v27  ;;  %v9156_v8 = vcombine.low %v768_v44, %v772_v6  ;;  %v864_v44 = vld [vmem:[#allocation5 + $0x17d0] sm:$0xff] }
 0x2cb   :  { %7273 = vmatprep.subr.bf16.mxu1 %v9181_v11  ;;  %v9149_v11 = vcombine.high %v760_v4, %v764_v5  ;;  %v868_v6 = vld [vmem:[#allocation5 + $0x17f0] sm:$0xff] }
 0x2cc   :  { %7231 = vmatpush1.bf16.msra.mxu0 %v9052_v17  ;;  %v9020_v17 = vcombine.low %v632_v1, %v636_v3  ;;  %v728_v1 = vld [vmem:[#allocation5 + $0x1390] sm:$0xff] }
 0x2cd   :  { %7232 = vmatprep.subr.bf16.mxu0 %v9045_v50  ;;  %v9013_v50 = vcombine.high %v624_v13, %v628_v15  ;;  %v732_v3 = vld [vmem:[#allocation5 + $0x13b0] sm:$0xff] }
 0x2ce   :  { %7274 = vmatpush1.bf16.msra.mxu1 %v9180_v31  ;;  %v9148_v31 = vcombine.low %v760_v4, %v764_v5  ;;  %v856_v4 = vld [vmem:[#allocation5 + $0x1790] sm:$0xff] }
 0x2cf   :  { %7275 = vmatprep.subr.bf16.mxu1 %v9173_v45  ;;  %v9141_v45 = vcombine.high %v752_v20, %v756_v54  ;;  %v860_v5 = vld [vmem:[#allocation5 + $0x17b0] sm:$0xff] }
 0x2d0   :  { %7233 = vmatpush1.bf16.msra.mxu0 %v9044_v51  ;;  %v9012_v51 = vcombine.low %v624_v13, %v628_v15  ;;  %v720_v13 = vld [vmem:[#allocation5 + $0x1350] sm:$0xff] }
 0x2d1   :  { %7234 = vmatprep.subr.bf16.mxu0 %v9037_v39  ;;  %v9005_v39 = vcombine.high %v616_v22, %v620_v26  ;;  %v724_v15 = vld [vmem:[#allocation5 + $0x1370] sm:$0xff] }
 0x2d2   :  { %7276 = vmatpush1.bf16.msra.mxu1 %v9172_v52  ;;  %v9140_v52 = vcombine.low %v752_v20, %v756_v54  ;;  %v848_v20 = vld [vmem:[#allocation5 + $0x1750] sm:$0xff] }
 0x2d3   :  { %7277 = vmatprep.subr.bf16.mxu1 %v9165_v40  ;;  %v9133_v40 = vcombine.high %v744_v60, %v748_v55  ;;  %v852_v54 = vld [vmem:[#allocation5 + $0x1770] sm:$0xff] }
 0x2d4   :  { %7235 = vmatpush1.bf16.msra.mxu0 %v9036_v56  ;;  %v9004_v56 = vcombine.low %v616_v22, %v620_v26  ;;  %v712_v22 = vld [vmem:[#allocation5 + $0x1310] sm:$0xff] }
 0x2d5   :  { %7236 = vmatprep.subr.bf16.mxu0 %v9029_v23  ;;  %v9125_v23 = vcombine.high %v736_v41, %v740_v42  ;;  %v716_v26 = vld [vmem:[#allocation5 + $0x1330] sm:$0xff] }
 0x2d6   :  { %7278 = vmatpush1.bf16.msra.mxu1 %v9164_v38  ;;  %v9132_v38 = vcombine.low %v744_v60, %v748_v55  ;;  %v840_v60 = vld [vmem:[#allocation5 + $0x1710] sm:$0xff] }
 0x2d7   :  { %7279 = vmatprep.subr.bf16.mxu1 %v9157_v28  ;;  %v9253_v28 = vcombine.high %v864_v44, %v868_v6  ;;  %v844_v55 = vld [vmem:[#allocation5 + $0x1730] sm:$0xff] }
 0x2d8   :  { %7237 = vmatpush1.bf16.msra.mxu0 %v9028_v7  ;;  %v9124_v7 = vcombine.low %v736_v41, %v740_v42  ;;  %v704_v41 = vld [vmem:[#allocation5 + $0x12d0] sm:$0xff] }
 0x2d9   :  { %7238 = vmatprep.subr.bf16.mxu0 %v9021_v10  ;;  %v9117_v10 = vcombine.high %v728_v1, %v732_v3  ;;  %v708_v42 = vld [vmem:[#allocation5 + $0x12f0] sm:$0xff] }
 0x2da   :  { %7280 = vmatpush1.bf16.msra.mxu1 %v9156_v8  ;;  %v9252_v8 = vcombine.low %v864_v44, %v868_v6  ;;  %v832_v44 = vld [vmem:[#allocation5 + $0x16d0] sm:$0xff] }
 0x2db   :  { %7281 = vmatprep.subr.bf16.mxu1 %v9149_v11  ;;  %v9245_v11 = vcombine.high %v856_v4, %v860_v5  ;;  %v836_v6 = vld [vmem:[#allocation5 + $0x16f0] sm:$0xff] }
 0x2dc   :  { %7239 = vmatpush1.bf16.msra.mxu0 %v9020_v17  ;;  %v9116_v17 = vcombine.low %v728_v1, %v732_v3  ;;  %v696_v1 = vld [vmem:[#allocation5 + $0x1290] sm:$0xff] }
 0x2dd   :  { %7240 = vmatprep.subr.bf16.mxu0 %v9013_v50  ;;  %v9109_v50 = vcombine.high %v720_v13, %v724_v15  ;;  %v700_v3 = vld [vmem:[#allocation5 + $0x12b0] sm:$0xff] }
 0x2de   :  { %7282 = vmatpush1.bf16.msra.mxu1 %v9148_v31  ;;  %v9244_v31 = vcombine.low %v856_v4, %v860_v5  ;;  %v824_v4 = vld [vmem:[#allocation5 + $0x1690] sm:$0xff] }
 0x2df   :  { %7283 = vmatprep.subr.bf16.mxu1 %v9141_v45  ;;  %v9237_v45 = vcombine.high %v848_v20, %v852_v54  ;;  %v828_v5 = vld [vmem:[#allocation5 + $0x16b0] sm:$0xff] }
 0x2e0   :  { %7241 = vmatpush1.bf16.msra.mxu0 %v9012_v51  ;;  %v9108_v51 = vcombine.low %v720_v13, %v724_v15  ;;  %v688_v13 = vld [vmem:[#allocation5 + $0x1250] sm:$0xff] }
 0x2e1   :  { %7242 = vmatprep.subr.bf16.mxu0 %v9005_v39  ;;  %v9101_v39 = vcombine.high %v712_v22, %v716_v26  ;;  %v692_v15 = vld [vmem:[#allocation5 + $0x1270] sm:$0xff] }
 0x2e2   :  { %7284 = vmatpush1.bf16.msra.mxu1 %v9140_v52  ;;  %v9236_v52 = vcombine.low %v848_v20, %v852_v54  ;;  %v816_v20 = vld [vmem:[#allocation5 + $0x1650] sm:$0xff] }
 0x2e3   :  { %7285 = vmatprep.subr.bf16.mxu1 %v9133_v40  ;;  %v9229_v40 = vcombine.high %v840_v60, %v844_v55  ;;  %v820_v54 = vld [vmem:[#allocation5 + $0x1670] sm:$0xff] }
 0x2e4   :  { %7243 = vmatpush1.bf16.msra.mxu0 %v9004_v56  ;;  %v9100_v56 = vcombine.low %v712_v22, %v716_v26  ;;  %v680_v22 = vld [vmem:[#allocation5 + $0x1210] sm:$0xff] }
 0x2e5   :  { %7244 = vmatprep.subr.bf16.mxu0 %v9125_v23  ;;  %v9093_v23 = vcombine.high %v704_v41, %v708_v42  ;;  %v684_v26 = vld [vmem:[#allocation5 + $0x1230] sm:$0xff] }
 0x2e6   :  { %7286 = vmatpush1.bf16.msra.mxu1 %v9132_v38  ;;  %v9228_v38 = vcombine.low %v840_v60, %v844_v55  ;;  %v808_v60 = vld [vmem:[#allocation5 + $0x1610] sm:$0xff] }
 0x2e7   :  { %7287 = vmatprep.subr.bf16.mxu1 %v9253_v28  ;;  %v9221_v28 = vcombine.high %v832_v44, %v836_v6  ;;  %v812_v55 = vld [vmem:[#allocation5 + $0x1630] sm:$0xff] }
 0x2e8   :  { %7245 = vmatpush2.bf16.msra.mxu0 %v9124_v7  ;;  %v9092_v7 = vcombine.low %v704_v41, %v708_v42  ;;  %v928_v41 = vld [vmem:[#allocation5 + $0x19d0] sm:$0xff] }
 0x2e9   :  { %7246 = vmatprep.subr.bf16.mxu0 %v9117_v10  ;;  %v9085_v10 = vcombine.high %v696_v1, %v700_v3  ;;  %v932_v42 = vld [vmem:[#allocation5 + $0x19f0] sm:$0xff] }
 0x2ea   :  { %7288 = vmatpush2.bf16.msra.mxu1 %v9252_v8  ;;  %v9220_v8 = vcombine.low %v832_v44, %v836_v6  ;;  %v1056_v44 = vld [vmem:[#allocation5 + $0x1dd0] sm:$0xff] }
 0x2eb   :  { %7289 = vmatprep.subr.bf16.mxu1 %v9245_v11  ;;  %v9213_v11 = vcombine.high %v824_v4, %v828_v5  ;;  %v1060_v6 = vld [vmem:[#allocation5 + $0x1df0] sm:$0xff] }
 0x2ec   :  { %7247 = vmatpush2.bf16.msra.mxu0 %v9116_v17  ;;  %v9084_v17 = vcombine.low %v696_v1, %v700_v3  ;;  %v920_v1 = vld [vmem:[#allocation5 + $0x1990] sm:$0xff] }
 0x2ed   :  { %7248 = vmatprep.subr.bf16.mxu0 %v9109_v50  ;;  %v9077_v50 = vcombine.high %v688_v13, %v692_v15  ;;  %v924_v3 = vld [vmem:[#allocation5 + $0x19b0] sm:$0xff] }
 0x2ee   :  { %7290 = vmatpush2.bf16.msra.mxu1 %v9244_v31  ;;  %v9212_v31 = vcombine.low %v824_v4, %v828_v5  ;;  %v1048_v4 = vld [vmem:[#allocation5 + $0x1d90] sm:$0xff] }
 0x2ef   :  { %7291 = vmatprep.subr.bf16.mxu1 %v9237_v45  ;;  %v9205_v45 = vcombine.high %v816_v20, %v820_v54  ;;  %v1052_v5 = vld [vmem:[#allocation5 + $0x1db0] sm:$0xff] }
 0x2f0   :  { %7249 = vmatpush2.bf16.msra.mxu0 %v9108_v51  ;;  %v9076_v51 = vcombine.low %v688_v13, %v692_v15  ;;  %v912_v13 = vld [vmem:[#allocation5 + $0x1950] sm:$0xff] }
 0x2f1   :  { %7250 = vmatprep.subr.bf16.mxu0 %v9101_v39  ;;  %v9069_v39 = vcombine.high %v680_v22, %v684_v26  ;;  %v916_v15 = vld [vmem:[#allocation5 + $0x1970] sm:$0xff] }
 0x2f2   :  { %7292 = vmatpush2.bf16.msra.mxu1 %v9236_v52  ;;  %v9204_v52 = vcombine.low %v816_v20, %v820_v54  ;;  %v1040_v20 = vld [vmem:[#allocation5 + $0x1d50] sm:$0xff] }
 0x2f3   :  { %7293 = vmatprep.subr.bf16.mxu1 %v9229_v40  ;;  %v9197_v40 = vcombine.high %v808_v60, %v812_v55  ;;  %v1044_v54 = vld [vmem:[#allocation5 + $0x1d70] sm:$0xff] }
 0x2f4   :  { %7251 = vmatpush2.bf16.msra.mxu0 %v9100_v56  ;;  %v9068_v56 = vcombine.low %v680_v22, %v684_v26  ;;  %v904_v22 = vld [vmem:[#allocation5 + $0x1910] sm:$0xff] }
 0x2f5   :  { %7252 = vmatprep.subr.bf16.mxu0 %v9093_v23  ;;  %v9317_v23 = vcombine.high %v928_v41, %v932_v42  ;;  %v908_v26 = vld [vmem:[#allocation5 + $0x1930] sm:$0xff] }
 0x2f6   :  { %7294 = vmatpush2.bf16.msra.mxu1 %v9228_v38  ;;  %v9196_v38 = vcombine.low %v808_v60, %v812_v55  ;;  %v1032_v60 = vld [vmem:[#allocation5 + $0x1d10] sm:$0xff] }
 0x2f7   :  { %7295 = vmatprep.subr.bf16.mxu1 %v9221_v28  ;;  %v9445_v28 = vcombine.high %v1056_v44, %v1060_v6  ;;  %v1036_v55 = vld [vmem:[#allocation5 + $0x1d30] sm:$0xff] }
 0x2f8   :  { %7253 = vmatpush2.bf16.msra.mxu0 %v9092_v7  ;;  %v9316_v7 = vcombine.low %v928_v41, %v932_v42  ;;  %v896_v41 = vld [vmem:[#allocation5 + $0x18d0] sm:$0xff] }
 0x2f9   :  { %7254 = vmatprep.subr.bf16.mxu0 %v9085_v10  ;;  %v9309_v10 = vcombine.high %v920_v1, %v924_v3  ;;  %v900_v42 = vld [vmem:[#allocation5 + $0x18f0] sm:$0xff] }
 0x2fa   :  { %7296 = vmatpush2.bf16.msra.mxu1 %v9220_v8  ;;  %v9444_v8 = vcombine.low %v1056_v44, %v1060_v6  ;;  %v1024_v44 = vld [vmem:[#allocation5 + $0x1cd0] sm:$0xff] }
 0x2fb   :  { %7297 = vmatprep.subr.bf16.mxu1 %v9213_v11  ;;  %v9437_v11 = vcombine.high %v1048_v4, %v1052_v5  ;;  %v1028_v6 = vld [vmem:[#allocation5 + $0x1cf0] sm:$0xff] }
 0x2fc   :  { %7255 = vmatpush2.bf16.msra.mxu0 %v9084_v17  ;;  %v9308_v17 = vcombine.low %v920_v1, %v924_v3  ;;  %v888_v1 = vld [vmem:[#allocation5 + $0x1890] sm:$0xff] }
 0x2fd   :  { %7256 = vmatprep.subr.bf16.mxu0 %v9077_v50  ;;  %v9301_v50 = vcombine.high %v912_v13, %v916_v15  ;;  %v892_v3 = vld [vmem:[#allocation5 + $0x18b0] sm:$0xff] }
 0x2fe   :  { %7298 = vmatpush2.bf16.msra.mxu1 %v9212_v31  ;;  %v9436_v31 = vcombine.low %v1048_v4, %v1052_v5  ;;  %v1016_v4 = vld [vmem:[#allocation5 + $0x1c90] sm:$0xff] }
 0x2ff   :  { %7299 = vmatprep.subr.bf16.mxu1 %v9205_v45  ;;  %v9429_v45 = vcombine.high %v1040_v20, %v1044_v54  ;;  %v1020_v5 = vld [vmem:[#allocation5 + $0x1cb0] sm:$0xff] }
 0x300   :  { %7257 = vmatpush2.bf16.msra.mxu0 %v9076_v51  ;;  %v9300_v51 = vcombine.low %v912_v13, %v916_v15  ;;  %v880_v13 = vld [vmem:[#allocation5 + $0x1850] sm:$0xff] }
 0x301   :  { %7258 = vmatprep.subr.bf16.mxu0 %v9069_v39  ;;  %v9293_v39 = vcombine.high %v904_v22, %v908_v26  ;;  %v884_v15 = vld [vmem:[#allocation5 + $0x1870] sm:$0xff] }
 0x302   :  { %7300 = vmatpush2.bf16.msra.mxu1 %v9204_v52  ;;  %v9428_v52 = vcombine.low %v1040_v20, %v1044_v54  ;;  %v1008_v20 = vld [vmem:[#allocation5 + $0x1c50] sm:$0xff] }
 0x303   :  { %7301 = vmatprep.subr.bf16.mxu1 %v9197_v40  ;;  %v9421_v40 = vcombine.high %v1032_v60, %v1036_v55  ;;  %v1012_v54 = vld [vmem:[#allocation5 + $0x1c70] sm:$0xff] }
 0x304   :  { %7259 = vmatpush2.bf16.msra.mxu0 %v9068_v56  ;;  %v9292_v56 = vcombine.low %v904_v22, %v908_v26  ;;  %v872_v22 = vld [vmem:[#allocation5 + $0x1810] sm:$0xff] }
 0x305   :  { %7314 = vmatprep.subr.bf16.mxu0 %v9317_v23  ;;  %v9285_v23 = vcombine.high %v896_v41, %v900_v42  ;;  %v876_v26 = vld [vmem:[#allocation5 + $0x1830] sm:$0xff] }
 0x306   :  { %7302 = vmatpush2.bf16.msra.mxu1 %v9196_v38  ;;  %v9420_v38 = vcombine.low %v1032_v60, %v1036_v55  ;;  %v1000_v60 = vld [vmem:[#allocation5 + $0x1c10] sm:$0xff] }
 0x307   :  { %7357 = vmatprep.subr.bf16.mxu1 %v9445_v28  ;;  %7261 = vmatmul.mubr.bf16.vlgmr.msra.gmra.mxu0 %v10005_v19  ;;  %v9413_v28 = vcombine.high %v1024_v44, %v1028_v6  ;;  %v1004_v55 = vld [vmem:[#allocation5 + $0x1c30] sm:$0xff] }
 0x308   :  { %7315 = vmatpush1.bf16.msra.mxu0 %v9316_v7  ;;  %7346 = vmatprep.mubr.bf16.mxu0 %v10021_v34  ;;  %v9284_v7 = vcombine.low %v896_v41, %v900_v42  ;;  %v992_v41 = vld [vmem:[#allocation5 + $0x1bd0] sm:$0xff] }
 0x309   :  { %7304 = vmatmul.mubr.bf16.vlgmr.msra.gmra.mxu1 %v10013_v29  ;;  %7316 = vmatprep.subr.bf16.mxu0 %v9309_v10  ;;  %v9277_v10 = vcombine.high %v888_v1, %v892_v3  ;;  %v996_v42 = vld [vmem:[#allocation5 + $0x1bf0] sm:$0xff] }
 0x30a   :  { %7358 = vmatpush1.bf16.msra.mxu1 %v9444_v8  ;;  %7389 = vmatprep.mubr.bf16.mxu1 %v10026_v35  ;;  %v9412_v8 = vcombine.low %v1024_v44, %v1028_v6  ;;  %v1120_v44 = vld [vmem:[#allocation5 + $0x1fd0] sm:$0xff] }
 0x30b   :  { %7359 = vmatprep.subr.bf16.mxu1 %v9437_v11  ;;  %v9405_v11 = vcombine.high %v1016_v4, %v1020_v5  ;;  %v1124_v6 = vld [vmem:[#allocation5 + $0x1ff0] sm:$0xff] }
 0x30c   :  { %7317 = vmatpush1.bf16.msra.mxu0 %v9308_v17  ;;  %v9276_v17 = vcombine.low %v888_v1, %v892_v3  ;;  %v984_v1 = vld [vmem:[#allocation5 + $0x1b90] sm:$0xff] }
 0x30d   :  { %7318 = vmatprep.subr.bf16.mxu0 %v9301_v50  ;;  %v9269_v50 = vcombine.high %v880_v13, %v884_v15  ;;  %v988_v3 = vld [vmem:[#allocation5 + $0x1bb0] sm:$0xff] }
 0x30e   :  { %7360 = vmatpush1.bf16.msra.mxu1 %v9436_v31  ;;  %v9404_v31 = vcombine.low %v1016_v4, %v1020_v5  ;;  %v1112_v4 = vld [vmem:[#allocation5 + $0x1f90] sm:$0xff] }
 0x30f   :  { %7361 = vmatprep.subr.bf16.mxu1 %v9429_v45  ;;  %v9397_v45 = vcombine.high %v1008_v20, %v1012_v54  ;;  %v1116_v5 = vld [vmem:[#allocation5 + $0x1fb0] sm:$0xff] }
 0x310   :  { %7319 = vmatpush1.bf16.msra.mxu0 %v9300_v51  ;;  %v9268_v51 = vcombine.low %v880_v13, %v884_v15  ;;  %v976_v13 = vld [vmem:[#allocation5 + $0x1b50] sm:$0xff] }
 0x311   :  { %7320 = vmatprep.subr.bf16.mxu0 %v9293_v39  ;;  %v9261_v39 = vcombine.high %v872_v22, %v876_v26  ;;  %v980_v15 = vld [vmem:[#allocation5 + $0x1b70] sm:$0xff] }
 0x312   :  { %7362 = vmatpush1.bf16.msra.mxu1 %v9428_v52  ;;  %v9396_v52 = vcombine.low %v1008_v20, %v1012_v54  ;;  %v1104_v20 = vld [vmem:[#allocation5 + $0x1f50] sm:$0xff] }
 0x313   :  { %7363 = vmatprep.subr.bf16.mxu1 %v9421_v40  ;;  %v9389_v40 = vcombine.high %v1000_v60, %v1004_v55  ;;  %v1108_v54 = vld [vmem:[#allocation5 + $0x1f70] sm:$0xff] }
 0x314   :  { %7321 = vmatpush1.bf16.msra.mxu0 %v9292_v56  ;;  %v9260_v56 = vcombine.low %v872_v22, %v876_v26  ;;  %v968_v22 = vld [vmem:[#allocation5 + $0x1b10] sm:$0xff] }
 0x315   :  { %7322 = vmatprep.subr.bf16.mxu0 %v9285_v23  ;;  %v9381_v23 = vcombine.high %v992_v41, %v996_v42  ;;  %v972_v26 = vld [vmem:[#allocation5 + $0x1b30] sm:$0xff] }
 0x316   :  { %7364 = vmatpush1.bf16.msra.mxu1 %v9420_v38  ;;  %v9388_v38 = vcombine.low %v1000_v60, %v1004_v55  ;;  %v1096_v60 = vld [vmem:[#allocation5 + $0x1f10] sm:$0xff] }
 0x317   :  { %7365 = vmatprep.subr.bf16.mxu1 %v9413_v28  ;;  %v9509_v28 = vcombine.high %v1120_v44, %v1124_v6  ;;  %v1100_v55 = vld [vmem:[#allocation5 + $0x1f30] sm:$0xff] }
 0x318   :  { %7323 = vmatpush1.bf16.msra.mxu0 %v9284_v7  ;;  %v9380_v7 = vcombine.low %v992_v41, %v996_v42  ;;  %v960_v41 = vld [vmem:[#allocation5 + $0x1ad0] sm:$0xff] }
 0x319   :  { %7324 = vmatprep.subr.bf16.mxu0 %v9277_v10  ;;  %v9373_v10 = vcombine.high %v984_v1, %v988_v3  ;;  %v964_v42 = vld [vmem:[#allocation5 + $0x1af0] sm:$0xff] }
 0x31a   :  { %7366 = vmatpush1.bf16.msra.mxu1 %v9412_v8  ;;  %v9508_v8 = vcombine.low %v1120_v44, %v1124_v6  ;;  %v1088_v44 = vld [vmem:[#allocation5 + $0x1ed0] sm:$0xff] }
 0x31b   :  { %7367 = vmatprep.subr.bf16.mxu1 %v9405_v11  ;;  %v9501_v11 = vcombine.high %v1112_v4, %v1116_v5  ;;  %v1092_v6 = vld [vmem:[#allocation5 + $0x1ef0] sm:$0xff] }
 0x31c   :  { %7325 = vmatpush1.bf16.msra.mxu0 %v9276_v17  ;;  %v9372_v17 = vcombine.low %v984_v1, %v988_v3  ;;  %v952_v1 = vld [vmem:[#allocation5 + $0x1a90] sm:$0xff] }
 0x31d   :  { %7326 = vmatprep.subr.bf16.mxu0 %v9269_v50  ;;  %v9365_v50 = vcombine.high %v976_v13, %v980_v15  ;;  %v956_v3 = vld [vmem:[#allocation5 + $0x1ab0] sm:$0xff] }
 0x31e   :  { %7368 = vmatpush1.bf16.msra.mxu1 %v9404_v31  ;;  %v9500_v31 = vcombine.low %v1112_v4, %v1116_v5  ;;  %v1080_v4 = vld [vmem:[#allocation5 + $0x1e90] sm:$0xff] }
 0x31f   :  { %7369 = vmatprep.subr.bf16.mxu1 %v9397_v45  ;;  %v9493_v45 = vcombine.high %v1104_v20, %v1108_v54  ;;  %v1084_v5 = vld [vmem:[#allocation5 + $0x1eb0] sm:$0xff] }
 0x320   :  { %7327 = vmatpush1.bf16.msra.mxu0 %v9268_v51  ;;  %v9364_v51 = vcombine.low %v976_v13, %v980_v15  ;;  %v944_v13 = vld [vmem:[#allocation5 + $0x1a50] sm:$0xff] }
 0x321   :  { %7328 = vmatprep.subr.bf16.mxu0 %v9261_v39  ;;  %v9357_v39 = vcombine.high %v968_v22, %v972_v26  ;;  %v948_v15 = vld [vmem:[#allocation5 + $0x1a70] sm:$0xff] }
 0x322   :  { %7370 = vmatpush1.bf16.msra.mxu1 %v9396_v52  ;;  %v9492_v52 = vcombine.low %v1104_v20, %v1108_v54  ;;  %v1072_v20 = vld [vmem:[#allocation5 + $0x1e50] sm:$0xff] }
 0x323   :  { %7371 = vmatprep.subr.bf16.mxu1 %v9389_v40  ;;  %v9485_v40 = vcombine.high %v1096_v60, %v1100_v55  ;;  %v1076_v54 = vld [vmem:[#allocation5 + $0x1e70] sm:$0xff] }
 0x324   :  { %7329 = vmatpush1.bf16.msra.mxu0 %v9260_v56  ;;  %v9356_v56 = vcombine.low %v968_v22, %v972_v26  ;;  %v936_v22 = vld [vmem:[#allocation5 + $0x1a10] sm:$0xff] }
 0x325   :  { %7330 = vmatprep.subr.bf16.mxu0 %v9381_v23  ;;  %v9349_v23 = vcombine.high %v960_v41, %v964_v42  ;;  %v940_v26 = vld [vmem:[#allocation5 + $0x1a30] sm:$0xff] }
 0x326   :  { %7372 = vmatpush1.bf16.msra.mxu1 %v9388_v38  ;;  %v9484_v38 = vcombine.low %v1096_v60, %v1100_v55  ;;  %v1064_v60 = vld [vmem:[#allocation5 + $0x1e10] sm:$0xff] }
 0x327   :  { %7373 = vmatprep.subr.bf16.mxu1 %v9509_v28  ;;  %v9477_v28 = vcombine.high %v1088_v44, %v1092_v6  ;;  %v1068_v55 = vld [vmem:[#allocation5 + $0x1e30] sm:$0xff] }
 0x328   :  { %7331 = vmatpush2.bf16.msra.mxu0 %v9380_v7  ;;  %v9348_v7 = vcombine.low %v960_v41, %v964_v42  ;;  %v161_v41 = vld [vmem:[#allocation5 + $0x1d8] sm:$0xff] }
 0x329   :  { %7332 = vmatprep.subr.bf16.mxu0 %v9373_v10  ;;  %v9341_v10 = vcombine.high %v952_v1, %v956_v3  ;;  %v165_v42 = vld [vmem:[#allocation5 + $0x1f8] sm:$0xff] }
 0x32a   :  { %7374 = vmatpush2.bf16.msra.mxu1 %v9508_v8  ;;  %v9476_v8 = vcombine.low %v1088_v44, %v1092_v6  ;;  %v289_v44 = vld [vmem:[#allocation5 + $0x5d8] sm:$0xff] }
 0x32b   :  { %7375 = vmatprep.subr.bf16.mxu1 %v9501_v11  ;;  %v9469_v11 = vcombine.high %v1080_v4, %v1084_v5  ;;  %v293_v6 = vld [vmem:[#allocation5 + $0x5f8] sm:$0xff] }
 0x32c   :  { %7333 = vmatpush2.bf16.msra.mxu0 %v9372_v17  ;;  %v9340_v17 = vcombine.low %v952_v1, %v956_v3  ;;  %v153_v1 = vld [vmem:[#allocation5 + $0x198] sm:$0xff] }
 0x32d   :  { %7334 = vmatprep.subr.bf16.mxu0 %v9365_v50  ;;  %v9333_v50 = vcombine.high %v944_v13, %v948_v15  ;;  %v157_v3 = vld [vmem:[#allocation5 + $0x1b8] sm:$0xff] }
 0x32e   :  { %7376 = vmatpush2.bf16.msra.mxu1 %v9500_v31  ;;  %v9468_v31 = vcombine.low %v1080_v4, %v1084_v5  ;;  %v281_v4 = vld [vmem:[#allocation5 + $0x598] sm:$0xff] }
 0x32f   :  { %7377 = vmatprep.subr.bf16.mxu1 %v9493_v45  ;;  %v9461_v45 = vcombine.high %v1072_v20, %v1076_v54  ;;  %v285_v5 = vld [vmem:[#allocation5 + $0x5b8] sm:$0xff] }
 0x330   :  { %7335 = vmatpush2.bf16.msra.mxu0 %v9364_v51  ;;  %v9332_v51 = vcombine.low %v944_v13, %v948_v15  ;;  %v145_v13 = vld [vmem:[#allocation5 + $0x158] sm:$0xff] }
 0x331   :  { %7336 = vmatprep.subr.bf16.mxu0 %v9357_v39  ;;  %v9325_v39 = vcombine.high %v936_v22, %v940_v26  ;;  %v149_v15 = vld [vmem:[#allocation5 + $0x178] sm:$0xff] }
 0x332   :  { %7378 = vmatpush2.bf16.msra.mxu1 %v9492_v52  ;;  %v9460_v52 = vcombine.low %v1072_v20, %v1076_v54  ;;  %v273_v20 = vld [vmem:[#allocation5 + $0x558] sm:$0xff] }
 0x333   :  { %7379 = vmatprep.subr.bf16.mxu1 %v9485_v40  ;;  %v9453_v40 = vcombine.high %v1064_v60, %v1068_v55  ;;  %v277_v54 = vld [vmem:[#allocation5 + $0x578] sm:$0xff] }
 0x334   :  { %7337 = vmatpush2.bf16.msra.mxu0 %v9356_v56  ;;  %v9324_v56 = vcombine.low %v936_v22, %v940_v26  ;;  %v137_v22 = vld [vmem:[#allocation5 + $0x118] sm:$0xff] }
 0x335   :  { %7338 = vmatprep.subr.bf16.mxu0 %v9349_v23  ;;  %v8551_v23 = vcombine.high %v161_v41, %v165_v42  ;;  %v141_v26 = vld [vmem:[#allocation5 + $0x138] sm:$0xff] }
 0x336   :  { %7380 = vmatpush2.bf16.msra.mxu1 %v9484_v38  ;;  %v9452_v38 = vcombine.low %v1064_v60, %v1068_v55  ;;  %v265_v60 = vld [vmem:[#allocation5 + $0x518] sm:$0xff] }
 0x337   :  { %7381 = vmatprep.subr.bf16.mxu1 %v9477_v28  ;;  %v8679_v28 = vcombine.high %v289_v44, %v293_v6  ;;  %v269_v55 = vld [vmem:[#allocation5 + $0x538] sm:$0xff] }
 0x338   :  { %7339 = vmatpush2.bf16.msra.mxu0 %v9348_v7  ;;  %v8550_v7 = vcombine.low %v161_v41, %v165_v42  ;;  %v129_v41 = vld [vmem:[#allocation5 + $0xd8] sm:$0xff] }
 0x339   :  { %7340 = vmatprep.subr.bf16.mxu0 %v9341_v10  ;;  %v8543_v10 = vcombine.high %v153_v1, %v157_v3  ;;  %v133_v42 = vld [vmem:[#allocation5 + $0xf8] sm:$0xff] }
 0x33a   :  { %7382 = vmatpush2.bf16.msra.mxu1 %v9476_v8  ;;  %v8678_v8 = vcombine.low %v289_v44, %v293_v6  ;;  %v257_v44 = vld [vmem:[#allocation5 + $0x4d8] sm:$0xff] }
 0x33b   :  { %7383 = vmatprep.subr.bf16.mxu1 %v9469_v11  ;;  %v8671_v11 = vcombine.high %v281_v4, %v285_v5  ;;  %v261_v6 = vld [vmem:[#allocation5 + $0x4f8] sm:$0xff] }
 0x33c   :  { %7341 = vmatpush2.bf16.msra.mxu0 %v9340_v17  ;;  %v8542_v17 = vcombine.low %v153_v1, %v157_v3  ;;  %v249_v1 = vld [vmem:[#allocation5 + $0x498] sm:$0xff] }
 0x33d   :  { %7342 = vmatprep.subr.bf16.mxu0 %v9333_v50  ;;  %v8535_v50 = vcombine.high %v145_v13, %v149_v15  ;;  %v253_v3 = vld [vmem:[#allocation5 + $0x4b8] sm:$0xff] }
 0x33e   :  { %7384 = vmatpush2.bf16.msra.mxu1 %v9468_v31  ;;  %v8670_v31 = vcombine.low %v281_v4, %v285_v5  ;;  %v8518_v4 = vcombine.low %v129_v41, %v133_v42  ;;  %v8646_v5 = vcombine.low %v257_v44, %v261_v6 }
 0x33f   :  { %7385 = vmatprep.subr.bf16.mxu1 %v9461_v45  ;;  %v8663_v45 = vcombine.high %v273_v20, %v277_v54 }
 0x340   :  { %7343 = vmatpush2.bf16.msra.mxu0 %v9332_v51  ;;  %v8534_v51 = vcombine.low %v145_v13, %v149_v15  ;;  %v241_v13 = vld [vmem:[#allocation5 + $0x458] sm:$0xff] }
 0x341   :  { %7344 = vmatprep.subr.bf16.mxu0 %v9325_v39  ;;  %v8527_v39 = vcombine.high %v137_v22, %v141_v26  ;;  %v245_v15 = vld [vmem:[#allocation5 + $0x478] sm:$0xff] }
 0x342   :  { %7386 = vmatpush2.bf16.msra.mxu1 %v9460_v52  ;;  %v8662_v52 = vcombine.low %v273_v20, %v277_v54  ;;  %v8638_v54 = vcombine.low %v249_v1, %v253_v3 }
 0x343   :  { %7387 = vmatprep.subr.bf16.mxu1 %v9453_v40  ;;  %v8655_v40 = vcombine.high %v265_v60, %v269_v55 }
 0x344   :  { %7345 = vmatpush2.bf16.msra.mxu0 %v9324_v56  ;;  %v8526_v56 = vcombine.low %v137_v22, %v141_v26  ;;  %v233_v22 = vld [vmem:[#allocation5 + $0x418] sm:$0xff] }
 0x345   :  { %7400 = vmatprep.subr.bf16.mxu0 %v8551_v23  ;;  %v121_v23 = vld [vmem:[#allocation5 + $0x98] sm:$0xff] }
 0x346   :  { %7388 = vmatpush2.bf16.msra.mxu1 %v9452_v38  ;;  %v8519_v38 = vcombine.high %v129_v41, %v133_v42  ;;  %v237_v26 = vld [vmem:[#allocation5 + $0x438] sm:$0xff] }
 0x347   :  { %7443 = vmatprep.subr.bf16.mxu1 %v8679_v28  ;;  %7347 = vmatmul.mubr.bf16.vlgmr.msra.gmra.mxu0 %v10036_v12  ;;  %v125_v28 = vld [vmem:[#allocation5 + $0xb8] sm:$0xff] }
 0x348   :  { %7401 = vmatpush1.bf16.msra.mxu0 %v8550_v7  ;;  %7432 = vmatprep.mubr.bf16.mxu0 %v9935_v58  ;;  %v8654_v58 = vcombine.low %v265_v60, %v269_v55  ;;  %v8511_v7 = vcombine.high %v121_v23, %v125_v28  ;;  %v8510_v20 = vcombine.low %v121_v23, %v125_v28  ;;  %v353_v41 = vld [vmem:[#allocation5 + $0x7d8] sm:$0xff] }
 0x349   :  { %7390 = vmatmul.mubr.bf16.vlgmr.msra.gmra.mxu1 %v10040_v16  ;;  %7402 = vmatprep.subr.bf16.mxu0 %v8543_v10  ;;  %v113_v10 = vld [vmem:[#allocation5 + $0x58] sm:$0xff]  ;;  %v8630_v55 = vcombine.low %v241_v13, %v245_v15 }
 0x34a   :  { %7444 = vmatpush1.bf16.msra.mxu1 %v8678_v8  ;;  %7475 = vmatprep.mubr.bf16.mxu1 %v9943_v63  ;;  %v8647_v63 = vcombine.high %v257_v44, %v261_v6  ;;  %v8639_v8 = vcombine.high %v249_v1, %v253_v3  ;;  %v357_v42 = vld [vmem:[#allocation5 + $0x7f8] sm:$0xff]  ;;  %v8622_v6 = vcombine.low %v233_v22, %v237_v26 }
 0x34b   :  { %7445 = vmatprep.subr.bf16.mxu1 %v8671_v11  ;;  %v117_v11 = vld [vmem:[#allocation5 + $0x78] sm:$0xff]  ;;  %v8742_v3 = vcombine.low %v353_v41, %v357_v42 }
 0x34c   :  { %7403 = vmatpush1.bf16.msra.mxu0 %v8542_v17  ;;  %v8503_v17 = vcombine.high %v113_v10, %v117_v11  ;;  %v8502_v60 = vcombine.low %v113_v10, %v117_v11  ;;  %v345_v23 = vld [vmem:[#allocation5 + $0x798] sm:$0xff] }
 0x34d   :  { %7404 = vmatprep.subr.bf16.mxu0 %v8535_v50  ;;  %v105_v50 = vld [vmem:[#allocation5 + $0x18] sm:$0xff] }
 0x34e   :  { %7446 = vmatpush1.bf16.msra.mxu1 %v8670_v31  ;;  %v8631_v31 = vcombine.high %v241_v13, %v245_v15  ;;  %v349_v28 = vld [vmem:[#allocation5 + $0x7b8] sm:$0xff] }
 0x34f   :  { %7447 = vmatprep.subr.bf16.mxu1 %v8663_v45  ;;  %v109_v45 = vld [vmem:[#allocation5 + $0x38] sm:$0xff]  ;;  %v8734_v15 = vcombine.low %v345_v23, %v349_v28 }
 0x350   :  { %7405 = vmatpush1.bf16.msra.mxu0 %v8534_v51  ;;  %v8495_v51 = vcombine.high %v105_v50, %v109_v45  ;;  %v8494_v44 = vcombine.low %v105_v50, %v109_v45  ;;  %v337_v10 = vld [vmem:[#allocation5 + $0x758] sm:$0xff] }
 0x351   :  { %7406 = vmatprep.subr.bf16.mxu0 %v8527_v39  ;;  %v225_v39 = vld [vmem:[#allocation5 + $0x3d8] sm:$0xff] }
 0x352   :  { %7448 = vmatpush1.bf16.msra.mxu1 %v8662_v52  ;;  %v8623_v52 = vcombine.high %v233_v22, %v237_v26  ;;  %v341_v11 = vld [vmem:[#allocation5 + $0x778] sm:$0xff] }
 0x353   :  { %7449 = vmatprep.subr.bf16.mxu1 %v8655_v40  ;;  %v229_v40 = vld [vmem:[#allocation5 + $0x3f8] sm:$0xff]  ;;  %v8726_v26 = vcombine.low %v337_v10, %v341_v11 }
 0x354   :  { %7407 = vmatpush1.bf16.msra.mxu0 %v8526_v56  ;;  %v8615_v56 = vcombine.high %v225_v39, %v229_v40  ;;  %v8614_v1 = vcombine.low %v225_v39, %v229_v40  ;;  %v329_v50 = vld [vmem:[#allocation5 + $0x718] sm:$0xff] }
 0x355   :  { %7408 = vmatprep.subr.bf16.mxu0 %v8519_v38  ;;  %v217_v38 = vld [vmem:[#allocation5 + $0x398] sm:$0xff] }
 0x356   :  { %7450 = vmatpush1.bf16.msra.mxu1 %v8654_v58  ;;  %v8743_v58 = vcombine.high %v353_v41, %v357_v42  ;;  %v333_v45 = vld [vmem:[#allocation5 + $0x738] sm:$0xff] }
 0x357   :  { %7451 = vmatprep.subr.bf16.mxu1 %v8647_v63  ;;  %v221_v63 = vld [vmem:[#allocation5 + $0x3b8] sm:$0xff]  ;;  %v8718_v42 = vcombine.low %v329_v50, %v333_v45 }
 0x358   :  { %7409 = vmatpush1.bf16.msra.mxu0 %v8518_v4  ;;  %v8607_v4 = vcombine.high %v217_v38, %v221_v63  ;;  %v8606_v13 = vcombine.low %v217_v38, %v221_v63  ;;  %v321_v39 = vld [vmem:[#allocation5 + $0x6d8] sm:$0xff] }
 0x359   :  { %7410 = vmatprep.subr.bf16.mxu0 %v8511_v7  ;;  %v209_v7 = vld [vmem:[#allocation5 + $0x358] sm:$0xff] }
 0x35a   :  { %7452 = vmatpush1.bf16.msra.mxu1 %v8646_v5  ;;  %v8735_v5 = vcombine.high %v345_v23, %v349_v28  ;;  %v325_v40 = vld [vmem:[#allocation5 + $0x6f8] sm:$0xff] }
 0x35b   :  { %7453 = vmatprep.subr.bf16.mxu1 %v8639_v8  ;;  %v213_v8 = vld [vmem:[#allocation5 + $0x378] sm:$0xff]  ;;  %v8710_v28 = vcombine.low %v321_v39, %v325_v40 }
 0x35c   :  { %7411 = vmatpush1.bf16.msra.mxu0 %v8510_v20  ;;  %v8599_v20 = vcombine.high %v209_v7, %v213_v8  ;;  %v8598_v22 = vcombine.low %v209_v7, %v213_v8  ;;  %v313_v38 = vld [vmem:[#allocation5 + $0x698] sm:$0xff] }
 0x35d   :  { %7412 = vmatprep.subr.bf16.mxu0 %v8503_v17  ;;  %v201_v17 = vld [vmem:[#allocation5 + $0x318] sm:$0xff] }
 0x35e   :  { %7454 = vmatpush1.bf16.msra.mxu1 %v8638_v54  ;;  %v8727_v54 = vcombine.high %v337_v10, %v341_v11  ;;  %v317_v63 = vld [vmem:[#allocation5 + $0x6b8] sm:$0xff] }
 0x35f   :  { %7455 = vmatprep.subr.bf16.mxu1 %v8631_v31  ;;  %v205_v31 = vld [vmem:[#allocation5 + $0x338] sm:$0xff]  ;;  %v8702_v11 = vcombine.low %v313_v38, %v317_v63 }
 0x360   :  { %7413 = vmatpush1.bf16.msra.mxu0 %v8502_v60  ;;  %v8591_v60 = vcombine.high %v201_v17, %v205_v31  ;;  %v8590_v41 = vcombine.low %v201_v17, %v205_v31  ;;  %v305_v7 = vld [vmem:[#allocation5 + $0x658] sm:$0xff] }
 0x361   :  { %7414 = vmatprep.subr.bf16.mxu0 %v8495_v51  ;;  %v193_v51 = vld [vmem:[#allocation5 + $0x2d8] sm:$0xff] }
 0x362   :  { %7456 = vmatpush1.bf16.msra.mxu1 %v8630_v55  ;;  %v8719_v55 = vcombine.high %v329_v50, %v333_v45  ;;  %v309_v8 = vld [vmem:[#allocation5 + $0x678] sm:$0xff] }
 0x363   :  { %7457 = vmatprep.subr.bf16.mxu1 %v8623_v52  ;;  %v197_v52 = vld [vmem:[#allocation5 + $0x2f8] sm:$0xff]  ;;  %v8694_v45 = vcombine.low %v305_v7, %v309_v8 }
 0x364   :  { %7415 = vmatpush1.bf16.msra.mxu0 %v8494_v44  ;;  %v8583_v44 = vcombine.high %v193_v51, %v197_v52  ;;  %v8582_v23 = vcombine.low %v193_v51, %v197_v52  ;;  %v297_v17 = vld [vmem:[#allocation5 + $0x618] sm:$0xff] }
 0x365   :  { %7416 = vmatprep.subr.bf16.mxu0 %v8615_v56  ;;  %v185_v56 = vld [vmem:[#allocation5 + $0x298] sm:$0xff] }
 0x366   :  { %7458 = vmatpush1.bf16.msra.mxu1 %v8622_v6  ;;  %v8711_v6 = vcombine.high %v321_v39, %v325_v40  ;;  %v301_v31 = vld [vmem:[#allocation5 + $0x638] sm:$0xff] }
 0x367   :  { %7459 = vmatprep.subr.bf16.mxu1 %v8743_v58  ;;  %v189_v58 = vld [vmem:[#allocation5 + $0x2b8] sm:$0xff]  ;;  %v8686_v40 = vcombine.low %v297_v17, %v301_v31 }
 0x368   :  { %7417 = vmatpush2.bf16.msra.mxu0 %v8614_v1  ;;  %v8575_v1 = vcombine.high %v185_v56, %v189_v58  ;;  %v8574_v10 = vcombine.low %v185_v56, %v189_v58  ;;  %v545_v51 = vld [vmem:[#allocation5 + $0xdd8] sm:$0xff] }
 0x369   :  { %7418 = vmatprep.subr.bf16.mxu0 %v8607_v4  ;;  %v177_v4 = vld [vmem:[#allocation5 + $0x258] sm:$0xff] }
 0x36a   :  { %7460 = vmatpush2.bf16.msra.mxu1 %v8742_v3  ;;  %v8703_v3 = vcombine.high %v313_v38, %v317_v63  ;;  %v549_v52 = vld [vmem:[#allocation5 + $0xdf8] sm:$0xff] }
 0x36b   :  { %7461 = vmatprep.subr.bf16.mxu1 %v8735_v5  ;;  %v181_v5 = vld [vmem:[#allocation5 + $0x278] sm:$0xff]  ;;  %v8934_v63 = vcombine.low %v545_v51, %v549_v52 }
 0x36c   :  { %7419 = vmatpush2.bf16.msra.mxu0 %v8606_v13  ;;  %v8567_v13 = vcombine.high %v177_v4, %v181_v5  ;;  %v8566_v50 = vcombine.low %v177_v4, %v181_v5  ;;  %v537_v56 = vld [vmem:[#allocation5 + $0xd98] sm:$0xff] }
 0x36d   :  { %7420 = vmatprep.subr.bf16.mxu0 %v8599_v20  ;;  %v169_v20 = vld [vmem:[#allocation5 + $0x218] sm:$0xff] }
 0x36e   :  { %7462 = vmatpush2.bf16.msra.mxu1 %v8734_v15  ;;  %v8695_v15 = vcombine.high %v305_v7, %v309_v8  ;;  %v541_v58 = vld [vmem:[#allocation5 + $0xdb8] sm:$0xff] }
 0x36f   :  { %7463 = vmatprep.subr.bf16.mxu1 %v8727_v54  ;;  %v173_v54 = vld [vmem:[#allocation5 + $0x238] sm:$0xff]  ;;  %v8926_v8 = vcombine.low %v537_v56, %v541_v58 }
 0x370   :  { %7421 = vmatpush2.bf16.msra.mxu0 %v8598_v22  ;;  %v8559_v22 = vcombine.high %v169_v20, %v173_v54  ;;  %v8558_v39 = vcombine.low %v169_v20, %v173_v54  ;;  %v529_v4 = vld [vmem:[#allocation5 + $0xd58] sm:$0xff] }
 0x371   :  { %7422 = vmatprep.subr.bf16.mxu0 %v8591_v60  ;;  %v417_v60 = vld [vmem:[#allocation5 + $0x9d8] sm:$0xff] }
 0x372   :  { %7464 = vmatpush2.bf16.msra.mxu1 %v8726_v26  ;;  %v8687_v26 = vcombine.high %v297_v17, %v301_v31  ;;  %v533_v5 = vld [vmem:[#allocation5 + $0xd78] sm:$0xff] }
 0x373   :  { %7465 = vmatprep.subr.bf16.mxu1 %v8719_v55  ;;  %v421_v55 = vld [vmem:[#allocation5 + $0x9f8] sm:$0xff] }
 0x374   :  { %7423 = vmatpush2.bf16.msra.mxu0 %v8590_v41  ;;  %v8807_v41 = vcombine.high %v417_v60, %v421_v55  ;;  %v8806_v38 = vcombine.low %v417_v60, %v421_v55  ;;  %v521_v20 = vld [vmem:[#allocation5 + $0xd18] sm:$0xff] }
 0x375   :  { %7424 = vmatprep.subr.bf16.mxu0 %v8583_v44  ;;  %v409_v44 = vld [vmem:[#allocation5 + $0x998] sm:$0xff] }
 0x376   :  { %7466 = vmatpush2.bf16.msra.mxu1 %v8718_v42  ;;  %v8935_v42 = vcombine.high %v545_v51, %v549_v52  ;;  %v525_v54 = vld [vmem:[#allocation5 + $0xd38] sm:$0xff] }
 0x377   :  { %7467 = vmatprep.subr.bf16.mxu1 %v8711_v6  ;;  %v413_v6 = vld [vmem:[#allocation5 + $0x9b8] sm:$0xff]  ;;  %v8911_v31 = vcombine.high %v521_v20, %v525_v54 }
 0x378   :  { %7425 = vmatpush2.bf16.msra.mxu0 %v8582_v23  ;;  %v8799_v23 = vcombine.high %v409_v44, %v413_v6  ;;  %v8798_v7 = vcombine.low %v409_v44, %v413_v6  ;;  %v377_v51 = vld [vmem:[#allocation5 + $0x898] sm:$0xff] }
 0x379   :  { %7426 = vmatprep.subr.bf16.mxu0 %v8575_v1  ;;  %v401_v1 = vld [vmem:[#allocation5 + $0x958] sm:$0xff] }
 0x37a   :  { %7468 = vmatpush2.bf16.msra.mxu1 %v8710_v28  ;;  %v8927_v28 = vcombine.high %v537_v56, %v541_v58  ;;  %v381_v52 = vld [vmem:[#allocation5 + $0x8b8] sm:$0xff] }
 0x37b   :  { %7469 = vmatprep.subr.bf16.mxu1 %v8703_v3  ;;  %v405_v3 = vld [vmem:[#allocation5 + $0x978] sm:$0xff]  ;;  %v8767_v44 = vcombine.high %v377_v51, %v381_v52 }
 0x37c   :  { %7427 = vmatpush2.bf16.msra.mxu0 %v8574_v10  ;;  %v8791_v10 = vcombine.high %v401_v1, %v405_v3  ;;  %v369_v56 = vld [vmem:[#allocation5 + $0x858] sm:$0xff] }
 0x37d   :  { %7428 = vmatprep.subr.bf16.mxu0 %v8567_v13  ;;  %v393_v13 = vld [vmem:[#allocation5 + $0x918] sm:$0xff] }
 0x37e   :  { %7470 = vmatpush2.bf16.msra.mxu1 %v8702_v11  ;;  %v8919_v11 = vcombine.high %v529_v4, %v533_v5  ;;  %v373_v58 = vld [vmem:[#allocation5 + $0x878] sm:$0xff] }
 0x37f   :  { %7471 = vmatprep.subr.bf16.mxu1 %v8695_v15  ;;  %v397_v15 = vld [vmem:[#allocation5 + $0x938] sm:$0xff] }
 0x380   :  { %7429 = vmatpush2.bf16.msra.mxu0 %v8566_v50  ;;  %v8783_v17 = vcombine.high %v393_v13, %v397_v15  ;;  %v385_v50 = vld [vmem:[#allocation5 + $0x8d8] sm:$0xff]  ;;  %v8782_v60 = vcombine.low %v393_v13, %v397_v15 }
 0x381   :  { %7430 = vmatprep.subr.bf16.mxu0 %v8559_v22  ;;  %v513_v22 = vld [vmem:[#allocation5 + $0xcd8] sm:$0xff] }
 0x382   :  { %7472 = vmatpush2.bf16.msra.mxu1 %v8694_v45  ;;  %v389_v45 = vld [vmem:[#allocation5 + $0x8f8] sm:$0xff] }
 0x383   :  { %7473 = vmatprep.subr.bf16.mxu1 %v8687_v26  ;;  %v517_v26 = vld [vmem:[#allocation5 + $0xcf8] sm:$0xff]  ;;  %v8775_v55 = vcombine.high %v385_v50, %v389_v45 }
 0x384   :  { %7431 = vmatpush2.bf16.msra.mxu0 %v8558_v39  ;;  %v505_v39 = vld [vmem:[#allocation5 + $0xc98] sm:$0xff] }
 0x385   :  { %7486 = vmatprep.subr.bf16.mxu0 %v8807_v41  ;;  %v8774_v41 = vcombine.low %v385_v50, %v389_v45 }
 0x386   :  { %7474 = vmatpush2.bf16.msra.mxu1 %v8686_v40  ;;  %v509_v40 = vld [vmem:[#allocation5 + $0xcb8] sm:$0xff] }
 0x387   :  { %7529 = vmatprep.subr.bf16.mxu1 %v8935_v42  ;;  %7433 = vmatmul.mubr.bf16.vlgmr.msra.gmra.mxu0 %v9949_v21  ;;  %v8790_v21 = vcombine.low %v401_v1, %v405_v3  ;;  %v8902_v42 = vcombine.low %v513_v22, %v517_v26  ;;  %v8895_v6 = vcombine.high %v505_v39, %v509_v40 }
 0x388   :  { %7487 = vmatpush1.bf16.msra.mxu0 %v8806_v38  ;;  %7518 = vmatprep.mubr.bf16.mxu0 %v9965_v32  ;;  %v8910_v32 = vcombine.low %v521_v20, %v525_v54  ;;  %v497_v38 = vld [vmem:[#allocation5 + $0xc58] sm:$0xff]  ;;  %v8759_v1 = vcombine.high %v369_v56, %v373_v58 }
 0x389   :  { %7476 = vmatmul.mubr.bf16.vlgmr.msra.gmra.mxu1 %v9957_v25  ;;  %7488 = vmatprep.subr.bf16.mxu0 %v8799_v23  ;;  %v8918_v25 = vcombine.low %v529_v4, %v533_v5  ;;  %v8766_v23 = vcombine.low %v377_v51, %v381_v52  ;;  %v361_v4 = vld [vmem:[#allocation5 + $0x818] sm:$0xff] }
 0x38a   :  { %7530 = vmatpush1.bf16.msra.mxu1 %v8934_v63  ;;  %7561 = vmatprep.mubr.bf16.mxu1 %v9970_v33  ;;  %v8903_v33 = vcombine.high %v513_v22, %v517_v26  ;;  %v501_v63 = vld [vmem:[#allocation5 + $0xc78] sm:$0xff] }
 0x38b   :  { %7531 = vmatprep.subr.bf16.mxu1 %v8927_v28  ;;  %v8894_v28 = vcombine.low %v505_v39, %v509_v40  ;;  %v8887_v3 = vcombine.high %v497_v38, %v501_v63  ;;  %v365_v5 = vld [vmem:[#allocation5 + $0x838] sm:$0xff] }
 0x38c   :  { %7489 = vmatpush1.bf16.msra.mxu0 %v8798_v7  ;;  %v489_v7 = vld [vmem:[#allocation5 + $0xc18] sm:$0xff]  ;;  %v8751_v13 = vcombine.high %v361_v4, %v365_v5 }
 0x38d   :  { %7490 = vmatprep.subr.bf16.mxu0 %v8791_v10  ;;  %v8758_v10 = vcombine.low %v369_v56, %v373_v58  ;;  %v481_v20 = vld [vmem:[#allocation5 + $0xbd8] sm:$0xff] }
 0x38e   :  { %7532 = vmatpush1.bf16.msra.mxu1 %v8926_v8  ;;  %v493_v8 = vld [vmem:[#allocation5 + $0xc38] sm:$0xff] }
 0x38f   :  { %7533 = vmatprep.subr.bf16.mxu1 %v8919_v11  ;;  %v8886_v11 = vcombine.low %v497_v38, %v501_v63  ;;  %v8879_v15 = vcombine.high %v489_v7, %v493_v8  ;;  %v485_v54 = vld [vmem:[#allocation5 + $0xbf8] sm:$0xff] }
 0x390   :  { %7491 = vmatpush1.bf16.msra.mxu0 %v8790_v21  ;;  %v609_v21 = vld [vmem:[#allocation5 + $0xfd8] sm:$0xff]  ;;  %v8871_v50 = vcombine.high %v481_v20, %v485_v54 }
 0x391   :  { %7492 = vmatprep.subr.bf16.mxu0 %v8783_v17  ;;  %v8750_v17 = vcombine.low %v361_v4, %v365_v5  ;;  %v473_v22 = vld [vmem:[#allocation5 + $0xb98] sm:$0xff] }
 0x392   :  { %7534 = vmatpush1.bf16.msra.mxu1 %v8918_v25  ;;  %v613_v25 = vld [vmem:[#allocation5 + $0xff8] sm:$0xff] }
 0x393   :  { %7535 = vmatprep.subr.bf16.mxu1 %v8911_v31  ;;  %v8878_v31 = vcombine.low %v489_v7, %v493_v8  ;;  %v8999_v45 = vcombine.high %v609_v21, %v613_v25  ;;  %v477_v26 = vld [vmem:[#allocation5 + $0xbb8] sm:$0xff] }
 0x394   :  { %7493 = vmatpush1.bf16.msra.mxu0 %v8782_v60  ;;  %v601_v60 = vld [vmem:[#allocation5 + $0xf98] sm:$0xff]  ;;  %v8863_v51 = vcombine.high %v473_v22, %v477_v26 }
 0x395   :  { %7494 = vmatprep.subr.bf16.mxu0 %v8775_v55  ;;  %v8870_v55 = vcombine.low %v481_v20, %v485_v54  ;;  %v465_v39 = vld [vmem:[#allocation5 + $0xb58] sm:$0xff] }
 0x396   :  { %7536 = vmatpush1.bf16.msra.mxu1 %v8910_v32  ;;  %v605_v32 = vld [vmem:[#allocation5 + $0xfb8] sm:$0xff] }
 0x397   :  { %7537 = vmatprep.subr.bf16.mxu1 %v8903_v33  ;;  %v8998_v33 = vcombine.low %v609_v21, %v613_v25  ;;  %v8991_v52 = vcombine.high %v601_v60, %v605_v32  ;;  %v469_v40 = vld [vmem:[#allocation5 + $0xb78] sm:$0xff] }
 0x398   :  { %7495 = vmatpush1.bf16.msra.mxu0 %v8774_v41  ;;  %v593_v41 = vld [vmem:[#allocation5 + $0xf58] sm:$0xff]  ;;  %v8855_v56 = vcombine.high %v465_v39, %v469_v40 }
 0x399   :  { %7496 = vmatprep.subr.bf16.mxu0 %v8767_v44  ;;  %v8862_v44 = vcombine.low %v473_v22, %v477_v26  ;;  %v457_v38 = vld [vmem:[#allocation5 + $0xb18] sm:$0xff] }
 0x39a   :  { %7538 = vmatpush1.bf16.msra.mxu1 %v8902_v42  ;;  %v597_v42 = vld [vmem:[#allocation5 + $0xf78] sm:$0xff] }
 0x39b   :  { %7539 = vmatprep.subr.bf16.mxu1 %v8895_v6  ;;  %v8990_v6 = vcombine.low %v601_v60, %v605_v32  ;;  %v8983_v58 = vcombine.high %v593_v41, %v597_v42  ;;  %v461_v63 = vld [vmem:[#allocation5 + $0xb38] sm:$0xff] }
 0x39c   :  { %7497 = vmatpush1.bf16.msra.mxu0 %v8766_v23  ;;  %v585_v23 = vld [vmem:[#allocation5 + $0xf18] sm:$0xff]  ;;  %v8847_v4 = vcombine.high %v457_v38, %v461_v63 }
 0x39d   :  { %7498 = vmatprep.subr.bf16.mxu0 %v8759_v1  ;;  %v8854_v1 = vcombine.low %v465_v39, %v469_v40  ;;  %v449_v7 = vld [vmem:[#allocation5 + $0xad8] sm:$0xff] }
 0x39e   :  { %7540 = vmatpush1.bf16.msra.mxu1 %v8894_v28  ;;  %v589_v28 = vld [vmem:[#allocation5 + $0xf38] sm:$0xff] }
 0x39f   :  { %7541 = vmatprep.subr.bf16.mxu1 %v8887_v3  ;;  %v8982_v3 = vcombine.low %v593_v41, %v597_v42  ;;  %v8975_v5 = vcombine.high %v585_v23, %v589_v28  ;;  %v453_v8 = vld [vmem:[#allocation5 + $0xaf8] sm:$0xff] }
 0x3a0   :  { %7499 = vmatpush1.bf16.msra.mxu0 %v8758_v10  ;;  %v577_v10 = vld [vmem:[#allocation5 + $0xed8] sm:$0xff]  ;;  %v8839_v20 = vcombine.high %v449_v7, %v453_v8 }
 0x3a1   :  { %7500 = vmatprep.subr.bf16.mxu0 %v8751_v13  ;;  %v8846_v13 = vcombine.low %v457_v38, %v461_v63  ;;  %v441_v21 = vld [vmem:[#allocation5 + $0xa98] sm:$0xff] }
 0x3a2   :  { %7542 = vmatpush1.bf16.msra.mxu1 %v8886_v11  ;;  %v581_v11 = vld [vmem:[#allocation5 + $0xef8] sm:$0xff] }
 0x3a3   :  { %7543 = vmatprep.subr.bf16.mxu1 %v8879_v15  ;;  %v8974_v15 = vcombine.low %v585_v23, %v589_v28  ;;  %v8967_v54 = vcombine.high %v577_v10, %v581_v11  ;;  %v445_v25 = vld [vmem:[#allocation5 + $0xab8] sm:$0xff] }
 0x3a4   :  { %7501 = vmatpush1.bf16.msra.mxu0 %v8750_v17  ;;  %v569_v17 = vld [vmem:[#allocation5 + $0xe98] sm:$0xff]  ;;  %v8831_v22 = vcombine.high %v441_v21, %v445_v25 }
 0x3a5   :  { %7502 = vmatprep.subr.bf16.mxu0 %v8871_v50  ;;  %v8838_v50 = vcombine.low %v449_v7, %v453_v8  ;;  %v433_v60 = vld [vmem:[#allocation5 + $0xa58] sm:$0xff] }
 0x3a6   :  { %7544 = vmatpush1.bf16.msra.mxu1 %v8878_v31  ;;  %v573_v31 = vld [vmem:[#allocation5 + $0xeb8] sm:$0xff] }
 0x3a7   :  { %7545 = vmatprep.subr.bf16.mxu1 %v8999_v45  ;;  %v8966_v45 = vcombine.low %v577_v10, %v581_v11  ;;  %v8959_v26 = vcombine.high %v569_v17, %v573_v31  ;;  %v437_v32 = vld [vmem:[#allocation5 + $0xa78] sm:$0xff] }
 0x3a8   :  { %7503 = vmatpush2.bf16.msra.mxu0 %v8870_v55  ;;  %v561_v55 = vld [vmem:[#allocation5 + $0xe58] sm:$0xff]  ;;  %v8823_v39 = vcombine.high %v433_v60, %v437_v32 }
 0x3a9   :  { %7504 = vmatprep.subr.bf16.mxu0 %v8863_v51  ;;  %v8830_v51 = vcombine.low %v441_v21, %v445_v25  ;;  %v425_v41 = vld [vmem:[#allocation5 + $0xa18] sm:$0xff] }
 0x3aa   :  { %7546 = vmatpush2.bf16.msra.mxu1 %v8998_v33  ;;  %v565_v33 = vld [vmem:[#allocation5 + $0xe78] sm:$0xff] }
 0x3ab   :  { %7547 = vmatprep.subr.bf16.mxu1 %v8991_v52  ;;  %v8958_v52 = vcombine.low %v569_v17, %v573_v31  ;;  %v8951_v40 = vcombine.high %v561_v55, %v565_v33  ;;  %v429_v42 = vld [vmem:[#allocation5 + $0xa38] sm:$0xff] }
 0x3ac   :  { %7505 = vmatpush2.bf16.msra.mxu0 %v8862_v44  ;;  %v553_v44 = vld [vmem:[#allocation5 + $0xe18] sm:$0xff]  ;;  %v8815_v38 = vcombine.high %v425_v41, %v429_v42 }
 0x3ad   :  { %7506 = vmatprep.subr.bf16.mxu0 %v8855_v56  ;;  %v8822_v56 = vcombine.low %v433_v60, %v437_v32  ;;  %v673_v23 = vld [vmem:[#allocation5 + $0x11d8] sm:$0xff] }
 0x3ae   :  { %7548 = vmatpush2.bf16.msra.mxu1 %v8990_v6  ;;  %v557_v6 = vld [vmem:[#allocation5 + $0xe38] sm:$0xff] }
 0x3af   :  { %7549 = vmatprep.subr.bf16.mxu1 %v8983_v58  ;;  %v8950_v58 = vcombine.low %v561_v55, %v565_v33  ;;  %v8943_v63 = vcombine.high %v553_v44, %v557_v6  ;;  %v677_v28 = vld [vmem:[#allocation5 + $0x11f8] sm:$0xff] }
 0x3b0   :  { %7507 = vmatpush2.bf16.msra.mxu0 %v8854_v1  ;;  %v801_v1 = vld [vmem:[#allocation5 + $0x15d8] sm:$0xff]  ;;  %v9063_v7 = vcombine.high %v673_v23, %v677_v28 }
 0x3b1   :  { %7508 = vmatprep.subr.bf16.mxu0 %v8847_v4  ;;  %v8814_v4 = vcombine.low %v425_v41, %v429_v42  ;;  %v665_v10 = vld [vmem:[#allocation5 + $0x1198] sm:$0xff] }
 0x3b2   :  { %7550 = vmatpush2.bf16.msra.mxu1 %v8982_v3  ;;  %v805_v3 = vld [vmem:[#allocation5 + $0x15f8] sm:$0xff] }
 0x3b3   :  { %7551 = vmatprep.subr.bf16.mxu1 %v8975_v5  ;;  %v8942_v5 = vcombine.low %v553_v44, %v557_v6  ;;  %v9191_v8 = vcombine.high %v801_v1, %v805_v3  ;;  %v669_v11 = vld [vmem:[#allocation5 + $0x11b8] sm:$0xff] }
 0x3b4   :  { %7509 = vmatpush2.bf16.msra.mxu0 %v8846_v13  ;;  %v793_v13 = vld [vmem:[#allocation5 + $0x1598] sm:$0xff]  ;;  %v9055_v21 = vcombine.high %v665_v10, %v669_v11 }
 0x3b5   :  { %7510 = vmatprep.subr.bf16.mxu0 %v8839_v20  ;;  %v9062_v20 = vcombine.low %v673_v23, %v677_v28  ;;  %v657_v17 = vld [vmem:[#allocation5 + $0x1158] sm:$0xff] }
 0x3b6   :  { %7552 = vmatpush2.bf16.msra.mxu1 %v8974_v15  ;;  %v797_v15 = vld [vmem:[#allocation5 + $0x15b8] sm:$0xff] }
 0x3b7   :  { %7553 = vmatprep.subr.bf16.mxu1 %v8967_v54  ;;  %v9190_v54 = vcombine.low %v801_v1, %v805_v3  ;;  %v9183_v25 = vcombine.high %v793_v13, %v797_v15  ;;  %v661_v31 = vld [vmem:[#allocation5 + $0x1178] sm:$0xff] }
 0x3b8   :  { %7511 = vmatpush2.bf16.msra.mxu0 %v8838_v50  ;;  %v785_v50 = vld [vmem:[#allocation5 + $0x1558] sm:$0xff]  ;;  %v9047_v60 = vcombine.high %v657_v17, %v661_v31 }
 0x3b9   :  { %7512 = vmatprep.subr.bf16.mxu0 %v8831_v22  ;;  %v9054_v22 = vcombine.low %v665_v10, %v669_v11  ;;  %v649_v55 = vld [vmem:[#allocation5 + $0x1118] sm:$0xff] }
 0x3ba   :  { %7554 = vmatpush2.bf16.msra.mxu1 %v8966_v45  ;;  %v789_v45 = vld [vmem:[#allocation5 + $0x1578] sm:$0xff] }
 0x3bb   :  { %7555 = vmatprep.subr.bf16.mxu1 %v8959_v26  ;;  %v9182_v26 = vcombine.low %v793_v13, %v797_v15  ;;  %v9175_v32 = vcombine.high %v785_v50, %v789_v45  ;;  %v653_v33 = vld [vmem:[#allocation5 + $0x1138] sm:$0xff] }
 0x3bc   :  { %7513 = vmatpush2.bf16.msra.mxu0 %v8830_v51  ;;  %v777_v51 = vld [vmem:[#allocation5 + $0x1518] sm:$0xff] }
 0x3bd   :  { %7514 = vmatprep.subr.bf16.mxu0 %v8823_v39  ;;  %v9039_v39 = vcombine.high %v649_v55, %v653_v33  ;;  %v641_v41 = vld [vmem:[#allocation5 + $0x10d8] sm:$0xff] }
 0x3be   :  { %7556 = vmatpush2.bf16.msra.mxu1 %v8958_v52  ;;  %v781_v52 = vld [vmem:[#allocation5 + $0x1538] sm:$0xff] }
 0x3bf   :  { %7557 = vmatprep.subr.bf16.mxu1 %v8951_v40  ;;  %v9167_v40 = vcombine.high %v777_v51, %v781_v52  ;;  %v645_v42 = vld [vmem:[#allocation5 + $0x10f8] sm:$0xff] }
 0x3c0   :  { %7515 = vmatpush2.bf16.msra.mxu0 %v8822_v56  ;;  %v769_v44 = vld [vmem:[#allocation5 + $0x14d8] sm:$0xff]  ;;  %v9038_v56 = vcombine.low %v649_v55, %v653_v33  ;;  %v9030_v1 = vcombine.low %v641_v41, %v645_v42 }
 0x3c1   :  { %7516 = vmatprep.subr.bf16.mxu0 %v8815_v38  ;;  %v773_v6 = vld [vmem:[#allocation5 + $0x14f8] sm:$0xff] }
 0x3c2   :  { %7558 = vmatpush2.bf16.msra.mxu1 %v8950_v58  ;;  %v9031_v58 = vcombine.high %v641_v41, %v645_v42  ;;  %v633_v38 = vld [vmem:[#allocation5 + $0x1098] sm:$0xff]  ;;  %v9158_v3 = vcombine.low %v769_v44, %v773_v6 }
 0x3c3   :  { %7559 = vmatprep.subr.bf16.mxu1 %v8943_v63  ;;  %v637_v63 = vld [vmem:[#allocation5 + $0x10b8] sm:$0xff] }
 0x3c4   :  { %7517 = vmatpush2.bf16.msra.mxu0 %v8814_v4  ;;  %v761_v23 = vld [vmem:[#allocation5 + $0x1498] sm:$0xff]  ;;  %v9023_v4 = vcombine.high %v633_v38, %v637_v63  ;;  %v9022_v13 = vcombine.low %v633_v38, %v637_v63 }
 0x3c5   :  { %7572 = vmatprep.subr.bf16.mxu0 %v9063_v7  ;;  %v765_v28 = vld [vmem:[#allocation5 + $0x14b8] sm:$0xff] }
 0x3c6   :  { %7560 = vmatpush2.bf16.msra.mxu1 %v8942_v5  ;;  %v9151_v5 = vcombine.high %v761_v23, %v765_v28  ;;  %v625_v7 = vld [vmem:[#allocation5 + $0x1058] sm:$0xff]  ;;  %v9150_v15 = vcombine.low %v761_v23, %v765_v28  ;;  %v10134_v23 = vpop.f32.mrf.mxu0 }
 0x3c7   :  { %7615 = vmatprep.subr.bf16.mxu1 %v9191_v8  ;;  %7519 = vmatmul.mubr.bf16.vlgmr.msra.gmra.mxu0 %v9981_v48  ;;  %v9046_v48 = vcombine.low %v657_v17, %v661_v31  ;;  %v629_v8 = vld [vmem:[#allocation5 + $0x1078] sm:$0xff] }
 0x3c8   :  { %7573 = vmatpush1.bf16.msra.mxu0 %v9062_v20  ;;  %7604 = vmatprep.mubr.bf16.mxu0 %v9993_v0  ;;  %v9166_v0 = vcombine.low %v777_v51, %v781_v52  ;;  %v753_v10 = vld [vmem:[#allocation5 + $0x1458] sm:$0xff]  ;;  %v9015_v20 = vcombine.high %v625_v7, %v629_v8 }
 0x3c9   :  { %7562 = vmatmul.mubr.bf16.vlgmr.msra.gmra.mxu1 %v9985_v49  ;;  %7574 = vmatprep.subr.bf16.mxu0 %v9055_v21  ;;  %v9174_v49 = vcombine.low %v785_v50, %v789_v45  ;;  %v757_v11 = vld [vmem:[#allocation5 + $0x1478] sm:$0xff]  ;;  %v9014_v50 = vcombine.low %v625_v7, %v629_v8 }
 0x3ca   :  { %7616 = vmatpush1.bf16.msra.mxu1 %v9190_v54  ;;  %7647 = vmatprep.mubr.bf16.mxu1 %v9998_v27  ;;  %v9159_v27 = vcombine.high %v769_v44, %v773_v6  ;;  %v9143_v54 = vcombine.high %v753_v10, %v757_v11  ;;  %v617_v21 = vld [vmem:[#allocation5 + $0x1018] sm:$0xff]  ;;  %v9142_v45 = vcombine.low %v753_v10, %v757_v11 }
 0x3cb   :  { %7617 = vmatprep.subr.bf16.mxu1 %v9183_v25  ;;  %v621_v25 = vld [vmem:[#allocation5 + $0x1038] sm:$0xff] }
 0x3cc   :  { %7575 = vmatpush1.bf16.msra.mxu0 %v9054_v22  ;;  %v745_v17 = vld [vmem:[#allocation5 + $0x1418] sm:$0xff]  ;;  %v9007_v22 = vcombine.high %v617_v21, %v621_v25  ;;  %v9006_v51 = vcombine.low %v617_v21, %v621_v25 }
 0x3cd   :  { %7576 = vmatprep.subr.bf16.mxu0 %v9047_v60  ;;  %v749_v31 = vld [vmem:[#allocation5 + $0x1438] sm:$0xff] }
 0x3ce   :  { %7618 = vmatpush1.bf16.msra.mxu1 %v9182_v26  ;;  %v9135_v26 = vcombine.high %v745_v17, %v749_v31  ;;  %v737_v60 = vld [vmem:[#allocation5 + $0x13d8] sm:$0xff]  ;;  %v9134_v52 = vcombine.low %v745_v17, %v749_v31 }
 0x3cf   :  { %7619 = vmatprep.subr.bf16.mxu1 %v9175_v32  ;;  %v741_v32 = vld [vmem:[#allocation5 + $0x13f8] sm:$0xff] }
 0x3d0   :  { %7577 = vmatpush1.bf16.msra.mxu0 %v9046_v48  ;;  %v865_v55 = vld [vmem:[#allocation5 + $0x17d8] sm:$0xff]  ;;  %v9127_v48 = vcombine.high %v737_v60, %v741_v32  ;;  %v9126_v44 = vcombine.low %v737_v60, %v741_v32 }
 0x3d1   :  { %7578 = vmatprep.subr.bf16.mxu0 %v9039_v39  ;;  %v869_v33 = vld [vmem:[#allocation5 + $0x17f8] sm:$0xff] }
 0x3d2   :  { %7620 = vmatpush1.bf16.msra.mxu1 %v9174_v49  ;;  %v9255_v49 = vcombine.high %v865_v55, %v869_v33  ;;  %v729_v39 = vld [vmem:[#allocation5 + $0x1398] sm:$0xff]  ;;  %v9254_v6 = vcombine.low %v865_v55, %v869_v33 }
 0x3d3   :  { %7621 = vmatprep.subr.bf16.mxu1 %v9167_v40  ;;  %v733_v40 = vld [vmem:[#allocation5 + $0x13b8] sm:$0xff] }
 0x3d4   :  { %7579 = vmatpush1.bf16.msra.mxu0 %v9038_v56  ;;  %v857_v41 = vld [vmem:[#allocation5 + $0x1798] sm:$0xff]  ;;  %v9119_v56 = vcombine.high %v729_v39, %v733_v40  ;;  %v9118_v28 = vcombine.low %v729_v39, %v733_v40 }
 0x3d5   :  { %7580 = vmatprep.subr.bf16.mxu0 %v9031_v58  ;;  %v861_v42 = vld [vmem:[#allocation5 + $0x17b8] sm:$0xff] }
 0x3d6   :  { %7622 = vmatpush1.bf16.msra.mxu1 %v9166_v0  ;;  %v9247_v0 = vcombine.high %v857_v41, %v861_v42  ;;  %v721_v58 = vld [vmem:[#allocation5 + $0x1358] sm:$0xff] }
 0x3d7   :  { %7623 = vmatprep.subr.bf16.mxu1 %v9159_v27  ;;  %v725_v27 = vld [vmem:[#allocation5 + $0x1378] sm:$0xff] }
 0x3d8   :  { %7581 = vmatpush1.bf16.msra.mxu0 %v9030_v1  ;;  %v849_v38 = vld [vmem:[#allocation5 + $0x1758] sm:$0xff]  ;;  %v9246_v1 = vcombine.low %v857_v41, %v861_v42 }
 0x3d9   :  { %7582 = vmatprep.subr.bf16.mxu0 %v9023_v4  ;;  %v853_v63 = vld [vmem:[#allocation5 + $0x1778] sm:$0xff]  ;;  %v10136_v4 = vpop.f32.mrf.mxu0 }
 0x3da   :  { %7624 = vmatpush1.bf16.msra.mxu1 %v9158_v3  ;;  %v9111_v3 = vcombine.high %v721_v58, %v725_v27  ;;  %v713_v7 = vld [vmem:[#allocation5 + $0x1318] sm:$0xff] }
 0x3db   :  { %7625 = vmatprep.subr.bf16.mxu1 %v9151_v5  ;;  %v9239_v5 = vcombine.high %v849_v38, %v853_v63  ;;  %v717_v8 = vld [vmem:[#allocation5 + $0x1338] sm:$0xff]  ;;  %v10140_v21 = vpop.f32.mrf.mxu0 }
 0x3dc   :  { %7583 = vmatpush1.bf16.msra.mxu0 %v9022_v13  ;;  %v841_v10 = vld [vmem:[#allocation5 + $0x1718] sm:$0xff]  ;;  %v9110_v13 = vcombine.low %v721_v58, %v725_v27 }
 0x3dd   :  { %7584 = vmatprep.subr.bf16.mxu0 %v9015_v20  ;;  %v845_v11 = vld [vmem:[#allocation5 + $0x1738] sm:$0xff]  ;;  %v9103_v20 = vcombine.high %v713_v7, %v717_v8  ;;  %v10144_v55 = vpop.f32.mrf.mxu0 }
 0x3de   :  { %7626 = vmatpush1.bf16.msra.mxu1 %v9150_v15  ;;  %v9238_v15 = vcombine.low %v849_v38, %v853_v63  ;;  %v9231_v25 = vcombine.high %v841_v10, %v845_v11  ;;  %v705_v17 = vld [vmem:[#allocation5 + $0x12d8] sm:$0xff]  ;;  %v9230_v60 = vcombine.low %v841_v10, %v845_v11 }
 0x3df   :  { %7627 = vmatprep.subr.bf16.mxu1 %v9143_v54  ;;  %v10138_v54 = vpop.f32.mrf.mxu1  ;;  %v709_v31 = vld [vmem:[#allocation5 + $0x12f8] sm:$0xff] }
 0x3e0   :  { %7585 = vmatpush1.bf16.msra.mxu0 %v9014_v50  ;;  %v833_v50 = vld [vmem:[#allocation5 + $0x16d8] sm:$0xff]  ;;  %v9095_v32 = vcombine.high %v705_v17, %v709_v31  ;;  %v9094_v40 = vcombine.low %v705_v17, %v709_v31 }
 0x3e1   :  { %7586 = vmatprep.subr.bf16.mxu0 %v9007_v22  ;;  %v10142_v22 = vpop.f32.mrf.mxu1  ;;  %v817_v58 = vld [vmem:[#allocation5 + $0x1658] sm:$0xff] }
 0x3e2   :  { %7628 = vmatpush1.bf16.msra.mxu1 %v9142_v45  ;;  %v837_v45 = vld [vmem:[#allocation5 + $0x16f8] sm:$0xff]  ;;  %10361 = vst [vmem:[#allocation17_spill] sm:$0xff] %v10142_v22 }
 0x3e3   :  { %7629 = vmatprep.subr.bf16.mxu1 %v9135_v26  ;;  %v9102_v26 = vcombine.low %v713_v7, %v717_v8  ;;  %v9223_v33 = vcombine.high %v833_v50, %v837_v45  ;;  %v10146_v39 = vpop.f32.mrf.mxu1  ;;  %v9222_v41 = vcombine.low %v833_v50, %v837_v45  ;;  %v821_v27 = vld [vmem:[#allocation5 + $0x1678] sm:$0xff] }
 0x3e4   :  { %7587 = vmatpush1.bf16.msra.mxu0 %v9006_v51  ;;  %v697_v51 = vld [vmem:[#allocation5 + $0x1298] sm:$0xff] }
 0x3e5   :  { %7588 = vmatprep.subr.bf16.mxu0 %v9127_v48  ;;  %v825_v48 = vld [vmem:[#allocation5 + $0x1698] sm:$0xff]  ;;  %v10150_v38 = vpop.f32.mrf.mxu1 }
 0x3e6   :  { %7630 = vmatpush1.bf16.msra.mxu1 %v9134_v52  ;;  %v701_v52 = vld [vmem:[#allocation5 + $0x12b8] sm:$0xff]  ;;  %10362 = vst [vmem:[#allocation18_spill] sm:$0xff] %v10150_v38 }
 0x3e7   :  { %7631 = vmatprep.subr.bf16.mxu1 %v9255_v49  ;;  %v829_v49 = vld [vmem:[#allocation5 + $0x16b8] sm:$0xff]  ;;  %v9087_v42 = vcombine.high %v697_v51, %v701_v52 }
 0x3e8   :  { %7589 = vmatpush2.bf16.msra.mxu0 %v9126_v44  ;;  %v10148_v44 = vpop.f32.mrf.mxu0  ;;  %v681_v7 = vld [vmem:[#allocation5 + $0x1218] sm:$0xff] }
 0x3e9   :  { %7590 = vmatprep.subr.bf16.mxu0 %v9119_v56  ;;  %v689_v56 = vld [vmem:[#allocation5 + $0x1258] sm:$0xff] }
 0x3ea   :  { %7632 = vmatpush2.bf16.msra.mxu1 %v9254_v6  ;;  %v9215_v6 = vcombine.high %v825_v48, %v829_v49  ;;  %v10152_v63 = vpop.f32.mrf.mxu0  ;;  %v685_v8 = vld [vmem:[#allocation5 + $0x1238] sm:$0xff] }
 0x3eb   :  { %7633 = vmatprep.subr.bf16.mxu1 %v9247_v0  ;;  %v693_v0 = vld [vmem:[#allocation5 + $0x1278] sm:$0xff]  ;;  %10363 = vst [vmem:[#allocation19_spill] sm:$0xff] %v10152_v63  ;;  %v9071_v17 = vcombine.high %v681_v7, %v685_v8 }
 0x3ec   :  { %7591 = vmatpush2.bf16.msra.mxu0 %v9118_v28  ;;  %v9086_v28 = vcombine.low %v697_v51, %v701_v52  ;;  %v809_v10 = vld [vmem:[#allocation5 + $0x1618] sm:$0xff]  ;;  %v9070_v51 = vcombine.low %v681_v7, %v685_v8 }
 0x3ed   :  { %7592 = vmatprep.subr.bf16.mxu0 %v9111_v3  ;;  %v9079_v3 = vcombine.high %v689_v56, %v693_v0  ;;  %v813_v11 = vld [vmem:[#allocation5 + $0x1638] sm:$0xff] }
 0x3ee   :  { %7634 = vmatpush2.bf16.msra.mxu1 %v9246_v1  ;;  %v9214_v1 = vcombine.low %v825_v48, %v829_v49  ;;  %v9199_v50 = vcombine.high %v809_v10, %v813_v11  ;;  %v929_v45 = vld [vmem:[#allocation5 + $0x19d8] sm:$0xff]  ;;  %v9198_v52 = vcombine.low %v809_v10, %v813_v11 }
 0x3ef   :  { %7635 = vmatprep.subr.bf16.mxu1 %v9239_v5  ;;  %v9207_v5 = vcombine.high %v817_v58, %v821_v27  ;;  %v913_v7 = vld [vmem:[#allocation5 + $0x1958] sm:$0xff] }
 0x3f0   :  { %7593 = vmatpush2.bf16.msra.mxu0 %v9110_v13  ;;  %v10154_v13 = vpop.f32.mrf.mxu1  ;;  %v917_v8 = vld [vmem:[#allocation5 + $0x1978] sm:$0xff] }
 0x3f1   :  { %7594 = vmatprep.subr.bf16.mxu0 %v9103_v20  ;;  %v9078_v20 = vcombine.low %v689_v56, %v693_v0  ;;  %v1053_v56 = vld [vmem:[#allocation5 + $0x1db8] sm:$0xff] }
 0x3f2   :  { %7636 = vmatpush2.bf16.msra.mxu1 %v9238_v15  ;;  %v10156_v15 = vpop.f32.mrf.mxu0  ;;  %v10158_v31 = vpop.f32.mrf.mxu1  ;;  %v1041_v10 = vld [vmem:[#allocation5 + $0x1d58] sm:$0xff] }
 0x3f3   :  { %7637 = vmatprep.subr.bf16.mxu1 %v9231_v25  ;;  %v9206_v25 = vcombine.low %v817_v58, %v821_v27  ;;  %10364 = vst [vmem:[#allocation20_spill] sm:$0xff] %v10158_v31  ;;  %v1045_v11 = vld [vmem:[#allocation5 + $0x1d78] sm:$0xff] }
 0x3f4   :  { %7595 = vmatpush2.bf16.msra.mxu0 %v9102_v26  ;;  %v933_v26 = vld [vmem:[#allocation5 + $0x19f8] sm:$0xff]  ;;  %v10162_v49 = vpop.f32.mrf.mxu1 }
 0x3f5   :  { %7596 = vmatprep.subr.bf16.mxu0 %v9095_v32  ;;  %v1061_v32 = vld [vmem:[#allocation5 + $0x1df8] sm:$0xff]  ;;  %v9319_v48 = vcombine.high %v929_v45, %v933_v26  ;;  %v9318_v58 = vcombine.low %v929_v45, %v933_v26  ;;  %v9431_v26 = vcombine.high %v1041_v10, %v1045_v11 }
 0x3f6   :  { %7638 = vmatpush2.bf16.msra.mxu1 %v9230_v60  ;;  %v1057_v60 = vld [vmem:[#allocation5 + $0x1dd8] sm:$0xff] }
 0x3f7   :  { %7639 = vmatprep.subr.bf16.mxu1 %v9223_v33  ;;  %v10160_v33 = vpop.f32.mrf.mxu0  ;;  %v9446_v27 = vcombine.low %v1057_v60, %v1061_v32  ;;  %v1117_v31 = vld [vmem:[#allocation5 + $0x1fb8] sm:$0xff] }
 0x3f8   :  { %7597 = vmatpush2.bf16.msra.mxu0 %v9094_v40  ;;  %10365 = vst [vmem:[#allocation21_spill] sm:$0xff] %v10160_v33  ;;  %v9447_v40 = vcombine.high %v1057_v60, %v1061_v32  ;;  %v905_v60 = vld [vmem:[#allocation5 + $0x1918] sm:$0xff] }
 0x3f9   :  { %7598 = vmatprep.subr.bf16.mxu0 %v9087_v42  ;;  %v925_v42 = vld [vmem:[#allocation5 + $0x19b8] sm:$0xff]  ;;  %v10164_v0 = vpop.f32.mrf.mxu0 }
 0x3fa   :  { %7640 = vmatpush2.bf16.msra.mxu1 %v9222_v41  ;;  %v921_v41 = vld [vmem:[#allocation5 + $0x1998] sm:$0xff] }
 0x3fb   :  { %7641 = vmatprep.subr.bf16.mxu1 %v9215_v6  ;;  %v1049_v6 = vld [vmem:[#allocation5 + $0x1d98] sm:$0xff] }
 0x3fc   :  { %7599 = vmatpush2.bf16.msra.mxu0 %v9086_v28  ;;  %v9311_v28 = vcombine.high %v921_v41, %v925_v42  ;;  %v909_v32 = vld [vmem:[#allocation5 + $0x1938] sm:$0xff] }
 0x3fd   :  { %7600 = vmatprep.subr.bf16.mxu0 %v9079_v3  ;;  %v10168_v3 = vpop.f32.mrf.mxu0  ;;  %v1105_v63 = vld [vmem:[#allocation5 + $0x1f58] sm:$0xff] }
 0x3fe   :  { %7642 = vmatpush2.bf16.msra.mxu1 %v9214_v1  ;;  %v10166_v1 = vpop.f32.mrf.mxu1  ;;  %10367 = vst [vmem:[#allocation23_spill] sm:$0xff] %v10168_v3  ;;  %v1109_v33 = vld [vmem:[#allocation5 + $0x1f78] sm:$0xff] }
 0x3ff   :  { %7643 = vmatprep.subr.bf16.mxu1 %v9207_v5  ;;  %10366 = vst [vmem:[#allocation22_spill] sm:$0xff] %v10166_v1  ;;  %v9439_v5 = vcombine.high %v1049_v6, %v1053_v56  ;;  %v10174_v45 = vpop.f32.mrf.mxu0  ;;  %v1142_v1 = vsub.s32 3, %v10031_v61  ;;  %v9495_v22 = vcombine.high %v1105_v63, %v1109_v33  ;;  %v969_v38 = vld [vmem:[#allocation5 + $0x1b18] sm:$0xff] }
 0x400   :  { %7601 = vmatpush2.bf16.msra.mxu0 %v9078_v20  ;;  %v9310_v20 = vcombine.low %v921_v41, %v925_v42 }
 0x401   :  { %7602 = vmatprep.subr.bf16.mxu0 %v9071_v17  ;;  %v9303_v17 = vcombine.high %v913_v7, %v917_v8  ;;  %v10180_v41 = vpop.f32.mrf.mxu0 }
 0x402   :  { %7644 = vmatpush2.bf16.msra.mxu1 %v9206_v25  ;;  %v9438_v25 = vcombine.low %v1049_v6, %v1053_v56  ;;  %10369 = vst [vmem:[#allocation25_spill] sm:$0xff] %v10180_v41  ;;  %v897_v6 = vld [vmem:[#allocation5 + $0x18d8] sm:$0xff] }
 0x403   :  { %7645 = vmatprep.subr.bf16.mxu1 %v9199_v50  ;;  %v10172_v50 = vpop.f32.mrf.mxu1  ;;  %v901_v56 = vld [vmem:[#allocation5 + $0x18f8] sm:$0xff] }
 0x404   :  { %7603 = vmatpush2.bf16.msra.mxu0 %v9070_v51  ;;  %v1037_v51 = vld [vmem:[#allocation5 + $0x1d38] sm:$0xff]  ;;  %v9286_v36 = vcombine.low %v897_v6, %v901_v56 }
 0x405   :  { %7658 = vmatprep.subr.bf16.mxu0 %v9319_v48  ;;  %v9430_v48 = vcombine.low %v1041_v10, %v1045_v11  ;;  %v889_v10 = vld [vmem:[#allocation5 + $0x1898] sm:$0xff] }
 0x406   :  { %7646 = vmatpush2.bf16.msra.mxu1 %v9198_v52  ;;  %v9302_v52 = vcombine.low %v913_v7, %v917_v8  ;;  %v10184_v7 = vpop.f32.mrf.mxu0  ;;  %v893_v11 = vld [vmem:[#allocation5 + $0x18b8] sm:$0xff] }
 0x407   :  { %7701 = vmatprep.subr.bf16.mxu1 %v9447_v40  ;;  %7605 = vmatmul.mubr.bf16.vlgmr.msra.gmra.mxu0 %v10005_v19  ;;  %v1033_v19 = vld [vmem:[#allocation5 + $0x1d18] sm:$0xff]  ;;  %v9295_v40 = vcombine.high %v905_v60, %v909_v32 }
 0x408   :  { %7659 = vmatpush1.bf16.msra.mxu0 %v9318_v58  ;;  %7690 = vmatprep.mubr.bf16.mxu0 %v10021_v34  ;;  %v9423_v42 = vcombine.high %v1033_v19, %v1037_v51  ;;  %v1025_v58 = vld [vmem:[#allocation5 + $0x1cd8] sm:$0xff] }
 0x409   :  { %7648 = vmatmul.mubr.bf16.vlgmr.msra.gmra.mxu1 %v10013_v29  ;;  %7660 = vmatprep.subr.bf16.mxu0 %v9311_v28  ;;  %v10178_v29 = vpop.f32.mrf.mxu1  ;;  %v1029_v34 = vld [vmem:[#allocation5 + $0x1cf8] sm:$0xff]  ;;  %v9422_v28 = vcombine.low %v1033_v19, %v1037_v51 }
 0x40a   :  { %7702 = vmatpush1.bf16.msra.mxu1 %v9446_v27  ;;  %7733 = vmatprep.mubr.bf16.mxu1 %v10026_v35  ;;  %10368 = vst [vmem:[#allocation24_spill] sm:$0xff] %v10178_v29  ;;  %v9294_v35 = vcombine.low %v905_v60, %v909_v32  ;;  %v9415_v8 = vcombine.high %v1025_v58, %v1029_v34  ;;  %v881_v51 = vld [vmem:[#allocation5 + $0x1858] sm:$0xff] }
 0x40b   :  { %7703 = vmatprep.subr.bf16.mxu1 %v9439_v5  ;;  %v10182_v27 = vpop.f32.mrf.mxu1  ;;  %v9287_v5 = vcombine.high %v897_v6, %v901_v56  ;;  %v9414_v60 = vcombine.low %v1025_v58, %v1029_v34  ;;  %v9279_v32 = vcombine.high %v889_v10, %v893_v11  ;;  %v873_v34 = vld [vmem:[#allocation5 + $0x1818] sm:$0xff] }
 0x40c   :  { %7661 = vmatpush1.bf16.msra.mxu0 %v9310_v20  ;;  %v1017_v20 = vld [vmem:[#allocation5 + $0x1c98] sm:$0xff] }
 0x40d   :  { %7662 = vmatprep.subr.bf16.mxu0 %v9303_v17  ;;  %v10186_v17 = vpop.f32.mrf.mxu1 }
 0x40e   :  { %7704 = vmatpush1.bf16.msra.mxu1 %v9438_v25  ;;  %v1021_v25 = vld [vmem:[#allocation5 + $0x1cb8] sm:$0xff]  ;;  %10370 = vst [vmem:[#allocation26_spill] sm:$0xff] %v10186_v17  ;;  %v9278_v17 = vcombine.low %v889_v10, %v893_v11 }
 0x40f   :  { %7705 = vmatprep.subr.bf16.mxu1 %v9431_v26  ;;  %v10188_v26 = vpop.f32.mrf.mxu0  ;;  %v9407_v19 = vcombine.high %v1017_v20, %v1021_v25 }
 0x410   :  { %7663 = vmatpush1.bf16.msra.mxu0 %v9302_v52  ;;  %10371 = vst [vmem:[#allocation27_spill] sm:$0xff] %v10188_v26  ;;  %v885_v52 = vld [vmem:[#allocation5 + $0x1878] sm:$0xff] }
 0x411   :  { %7664 = vmatprep.subr.bf16.mxu0 %v9295_v40  ;;  %v1013_v40 = vld [vmem:[#allocation5 + $0x1c78] sm:$0xff]  ;;  %v10192_v29 = vpop.f32.mrf.mxu0  ;;  %v9271_v6 = vcombine.high %v881_v51, %v885_v52  ;;  %v9270_v3 = vcombine.low %v881_v51, %v885_v52  ;;  %v1134_v52 = vsub.s32 1, %v10031_v61 }
 0x412   :  { %7706 = vmatpush1.bf16.msra.mxu1 %v9430_v48  ;;  %v1009_v48 = vld [vmem:[#allocation5 + $0x1c58] sm:$0xff] }
 0x413   :  { %7707 = vmatprep.subr.bf16.mxu1 %v9423_v42  ;;  %v10190_v42 = vpop.f32.mrf.mxu1  ;;  %v9399_v58 = vcombine.high %v1009_v48, %v1013_v40  ;;  %v10196_v26 = vpop.f32.mrf.mxu0 }
 0x414   :  { %7665 = vmatpush1.bf16.msra.mxu0 %v9294_v35  ;;  %v9406_v35 = vcombine.low %v1017_v20, %v1021_v25  ;;  %10373 = vst [vmem:[#allocation29_spill] sm:$0xff] %v10196_v26  ;;  %v993_v25 = vld [vmem:[#allocation5 + $0x1bd8] sm:$0xff] }
 0x415   :  { %7666 = vmatprep.subr.bf16.mxu0 %v9287_v5  ;;  %v10194_v56 = vpop.f32.mrf.mxu1  ;;  %v1001_v5 = vld [vmem:[#allocation5 + $0x1c18] sm:$0xff] }
 0x416   :  { %7708 = vmatpush1.bf16.msra.mxu1 %v9422_v28  ;;  %10372 = vst [vmem:[#allocation28_spill] sm:$0xff] %v10194_v56  ;;  %v877_v28 = vld [vmem:[#allocation5 + $0x1838] sm:$0xff]  ;;  %v10200_v56 = vpop.f32.mrf.mxu0 }
 0x417   :  { %7709 = vmatprep.subr.bf16.mxu1 %v9415_v8  ;;  %v1005_v8 = vld [vmem:[#allocation5 + $0x1c38] sm:$0xff]  ;;  %v9263_v10 = vcombine.high %v873_v34, %v877_v28  ;;  %v10198_v11 = vpop.f32.mrf.mxu1  ;;  %v9262_v41 = vcombine.low %v873_v34, %v877_v28 }
 0x418   :  { %7667 = vmatpush1.bf16.msra.mxu0 %v9286_v36  ;;  %v9398_v36 = vcombine.low %v1009_v48, %v1013_v40  ;;  %v9391_v20 = vcombine.high %v1001_v5, %v1005_v8  ;;  %v10205_v40 = vpop.f32.mrf.mxu0  ;;  %v1113_v26 = vld [vmem:[#allocation5 + $0x1f98] sm:$0xff] }
 0x419   :  { %7668 = vmatprep.subr.bf16.mxu0 %v9279_v32  ;;  %v1121_v32 = vld [vmem:[#allocation5 + $0x1fd8] sm:$0xff]  ;;  %v10203_v48 = vpop.f32.mrf.mxu1  ;;  %10375 = vst [vmem:[#allocation31_spill] sm:$0xff] %v10205_v40 }
 0x41a   :  { %7710 = vmatpush1.bf16.msra.mxu1 %v9414_v60  ;;  %v997_v60 = vld [vmem:[#allocation5 + $0x1bf8] sm:$0xff]  ;;  %10374 = vst [vmem:[#allocation30_spill] sm:$0xff] %v10203_v48 }
 0x41b   :  { %7711 = vmatprep.subr.bf16.mxu1 %v9407_v19  ;;  %v1125_v19 = vld [vmem:[#allocation5 + $0x1ff8] sm:$0xff]  ;;  %v9383_v51 = vcombine.high %v993_v25, %v997_v60 }
 0x41c   :  { %7669 = vmatpush1.bf16.msra.mxu0 %v9278_v17  ;;  %v9390_v17 = vcombine.low %v1001_v5, %v1005_v8  ;;  %v9510_v34 = vcombine.low %v1121_v32, %v1125_v19  ;;  %v10208_v5 = vld [vmem:[#allocation7] sm:$0xff]  ;;  %v977_v40 = vld [vmem:[#allocation5 + $0x1b58] sm:$0xff] }
 0x41d   :  { %7670 = vmatprep.subr.bf16.mxu0 %v9271_v6  ;;  %v985_v6 = vld [vmem:[#allocation5 + $0x1b98] sm:$0xff]  ;;  %v1135_v8 = vrot.slane %v10208_v5, %v1134_v52 }
 0x41e   :  { %7712 = vmatpush1.bf16.msra.mxu1 %v9406_v35  ;;  %v9511_v35 = vcombine.high %v1121_v32, %v1125_v19  ;;  %v981_v48 = vld [vmem:[#allocation5 + $0x1b78] sm:$0xff]  ;;  %v9502_v19 = vcombine.low %v1113_v26, %v1117_v31 }
 0x41f   :  { %7713 = vmatprep.subr.bf16.mxu1 %v9399_v58  ;;  %v989_v58 = vld [vmem:[#allocation5 + $0x1bb8] sm:$0xff]  ;;  %v6409_v32 = vadd.f32 %v10054_v47, %v1135_v8  ;;  %v9366_v47 = vcombine.low %v977_v40, %v981_v48 }
 0x420   :  { %7671 = vmatpush1.bf16.msra.mxu0 %v9270_v3  ;;  %v9382_v3 = vcombine.low %v993_v25, %v997_v60  ;;  %v9375_v28 = vcombine.high %v985_v6, %v989_v58  ;;  %v9374_v60 = vcombine.low %v985_v6, %v989_v58 }
 0x421   :  { %7672 = vmatprep.subr.bf16.mxu0 %v9263_v10  ;;  %v10213_v10 = vpop.f32.mrf.mxu0 }
 0x422   :  { %7714 = vmatpush1.bf16.msra.mxu1 %v9398_v36  ;;  %v10211_v36 = vpop.f32.mrf.mxu1  ;;  %10376 = vst [vmem:[#allocation32_spill] sm:$0xff] %v10213_v10  ;;  %v1097_v10 = vld [vmem:[#allocation5 + $0x1f18] sm:$0xff] }
 0x423   :  { %7715 = vmatprep.subr.bf16.mxu1 %v9391_v20  ;;  %v9503_v20 = vcombine.high %v1113_v26, %v1117_v31  ;;  %v6452_v31 = vadd.f32 %v10056_v59, %v6409_v32 }
 0x424   :  { %7673 = vmatpush1.bf16.msra.mxu0 %v9262_v41  ;;  %v1143_v41 = vrot.slane %v10208_v5, %v1142_v1  ;;  %v10216_v25 = vpop.f32.mrf.mxu1  ;;  %v973_v1 = vld [vmem:[#allocation5 + $0x1b38] sm:$0xff] }
 0x425   :  { %7674 = vmatprep.subr.bf16.mxu0 %v9383_v51  ;;  %10377 = vst [vmem:[#allocation33_spill] sm:$0xff] %v10216_v25  ;;  %v6405_v51 = vadd.f32 %v10044_v30, %v1135_v8  ;;  %v1101_v25 = vld [vmem:[#allocation5 + $0x1f38] sm:$0xff]  ;;  %v9494_v30 = vcombine.low %v1105_v63, %v1109_v33 }
 0x426   :  { %7716 = vmatpush1.bf16.msra.mxu1 %v9390_v17  ;;  %v9367_v17 = vcombine.high %v977_v40, %v981_v48  ;;  %v6753_v52 = vadd.f32 %v10148_v44, %v1143_v41  ;;  %v6749_v6 = vadd.f32 %v10140_v21, %v1143_v41  ;;  %v10224_v58 = vpop.f32.mrf.mxu1  ;;  %v9359_v44 = vcombine.high %v969_v38, %v973_v1  ;;  %v961_v8 = vld [vmem:[#allocation5 + $0x1ad8] sm:$0xff] }
 0x427   :  { %7717 = vmatprep.subr.bf16.mxu1 %v9511_v35  ;;  %v10221_v35 = vpop.f32.mrf.mxu0  ;;  %v6448_v26 = vadd.f32 %v10048_v37, %v6405_v51  ;;  %v965_v21 = vld [vmem:[#allocation5 + $0x1af8] sm:$0xff] }
 0x428   :  { %7675 = vmatpush2.bf16.msra.mxu0 %v9382_v3  ;;  %v6796_v3 = vadd.f32 %v10154_v13, %v6753_v52  ;;  %v1089_v41 = vld [vmem:[#allocation5 + $0x1ed8] sm:$0xff]  ;;  %v6792_v40 = vadd.f32 %v10146_v39, %v6749_v6  ;;  %v10235_v33 = vpop.f32.mrf.mxu1  ;;  %v9358_v13 = vcombine.low %v969_v38, %v973_v1 }
 0x429   :  { %7676 = vmatprep.subr.bf16.mxu0 %v9375_v28  ;;  %v9487_v28 = vcombine.high %v1097_v10, %v1101_v25  ;;  %v1093_v48 = vld [vmem:[#allocation5 + $0x1ef8] sm:$0xff]  ;;  %v6491_v59 = vadd.f32 %v10061_v43, %v6448_v26 }
 0x42a   :  { %7718 = vmatpush2.bf16.msra.mxu1 %v9510_v34  ;;  %v10229_v34 = vpop.f32.mrf.mxu0  ;;  %v6839_v63 = vadd.f32 %v10164_v0, %v6796_v3  ;;  %v9479_v32 = vcombine.high %v1089_v41, %v1093_v48  ;;  %v957_v43 = vld [vmem:[#allocation5 + $0x1ab8] sm:$0xff]  ;;  %v10243_v6 = vpop.f32.mrf.mxu1 }
 0x42b   :  { %7719 = vmatprep.subr.bf16.mxu1 %v9503_v20  ;;  %v6495_v20 = vadd.f32 %v10072_v24, %v6452_v31  ;;  %v6835_v24 = vadd.f32 %v10156_v15, %v6792_v40  ;;  %v1085_v0 = vld [vmem:[#allocation5 + $0x1eb8] sm:$0xff]  ;;  %v6534_v51 = vadd.f32 %v10065_v53, %v6491_v59 }
 0x42c   :  { %7677 = vmatpush2.bf16.msra.mxu0 %v9374_v60  ;;  %v10237_v37 = vpop.f32.mrf.mxu0  ;;  %v9351_v60 = vcombine.high %v961_v8, %v965_v21  ;;  %v6882_v52 = vadd.f32 %v10172_v50, %v6839_v63  ;;  %v10250_v31 = vpop.f32.mrf.mxu1  ;;  %v945_v50 = vld [vmem:[#allocation5 + $0x1a58] sm:$0xff] }
 0x42d   :  { %7678 = vmatprep.subr.bf16.mxu0 %v9367_v17  ;;  %v6538_v39 = vadd.f32 %v10074_v2, %v6495_v20  ;;  %v1081_v17 = vld [vmem:[#allocation5 + $0x1e98] sm:$0xff]  ;;  %v6878_v2 = vadd.f32 %v10162_v49, %v6835_v24 }
 0x42e   :  { %7720 = vmatpush2.bf16.msra.mxu1 %v9502_v19  ;;  %v953_v19 = vld [vmem:[#allocation5 + $0x1a98] sm:$0xff]  ;;  %v10245_v38 = vpop.f32.mrf.mxu0  ;;  %v9471_v53 = vcombine.high %v1081_v17, %v1085_v0 }
 0x42f   :  { %7721 = vmatprep.subr.bf16.mxu1 %v9495_v22  ;;  %v9486_v22 = vcombine.low %v1097_v10, %v1101_v25  ;;  %v9350_v10 = vcombine.low %v961_v8, %v965_v21  ;;  %v6581_v15 = vadd.f32 %v10090_v46, %v6538_v39  ;;  %v9478_v25 = vcombine.low %v1089_v41, %v1093_v48  ;;  %v1073_v26 = vld [vmem:[#allocation5 + $0x1e58] sm:$0xff]  ;;  %v10258_v41 = vpop.f32.mrf.mxu1 }
 0x430   :  { %7679 = vmatpush2.bf16.msra.mxu0 %v9366_v47  ;;  %v9343_v1 = vcombine.high %v953_v19, %v957_v43  ;;  %v6925_v47 = vadd.f32 %v10184_v7, %v6882_v52  ;;  %v1077_v3 = vld [vmem:[#allocation5 + $0x1e78] sm:$0xff]  ;;  %v6921_v46 = vadd.f32 %v10174_v45, %v6878_v2  ;;  %v9342_v8 = vcombine.low %v953_v19, %v957_v43 }
 0x431   :  { %7680 = vmatprep.subr.bf16.mxu0 %v9359_v44  ;;  %v6577_v44 = vadd.f32 %v10079_v57, %v6534_v51  ;;  %v6624_v49 = vadd.f32 %v10092_v62, %v6581_v15  ;;  %v9470_v7 = vcombine.low %v1081_v17, %v1085_v0  ;;  %v9463_v57 = vcombine.high %v1073_v26, %v1077_v3  ;;  %v937_v48 = vld [vmem:[#allocation5 + $0x1a18] sm:$0xff]  ;;  %v10268_v43 = vpop.f32.mrf.mxu1  ;;  %v9678_v51 = vld [vmem:[#allocation8 + $0x78] sm:$0xff]  }
 0x432   :  { %7722 = vmatpush2.bf16.msra.mxu1 %v9494_v30  ;;  %v949_v30 = vld [vmem:[#allocation5 + $0x1a78] sm:$0xff]  ;;  %v6968_v20 = vadd.f32 %v10190_v42, %v6925_v47  ;;  %v6964_v62 = vadd.f32 %v10182_v27, %v6921_v46 }
 0x433   :  { %7723 = vmatprep.subr.bf16.mxu1 %v9487_v28  ;;  %v10254_v28 = vpop.f32.mrf.mxu0  ;;  %v9335_v21 = vcombine.high %v945_v50, %v949_v30  ;;  %v941_v59 = vld [vmem:[#allocation5 + $0x1a38] sm:$0xff]  ;;  %v6620_v45 = vadd.f32 %v10083_v18, %v6577_v44  ;;  %v6667_v40 = vadd.f32 %v10134_v23, %v6624_v49  ;;  %v9334_v42 = vcombine.low %v945_v50, %v949_v30 }
 0x434   :  { %7681 = vmatpush2.bf16.msra.mxu0 %v9358_v13  ;;  %v1065_v63 = vld [vmem:[#allocation5 + $0x1e18] sm:$0xff]  ;;  %v9327_v19 = vcombine.high %v937_v48, %v941_v59  ;;  %v7007_v18 = vadd.f32 %v10192_v29, %v6964_v62  ;;  %v9326_v17 = vcombine.low %v937_v48, %v941_v59  ;;  %v1138_v29 = vsub.s32 2, %v10031_v61  ;;  %v9686_v48 = vld [vmem:[#allocation8 + $0x68] sm:$0xff]  }
 0x435   :  { %7682 = vmatprep.subr.bf16.mxu0 %v9351_v60  ;;  %v1069_v13 = vld [vmem:[#allocation5 + $0x1e38] sm:$0xff]  ;;  %v10264_v60 = vpop.f32.mrf.mxu0  ;;  %v6663_v24 = vadd.f32 %v10097_v9, %v6620_v45 }
 0x436   :  { %7724 = vmatpush2.bf16.msra.mxu1 %v9486_v22  ;;  %v7011_v22 = vadd.f32 %v10200_v56, %v6968_v20  ;;  %v9455_v27 = vcombine.high %v1065_v63, %v1069_v13  ;;  %v6710_v56 = vadd.f32 %v10138_v54, %v6667_v40  ;;  %v9454_v0 = vcombine.low %v1065_v63, %v1069_v13  ;;  %v9679_v54 = vld [vmem:[#allocation8 + $0xf8] sm:$0xff]   ;;  %v9682_v44 = vld [vmem:[#allocation8 + $0x70] sm:$0xff]   ;;  %v10379_v63 = vld [vmem:[#allocation18_spill] sm:$0xff] }
 0x437   :  { %7725 = vmatprep.subr.bf16.mxu1 %v9479_v32  ;;  %v9462_v32 = vcombine.low %v1073_v26, %v1077_v3  ;;  %v10270_v23 = vpop.f32.mrf.mxu0  ;;  %v6706_v9 = vadd.f32 %v10099_v14, %v6663_v24  ;;  %v7050_v52 = vadd.f32 %v10198_v11, %v7007_v18  ;;  %v9680_v14 = vld [vmem:[#allocation8 + $0x38] sm:$0xff]   ;;  %v1139_v11 = vrot.slane %v10208_v5, %v1138_v29  ;;  %v9683_v46 = vld [vmem:[#allocation8 + $0xf0] sm:$0xff]  }
 0x438   :  { %7683 = vmatpush2.bf16.msra.mxu0 %v9350_v10  ;;  %v7054_v39 = vadd.f32 %v10211_v36, %v7011_v22  ;;  %v10277_v10 = vpop.f32.mrf.mxu1  ;;  %v1150_v36 = vsub.s32 5, %v10031_v61  ;;  %v10380_v24 = vld [vmem:[#allocation17_spill] sm:$0xff] }
 0x439   :  { %7684 = vmatprep.subr.bf16.mxu0 %v9343_v1  ;;  %v10279_v15 = vpop.f32.mrf.mxu0  ;;  %v7745_v47 = vmax.f32 %v6706_v9, 0.0  ;;  %v7747_v50 = vmax.f32 %v7050_v52, 0.0  ;;  %v6747_v59 = vadd.f32 %v10136_v4, %v1139_v11  ;;  %v9689_v4 = vld [vmem:[#allocation8 + $0xa8] sm:$0xff]   ;;  %v9693_v52 = vld [vmem:[#allocation8 + $0xa0] sm:$0xff]  }
 0x43a   :  { %7726 = vmatpush2.bf16.msra.mxu1 %v9478_v25  ;;  %v7753_v25 = vmax.f32 %v6710_v56, 0.0  ;;  %v7755_v1 = vmax.f32 %v7054_v39, 0.0  ;;  %v10282_v2 = vpop.f32.mrf.mxu1  ;;  %v1151_v3 = vrot.slane %v10208_v5, %v1150_v36 }
 0x43b   :  { %7727 = vmatprep.subr.bf16.mxu1 %v9471_v53  ;;  %v9681_v53 = vld [vmem:[#allocation8 + $0xb8] sm:$0xff]   ;;  %v10285_v30 = vpop.f32.mrf.mxu0 }
 0x43c   :  { %7685 = vmatpush2.bf16.msra.mxu0 %v9342_v8  ;;  %v7761_v26 = vpack.c.bf16 %v7753_v25, %v7745_v47  ;;  %v6751_v8 = vadd.f32 %v10144_v55, %v1139_v11  ;;  %v7763_v49 = vpack.c.bf16 %v7755_v1, %v7747_v50  ;;  %v7097_v20 = vadd.f32 %v10229_v34, %v1151_v3  ;;  %v10378_v55 = vld [vmem:[#allocation32_spill] sm:$0xff]  ;;  %v9688_v34 = vld [vmem:[#allocation8 + $0x28] sm:$0xff]  }
 0x43d   :  { %7686 = vmatprep.subr.bf16.mxu0 %v9335_v21  ;;  %v9684_v21 = vld [vmem:[#allocation8 + $0x30] sm:$0xff]   ;;  %v7268_v45 = vpop.f32.mrf.mxu0  ;;  %v7093_v40 = vadd.f32 %v10378_v55, %v1151_v3  ;;  %v10383_v25 = vld [vmem:[#allocation22_spill] sm:$0xff]  ;;  %v9697_v3 = vld [vmem:[#allocation8 + $0x98] sm:$0xff]  }
 0x43e   :  { %7728 = vmatpush2.bf16.msra.mxu1 %v9470_v7  ;;  %v10290_v7 = vpop.f32.mrf.mxu1  ;;  %v6794_v13 = vadd.f32 %v10379_v63, %v6751_v8  ;;  %v7140_v22 = vadd.f32 %v10243_v6, %v7097_v20  ;;  %v9692_v6 = vld [vmem:[#allocation8 + $0x20] sm:$0xff]   ;;  %v10386_v8 = vld [vmem:[#allocation23_spill] sm:$0xff] }
 0x43f   :  { %7729 = vmatprep.subr.bf16.mxu1 %v9463_v57  ;;  %v9685_v57 = vld [vmem:[#allocation8 + $0xb0] sm:$0xff]   ;;  %v10299_v62 = vpop.f32.mrf.mxu0  ;;  %v7136_v56 = vadd.f32 %v10224_v58, %v7093_v40  ;;  %v9695_v58 = vld [vmem:[#allocation8 + $0xd8] sm:$0xff]  }
 0x440   :  { %7687 = vmatpush2.bf16.msra.mxu0 %v9334_v42  ;;  %v9690_v42 = vld [vmem:[#allocation8 + $0x60] sm:$0xff]   ;;  %v7183_v39 = vadd.f32 %v10264_v60, %v7140_v22  ;;  %v10388_v40 = vld [vmem:[#allocation24_spill] sm:$0xff] }
 0x441   :  { %7688 = vmatprep.subr.bf16.mxu0 %v9327_v19  ;;  %v10381_v19 = vld [vmem:[#allocation21_spill] sm:$0xff]  ;;  %v7179_v29 = vadd.f32 %v10245_v38, %v7136_v56 }
 0x442   :  { %7730 = vmatpush2.bf16.msra.mxu1 %v9462_v32  ;;  %v6790_v32 = vadd.f32 %v10380_v24, %v6747_v59  ;;  %v6837_v18 = vadd.f32 %v10381_v19, %v6794_v13  ;;  %v7226_v60 = vadd.f32 %v10277_v10, %v7183_v39  ;;  %v9696_v38 = vld [vmem:[#allocation8 + $0x18] sm:$0xff]   ;;  %v9699_v10 = vld [vmem:[#allocation8 + $0xd0] sm:$0xff]   ;;  %v9704_v19 = vld [vmem:[#allocation8 + $0x8] sm:$0xff]  }
 0x443   :  { %7731 = vmatprep.subr.bf16.mxu1 %v9455_v27  ;;  %v9691_v27 = vld [vmem:[#allocation8 + $0xe0] sm:$0xff]   ;;  %v10390_v24 = vld [vmem:[#allocation27_spill] sm:$0xff] }
 0x444   :  { %7689 = vmatpush2.bf16.msra.mxu0 %v9326_v17  ;;  %v10382_v17 = vld [vmem:[#allocation19_spill] sm:$0xff]  ;;  %v6880_v36 = vadd.f32 %v10383_v25, %v6837_v18  ;;  %v10389_v13 = vld [vmem:[#allocation29_spill] sm:$0xff]  ;;  %v10391_v39 = vld [vmem:[#allocation30_spill] sm:$0xff] }
 0x445   :  { %9577 = vmatprep.subr.bf16.mxu0 %v9678_v51  ;;  %v6833_v9 = vadd.f32 %v10382_v17, %v6790_v32  ;;  %v7350_v51 = vpop.f32.mrf.mxu0  ;;  %v9706_v56 = vld [vmem:[#allocation8 + $0x40] sm:$0xff]  }
 0x446   :  { %7732 = vmatpush2.bf16.msra.mxu1 %v9454_v0 }
 0x447   :  { %9599 = vmatprep.subr.bf16.mxu1 %v9679_v54  ;;  %7691 = vmatmul.mubr.bf16.vlgmr.msra.gmra.mxu0 %v10036_v12  ;;  %v9687_v12 = vld [vmem:[#allocation8 + $0xe8] sm:$0xff]   ;;  %v9694_v54 = vld [vmem:[#allocation8 + $0x58] sm:$0xff]   ;;  %v10314_v50 = vpop.f32.mrf.mxu0 }
 0x448   :  { %9578 = vmatpush3.bf16.msra.mxu0 %v9680_v14  ;;  %8319 = vmatprep.mubr.bf16.mxu0 %v7761_v26  ;;  %v10384_v14 = vld [vmem:[#allocation20_spill] sm:$0xff]  ;;  %v7269_v26 = vadd.f32 %v7268_v45, %v7226_v60  ;;  %v9702_v45 = vld [vmem:[#allocation8 + $0x48] sm:$0xff]  }
 0x449   :  { %7734 = vmatmul.mubr.bf16.vlgmr.msra.gmra.mxu1 %v10040_v16  ;;  %9579 = vmatprep.subr.bf16.mxu0 %v9682_v44  ;;  %v10297_v16 = vpop.f32.mrf.mxu1  ;;  %v6876_v47 = vadd.f32 %v10384_v14, %v6833_v9  ;;  %v7222_v44 = vadd.f32 %v10258_v41, %v7179_v29  ;;  %v7354_v59 = vpop.f32.mrf.mxu0  ;;  %v9701_v41 = vld [vmem:[#allocation8 + $0x90] sm:$0xff]   ;;  %v9726_v60 = vld [vmem:[#allocation8 + $0x1f8] sm:$0xff]  }
 0x44a   :  { %9600 = vmatpush3.bf16.msra.mxu1 %v9681_v53  ;;  %8360 = vmatprep.mubr.bf16.mxu1 %v7763_v49  ;;  %v10385_v53 = vld [vmem:[#allocation25_spill] sm:$0xff]  ;;  %v10392_v29 = vld [vmem:[#allocation28_spill] sm:$0xff] }
 0x44b   :  { %9601 = vmatprep.subr.bf16.mxu1 %v9683_v46  ;;  %v7311_v0 = vpop.f32.mrf.mxu1  ;;  %v6923_v11 = vadd.f32 %v10385_v53, %v6880_v36  ;;  %v9698_v46 = vld [vmem:[#allocation8 + $0x50] sm:$0xff]   ;;  %v6919_v49 = vadd.f32 %v10386_v8, %v6876_v47  ;;  %v7265_v20 = vadd.f32 %v10279_v15, %v7222_v44  ;;  %v9710_v36 = vld [vmem:[#allocation8 + $0x178] sm:$0xff]  }
 0x44c   :  { %9580 = vmatpush3.bf16.msra.mxu0 %v9684_v21  ;;  %v7312_v55 = vadd.f32 %v7311_v0, %v7269_v26  ;;  %v9707_v0 = vld [vmem:[#allocation8 + $0xc0] sm:$0xff]   ;;  %v9711_v53 = vld [vmem:[#allocation8 + $0x138] sm:$0xff]   ;;  %v9712_v44 = vld [vmem:[#allocation8 + $0x170] sm:$0xff]  }
 0x44d   :  { %9581 = vmatprep.subr.bf16.mxu0 %v9686_v48  ;;  %v10309_v1 = vpop.f32.mrf.mxu1  ;;  %v6962_v63 = vadd.f32 %v10388_v40, %v6919_v49  ;;  %v7308_v15 = vadd.f32 %v10290_v7, %v7265_v20  ;;  %v9708_v7 = vld [vmem:[#allocation8] sm:$0xff]   ;;  %v10393_v49 = vld [vmem:[#allocation16_spill] sm:$0xff]  ;;  %v10394_v20 = vld [vmem:[#allocation31_spill] sm:$0xff] }
 0x44e   :  { %9602 = vmatpush3.bf16.msra.mxu1 %v9685_v57  ;;  %v10387_v57 = vld [vmem:[#allocation26_spill] sm:$0xff] }
 0x44f   :  { %9603 = vmatprep.subr.bf16.mxu1 %v9687_v12  ;;  %v7393_v21 = vpop.f32.mrf.mxu1  ;;  %v6966_v48 = vadd.f32 %v10387_v57, %v6923_v11  ;;  %v9700_v12 = vld [vmem:[#allocation8 + $0x10] sm:$0xff]   ;;  %v7005_v32 = vadd.f32 %v10390_v24, %v6962_v63  ;;  %v7351_v18 = vadd.f32 %v7350_v51, %v7308_v15  ;;  %v9709_v51 = vld [vmem:[#allocation8 + $0x80] sm:$0xff]  }
 0x450   :  { %9582 = vmatpush3.bf16.msra.mxu0 %v9688_v34  ;;  %v9716_v63 = vld [vmem:[#allocation8 + $0x160] sm:$0xff]  }
 0x451   :  { %9583 = vmatprep.subr.bf16.mxu0 %v9690_v42  ;;  %v7009_v34 = vadd.f32 %v10389_v13, %v6966_v48  ;;  %v10322_v22 = vpop.f32.mrf.mxu1  ;;  %v7355_v42 = vadd.f32 %v7354_v59, %v7312_v55  ;;  %v7394_v25 = vadd.f32 %v7393_v21, %v7351_v18  ;;  %v9728_v21 = vld [vmem:[#allocation8 + $0x1f0] sm:$0xff]   ;;  %v9714_v48 = vld [vmem:[#allocation8 + $0x168] sm:$0xff]   ;;  %v9717_v15 = vld [vmem:[#allocation8 + $0x120] sm:$0xff]  }
 0x452   :  { %9604 = vmatpush3.bf16.msra.mxu1 %v9689_v4  ;;  %v9703_v4 = vld [vmem:[#allocation8 + $0xc8] sm:$0xff]   ;;  %v9729_v59 = vld [vmem:[#allocation8 + $0x1b0] sm:$0xff]   ;;  %v9733_v24 = vld [vmem:[#allocation8 + $0x1a0] sm:$0xff]  }
 0x453   :  { %9605 = vmatprep.subr.bf16.mxu1 %v9691_v27  ;;  %v9705_v27 = vld [vmem:[#allocation8 + $0x88] sm:$0xff]   ;;  %v7052_v17 = vadd.f32 %v10391_v39, %v7009_v34  ;;  %v7397_v9 = vpop.f32.mrf.mxu1 }
 0x454   :  { %9584 = vmatpush3.bf16.msra.mxu0 %v9692_v6  ;;  %v7398_v6 = vadd.f32 %v7397_v9, %v7355_v42  ;;  %v9730_v55 = vld [vmem:[#allocation8 + $0x1e8] sm:$0xff]   ;;  %v9718_v42 = vld [vmem:[#allocation8 + $0x158] sm:$0xff]  }
 0x455   :  { %9585 = vmatprep.subr.bf16.mxu0 %v9694_v54  ;;  %v1146_v54 = vsub.s32 4, %v10031_v61  ;;  %v9731_v13 = vld [vmem:[#allocation8 + $0x1a8] sm:$0xff]  }
 0x456   :  { %9606 = vmatpush3.bf16.msra.mxu1 %v9693_v52  ;;  %v7048_v52 = vadd.f32 %v10392_v29, %v7005_v32  ;;  %v7757_v14 = vmax.f32 %v7398_v6, 0.0 }
 0x457   :  { %9607 = vmatprep.subr.bf16.mxu1 %v9695_v58  ;;  %v7754_v58 = vmax.f32 %v7052_v17, 0.0  ;;  %v1147_v11 = vrot.slane %v10208_v5, %v1146_v54  ;;  %v9723_v17 = vld [vmem:[#allocation8 + $0x108] sm:$0xff]  }
 0x458   :  { %9586 = vmatpush3.bf16.msra.mxu0 %v9696_v38  ;;  %v7746_v47 = vmax.f32 %v7048_v52, 0.0  ;;  %v7749_v38 = vmax.f32 %v7394_v25, 0.0  ;;  %v9735_v52 = vld [vmem:[#allocation8 + $0x198] sm:$0xff]   ;;  %v9739_v54 = vld [vmem:[#allocation8 + $0x188] sm:$0xff]   ;;  %v9741_v25 = vld [vmem:[#allocation8 + $0x180] sm:$0xff]  }
 0x459   :  { %9587 = vmatprep.subr.bf16.mxu0 %v9698_v46  ;;  %v7095_v46 = vadd.f32 %v10221_v35, %v1147_v11  ;;  %v7091_v57 = vadd.f32 %v10394_v20, %v1147_v11  ;;  %v9715_v35 = vld [vmem:[#allocation8 + $0x128] sm:$0xff]  }
 0x45a   :  { %9608 = vmatpush3.bf16.msra.mxu1 %v9697_v3  ;;  %v7762_v26 = vpack.c.bf16 %v7754_v58, %v7746_v47  ;;  %v9727_v3 = vld [vmem:[#allocation8 + $0x1b8] sm:$0xff]   ;;  %v7765_v8 = vpack.c.bf16 %v7757_v14, %v7749_v38 }
 0x45b   :  { %9609 = vmatprep.subr.bf16.mxu1 %v9699_v10  ;;  %v9713_v10 = vld [vmem:[#allocation8 + $0x130] sm:$0xff]  }
 0x45c   :  { %9588 = vmatpush3.bf16.msra.mxu0 %v9700_v12  ;;  %v7138_v12 = vadd.f32 %v10235_v33, %v7095_v46 }
 0x45d   :  { %9589 = vmatprep.subr.bf16.mxu0 %v9702_v45 }
 0x45e   :  { %9610 = vmatpush3.bf16.msra.mxu1 %v9701_v41  ;;  %v10395_v41 = vld [vmem:[#allocation33_spill] sm:$0xff]  ;;  %v7181_v40 = vadd.f32 %v10254_v28, %v7138_v12 }
 0x45f   :  { %9611 = vmatprep.subr.bf16.mxu1 %v9703_v4  ;;  %v7134_v45 = vadd.f32 %v10395_v41, %v7091_v57  ;;  %v9732_v4 = vld [vmem:[#allocation8 + $0x1e0] sm:$0xff]  }
 0x460   :  { %9590 = vmatpush3.bf16.msra.mxu0 %v9704_v19  ;;  %v7224_v33 = vadd.f32 %v10268_v43, %v7181_v40  ;;  %v9719_v19 = vld [vmem:[#allocation8 + $0x118] sm:$0xff]   ;;  %v9721_v43 = vld [vmem:[#allocation8 + $0x110] sm:$0xff]  }
 0x461   :  { %9591 = vmatprep.subr.bf16.mxu0 %v9706_v56  ;;  %v7177_v34 = vadd.f32 %v10237_v37, %v7134_v45  ;;  %v9720_v37 = vld [vmem:[#allocation8 + $0x150] sm:$0xff]  }
 0x462   :  { %9612 = vmatpush3.bf16.msra.mxu1 %v9705_v27  ;;  %v7267_v28 = vadd.f32 %v10285_v30, %v7224_v33 }
 0x463   :  { %9613 = vmatprep.subr.bf16.mxu1 %v9707_v0  ;;  %v7220_v32 = vadd.f32 %v10250_v31, %v7177_v34  ;;  %v9722_v31 = vld [vmem:[#allocation8 + $0x148] sm:$0xff]  }
 0x464   :  { %9592 = vmatpush3.bf16.msra.mxu0 %v9708_v7  ;;  %v7310_v27 = vadd.f32 %v10297_v16, %v7267_v28  ;;  %v9725_v16 = vld [vmem:[#allocation8 + $0x100] sm:$0xff]   ;;  %v9737_v7 = vld [vmem:[#allocation8 + $0x190] sm:$0xff]  }
 0x465   :  { %9621 = vmatprep.subr.bf16.mxu0 %v9710_v36  ;;  %v7263_v18 = vadd.f32 %v10270_v23, %v7220_v32  ;;  %v9724_v23 = vld [vmem:[#allocation8 + $0x140] sm:$0xff]   ;;  %v7477_v36 = vpop.f32.mrf.mxu1 }
 0x466   :  { %9614 = vmatpush3.bf16.msra.mxu1 %v9709_v51  ;;  %v7353_v39 = vadd.f32 %v10314_v50, %v7310_v27  ;;  %v9734_v50 = vld [vmem:[#allocation8 + $0x1d8] sm:$0xff]   ;;  %v7434_v51 = vpop.f32.mrf.mxu0 }
 0x467   :  { %9643 = vmatprep.subr.bf16.mxu1 %v9726_v60  ;;  %8320 = vmatmul.mubr.bf16.vlgmr.msra.gmra.mxu0 %v10393_v49  ;;  %v7306_v56 = vadd.f32 %v10282_v2, %v7263_v18  ;;  %v7479_v60 = vpop.f32.mrf.mxu1 }
 0x468   :  { %9622 = vmatpush3.bf16.msra.mxu0 %v9711_v53  ;;  %8401 = vmatprep.mubr.bf16.mxu0 %v7765_v8  ;;  %v7396_v9 = vadd.f32 %v10322_v22, %v7353_v39  ;;  %v9738_v22 = vld [vmem:[#allocation8 + $0x1c8] sm:$0xff]   ;;  %v7436_v58 = vpop.f32.mrf.mxu0  ;;  %v1154_v8 = vsub.s32 6, %v10031_v61 }
 0x469   :  { %8361 = vmatmul.mubr.bf16.vlgmr.msra.gmra.mxu1 %v7762_v26  ;;  %9623 = vmatprep.subr.bf16.mxu0 %v9712_v44  ;;  %v7349_v30 = vadd.f32 %v10299_v62, %v7306_v56  ;;  %v9736_v62 = vld [vmem:[#allocation8 + $0x1d0] sm:$0xff]   ;;  %v7481_v47 = vpop.f32.mrf.mxu1 }
 0x46a   :  { %9644 = vmatpush3.bf16.msra.mxu1 %v9727_v3  ;;  %v7756_v6 = vmax.f32 %v7396_v9, 0.0  ;;  %v7438_v14 = vpop.f32.mrf.mxu0  ;;  %v1158_v3 = vsub.s32 7, %v10031_v61  ;;  %v1155_v20 = vrot.slane %v10208_v5, %v1154_v8 }
 0x46b   :  { %9645 = vmatprep.subr.bf16.mxu1 %v9728_v21  ;;  %v7392_v0 = vadd.f32 %v10309_v1, %v7349_v30  ;;  %v9740_v1 = vld [vmem:[#allocation8 + $0x1c0] sm:$0xff]   ;;  %v7483_v11 = vpop.f32.mrf.mxu1 }
 0x46c   :  { %9624 = vmatpush3.bf16.msra.mxu0 %v9713_v10  ;;  %v7440_v53 = vpop.f32.mrf.mxu0  ;;  %v1159_v21 = vrot.slane %v10208_v5, %v1158_v3  ;;  %v7435_v12 = vadd.f32 %v7434_v51, %v1155_v20 }
 0x46d   :  { %9625 = vmatprep.subr.bf16.mxu0 %v9714_v48  ;;  %v7748_v29 = vmax.f32 %v7392_v0, 0.0 }
 0x46e   :  { %9646 = vmatpush3.bf16.msra.mxu1 %v9729_v59  ;;  %v7437_v48 = vadd.f32 %v7436_v58, %v1159_v21  ;;  %v7441_v40 = vadd.f32 %v7440_v53, %v1159_v21 }
 0x46f   :  { %9647 = vmatprep.subr.bf16.mxu1 %v9730_v55  ;;  %v7764_v2 = vpack.c.bf16 %v7756_v6, %v7748_v29 }
 0x470   :  { %9626 = vmatpush3.bf16.msra.mxu0 %v9715_v35  ;;  %v7439_v35 = vadd.f32 %v7438_v14, %v1155_v20  ;;  %v7480_v45 = vadd.f32 %v7479_v60, %v7437_v48  ;;  %v7484_v33 = vadd.f32 %v7483_v11, %v7441_v40  ;;  %v9512_v48 = vld [vmem:[#allocation10] ss:$0 sm:$0xff] }
 0x471   :  { %9627 = vmatprep.subr.bf16.mxu0 %v9716_v63  ;;  %v7478_v63 = vadd.f32 %v7477_v36, %v7435_v12 }
 0x472   :  { %9648 = vmatpush3.bf16.msra.mxu1 %v9731_v13  ;;  %v7482_v34 = vadd.f32 %v7481_v47, %v7439_v35 }
 0x473   :  { %9649 = vmatprep.subr.bf16.mxu1 %v9732_v4 }
 0x474   :  { %9628 = vmatpush3.bf16.msra.mxu0 %v9717_v15 }
 0x475   :  { %9629 = vmatprep.subr.bf16.mxu0 %v9718_v42 }
 0x476   :  { %9650 = vmatpush3.bf16.msra.mxu1 %v9733_v24 }
 0x477   :  { %9651 = vmatprep.subr.bf16.mxu1 %v9734_v50 }
 0x478   :  { %9630 = vmatpush3.bf16.msra.mxu0 %v9719_v19 }
 0x479   :  { %9631 = vmatprep.subr.bf16.mxu0 %v9720_v37 }
 0x47a   :  { %9652 = vmatpush3.bf16.msra.mxu1 %v9735_v52 }
 0x47b   :  { %9653 = vmatprep.subr.bf16.mxu1 %v9736_v62 }
 0x47c   :  { %9632 = vmatpush3.bf16.msra.mxu0 %v9721_v43 }
 0x47d   :  { %9633 = vmatprep.subr.bf16.mxu0 %v9722_v31 }
 0x47e   :  { %9654 = vmatpush3.bf16.msra.mxu1 %v9737_v7 }
 0x47f   :  { %9655 = vmatprep.subr.bf16.mxu1 %v9738_v22 }
 0x480   :  { %9634 = vmatpush3.bf16.msra.mxu0 %v9723_v17 }
 0x481   :  { %9635 = vmatprep.subr.bf16.mxu0 %v9724_v23 }
 0x482   :  { %9656 = vmatpush3.bf16.msra.mxu1 %v9739_v54 }
 0x483   :  { %9657 = vmatprep.subr.bf16.mxu1 %v9740_v1 }
 0x484   :  { %9636 = vmatpush3.bf16.msra.mxu0 %v9725_v16 }
 0x486   :  { %9658 = vmatpush3.bf16.msra.mxu1 %v9741_v25 }
 0x487   :  { %8402 = vmatmul.mubr.bf16.vlgmr.msra.gmra.mxu0 %v7764_v2  ;;  %v7520_v38 = vpop.f32.mrf.mxu0 }
 0x488   :  { %v7521_v15 = vadd.f32 %v7520_v38, %v7478_v63 }
 0x489   :  { %v7563_v44 = vpop.f32.mrf.mxu1  ;;  %v7522_v26 = vpop.f32.mrf.mxu0 }
 0x48a   :  { %v7523_v4 = vadd.f32 %v7522_v26, %v7480_v45  ;;  %v7564_v19 = vadd.f32 %v7563_v44, %v7521_v15 }
 0x48b   :  { %v7565_v46 = vpop.f32.mrf.mxu1  ;;  %v7524_v49 = vpop.f32.mrf.mxu0 }
 0x48c   :  { %v7525_v42 = vadd.f32 %v7524_v49, %v7482_v34  ;;  %v7566_v32 = vadd.f32 %v7565_v46, %v7523_v4 }
 0x48d   :  { %v7567_v10 = vpop.f32.mrf.mxu1  ;;  %v7526_v57 = vpop.f32.mrf.mxu0 }
 0x48e   :  { %v7527_v5 = vadd.f32 %v7526_v57, %v7484_v33  ;;  %v7568_v18 = vadd.f32 %v7567_v10, %v7525_v42 }
 0x48f   :  { %v7569_v59 = vpop.f32.mrf.mxu1 }
 0x490   :  { %v7570_v56 = vadd.f32 %v7569_v59, %v7527_v5 }
 0x4c7   :  { %v7606_v55 = vpop.f32.mrf.mxu0 }
 0x4c8   :  { %v7607_v27 = vadd.f32 %v7606_v55, %v7564_v19 }
 0x4c9   :  { %v7649_v41 = vpop.f32.mrf.mxu1  ;;  %v7608_v13 = vpop.f32.mrf.mxu0 }
 0x4ca   :  { %v7609_v37 = vadd.f32 %v7608_v13, %v7566_v32  ;;  %v7650_v0 = vadd.f32 %v7649_v41, %v7607_v27 }
 0x4cb   :  { %v7651_v61 = vpop.f32.mrf.mxu1  ;;  %v7610_v24 = vpop.f32.mrf.mxu0 }
 0x4cc   :  { %v7611_v39 = vadd.f32 %v7610_v24, %v7568_v18  ;;  %v7652_v17 = vadd.f32 %v7651_v61, %v7609_v37 }
 0x4cd   :  { %v7653_v28 = vpop.f32.mrf.mxu1  ;;  %v7612_v43 = vpop.f32.mrf.mxu0 }
 0x4ce   :  { %v7613_v9 = vadd.f32 %v7612_v43, %v7570_v56  ;;  %v7654_v6 = vadd.f32 %v7653_v28, %v7611_v39 }
 0x4cf   :  { %v7655_v31 = vpop.f32.mrf.mxu1 }
 0x4d0   :  { %v7656_v62 = vadd.f32 %v7655_v31, %v7613_v9 }
 0x507   :  { %v7692_v30 = vpop.f32.mrf.mxu0 }
 0x508   :  { %v7693_v50 = vadd.f32 %v7692_v30, %v7650_v0 }
 0x509   :  { %v7735_v23 = vpop.f32.mrf.mxu1  ;;  %v7694_v16 = vpop.f32.mrf.mxu0 }
 0x50a   :  { %v7695_v29 = vadd.f32 %v7694_v16, %v7652_v17  ;;  %v7736_v36 = vadd.f32 %v7735_v23, %v7693_v50 }
 0x50b   :  { %v7737_v2 = vpop.f32.mrf.mxu1  ;;  %v7696_v52 = vpop.f32.mrf.mxu0 }
 0x50c   :  { %v7697_v7 = vadd.f32 %v7696_v52, %v7654_v6  ;;  %v7738_v1 = vadd.f32 %v7737_v2, %v7695_v29  ;;  %v7750_v11 = vmax.f32 %v7736_v36, 0.0 }
 0x50d   :  { %v7739_v22 = vpop.f32.mrf.mxu1  ;;  %v7698_v54 = vpop.f32.mrf.mxu0 }
 0x50e   :  { %v7740_v25 = vadd.f32 %v7739_v22, %v7697_v7  ;;  %v7699_v51 = vadd.f32 %v7698_v54, %v7656_v62  ;;  %v7751_v47 = vmax.f32 %v7738_v1, 0.0 }
 0x50f   :  { %v7741_v58 = vpop.f32.mrf.mxu1 }
 0x510   :  { %v7742_v60 = vadd.f32 %v7741_v58, %v7699_v51  ;;  %v7758_v14 = vmax.f32 %v7740_v25, 0.0 }
 0x512   :  { %v7759_v53 = vmax.f32 %v7742_v60, 0.0  ;;  %v7766_v44 = vpack.c.bf16 %v7758_v14, %v7750_v11 }
 0x514   :  { %v7767_v38 = vpack.c.bf16 %v7759_v53, %v7751_v47 }
 0x516   :  { %8442 = vmatprep.mubr.bf16.mxu1 %v7767_v38 }
 0x517   :  { %8443 = vmatmul.mubr.bf16.vlgmr.msra.gmra.mxu1 %v7766_v44 }
 0x527   :  { %v9593_v26 = vpop.f32.mrf.mxu0 }
 0x529   :  { %v9594_v3 = vpop.f32.mrf.mxu0  ;;  %v9615_v8 = vpop.f32.mrf.mxu1 }
 0x52a   :  { %v9595_v57 = vadd.f32 %v9594_v3, %v9593_v26 }
 0x52b   :  { %v9596_v46 = vpop.f32.mrf.mxu0  ;;  %v9616_v10 = vpop.f32.mrf.mxu1 }
 0x52c   :  { %v8322_v55 = vadd.f32 %v9595_v57, %v9512_v48  ;;  %v9617_v45 = vadd.f32 %v9616_v10, %v9615_v8 }
 0x52d   :  { %v9597_v49 = vpop.f32.mrf.mxu0  ;;  %v9618_v59 = vpop.f32.mrf.mxu1 }
 0x52e   :  { %v9598_v35 = vadd.f32 %v9597_v49, %v9596_v46  ;;  %v8363_v34 = vadd.f32 %v9617_v45, %v8322_v55 }
 0x52f   :  { %v9619_v41 = vpop.f32.mrf.mxu1 }
 0x530   :  { %v8325_v4 = vadd.f32 %v9598_v35, %v9512_v48  ;;  %v9620_v15 = vadd.f32 %v9619_v41, %v9618_v59 }
 0x532   :  { %v8366_v5 = vadd.f32 %v9620_v15, %v8325_v4 }
 0x547   :  { %v9637_v21 = vpop.f32.mrf.mxu0 }
 0x549   :  { %v9638_v20 = vpop.f32.mrf.mxu0 }
 0x54a   :  { %v9639_v40 = vadd.f32 %v9638_v20, %v9637_v21 }
 0x54b   :  { %v9640_v12 = vpop.f32.mrf.mxu0 }
 0x54c   :  { %v8404_v33 = vadd.f32 %v9639_v40, %v8363_v34 }
 0x54d   :  { %v9641_v63 = vpop.f32.mrf.mxu0 }
 0x54e   :  { %v9642_v42 = vadd.f32 %v9641_v63, %v9640_v12 }
 0x550   :  { %v8407_v18 = vadd.f32 %v9642_v42, %v8366_v5 }
 0x5d7   :  { %v9659_v13 = vpop.f32.mrf.mxu1 }
 0x5d9   :  { %v9660_v61 = vpop.f32.mrf.mxu1 }
 0x5da   :  { %v9661_v24 = vadd.f32 %v9660_v61, %v9659_v13 }
 0x5db   :  { %v9662_v32 = vpop.f32.mrf.mxu1 }
 0x5dc   :  { %v8445_v28 = vadd.f32 %v9661_v24, %v8404_v33 }
 0x5dd   :  { %v9663_v19 = vpop.f32.mrf.mxu1 }
 0x5de   :  { %8451 = vst [vmem:[#allocation11] sm:$0xff] %v8445_v28  ;;  %v9664_v37 = vadd.f32 %v9663_v19, %v9662_v32 }
 0x5e0   :  { %v8448_v27 = vadd.f32 %v9664_v37, %v8407_v18 }
 0x5e2   :  { %8452 = vst [vmem:[#allocation11 + $0x8] sm:$0xff] %v8448_v27 }
 0x5e3   :  { %9854 = shalt.err (!%p9851_p1)
}
 0x5e4   :  { %s9882_s22 = smov 128   ;;  %s9883_s23 = smov 8  }
 0x5e5   :  { %8464 = dma.vmem_to_hbm [thread:$0]  %s8459_s4, 256, %s10359_s5, [#allocation4], %s9882_s22, %s9882_s22, %s9883_s23  }
 0x5e6   :  { %9869 = dma.done.wait [#allocation4], 256  }
 0x5e7   :  { %9870 = vsyncadd [#allocation4], 4294967040 }
 0x5e8   :  { %8468 = vsyncpa [#allocation3], 1 }
 0x5e9   :  { %8469 = vsyncpa [#allocation6], 1 }
 0x5ea   :  { %8470 = vsyncpa [#allocation9], 1 }
 0x5eb   :  { %8471 = vsyncpa [#allocation4], 1 }

</bundles_post_ra>
